<compile_context>
chip_gen: v6e
topology: v6e:2x2x1
jax: 0.10.0
libtpu: 0.0.40
codegen_flags: <defaults>
</compile_context>

<pallas_src>
import numpy as np
import jax
import jax.numpy as jnp
from jax import lax
from jax.experimental import pallas as pl
from jax.experimental.pallas import tpu as pltpu

NODES = 14          # real graph nodes
NPAD = 16           # node axis padded to 2 full sublanes for aligned dynamic slicing
HID = 12
HEADS = 3
HEAD_DIM = HID // HEADS  # 4

# row offsets inside the consolidated weight slabs (16-row aligned blocks)
OFF_WIH, OFF_WHH, OFF_WIN = 0, 16, 32          # in w36 slab (48, 36)
OFF_WO, OFF_GW, OFF_FC, OFF_HEAD = 0, 16, 32, 80  # in w12 slab (96, 12)
# rows inside the bias slabs
ROW_BIH, ROW_BHH, ROW_BIN = 0, 1, 2            # b36 slab (3, 36)
ROW_BO, ROW_GB, ROW_GCS, ROW_FCB, ROW_B2 = 0, 1, 2, 3, 4   # b12 slab (5, 12)

INNER_EDGE = np.array(
    [[0, 0, 0, 0, 11, 12, 13, 5, 6, 2, 8, 6, 9, 8, 5, 10],
     [1, 2, 3, 4, 1, 1, 1, 2, 2, 2, 3, 3, 3, 4, 4, 4]])
INNER_SUB_EDGE = np.array([[0, 0, 0, 0, 2], [1, 2, 3, 4, 3]])
REVERSE_EDGE = np.array([INNER_EDGE[1], INNER_EDGE[0]])


def gcn_dense_adj(edge_index, num_nodes):
    """Dense normalized adjacency matching torch_geometric GCNConv gcn_norm
    (add self loops, deg over targets, D^-1/2 on both endpoints)."""
    src = np.concatenate([edge_index[0], np.arange(num_nodes)])
    dst = np.concatenate([edge_index[1], np.arange(num_nodes)])
    deg = np.zeros(num_nodes, np.float64)
    np.add.at(deg, dst, 1.0)
    dinv = np.where(deg > 0, 1.0 / np.sqrt(deg), 0.0)
    A = np.zeros((num_nodes, num_nodes), np.float64)
    for s, d in zip(src, dst):
        A[d, s] += dinv[s] * dinv[d]
    return A.astype(np.float32)


# ----------------------------- Pallas kernel --------------------------------
def traffic_gnn_kernel(x_ref, w36_ref, b36_ref, w12_ref, b12_ref,
                       a1k_ref, sel_ref, out_ref, buf36, bufh):
    BN = x_ref.shape[0]          # B * NPAD (static)
    B = BN // NPAD
    f32 = jnp.float32
    unroll = True if B <= 8 else 4   # full unroll for small static B, partial otherwise

    # ---- one-time weight/bias loads (static slices of the two fused slabs) ----
    wih_t = w36_ref[OFF_WIH:OFF_WIH + HID, :]       # (12, 36)
    whh_t = w36_ref[OFF_WHH:OFF_WHH + HID, :]       # (12, 36)
    win_t = w36_ref[OFF_WIN:OFF_WIN + HID, :]       # (12, 36)
    bih = b36_ref[ROW_BIH:ROW_BIH + 1, :]
    bhh = b36_ref[ROW_BHH:ROW_BHH + 1, :]
    b_in = b36_ref[ROW_BIN:ROW_BIN + 1, :]

    # ---------------- phase 1: GRU (sequence axis == batch axis) ----------------
    # Hoisted input projection: ONE (B*16,12)x(12,36) matmul kept whole in one scratch.
    buf36[...] = jnp.dot(x_ref[...], wih_t, preferred_element_type=f32) + bih

    def gru_step(t, h):
        row = pl.multiple_of(t * NPAD, NPAD)
        gi = buf36[pl.ds(row, NPAD), :]                                     # (16, 36)
        gh = jnp.dot(h, whh_t, preferred_element_type=f32) + bhh           # ONE h-matmul / step
        rz = jax.nn.sigmoid(gi[:, 0:2 * HID] + gh[:, 0:2 * HID])           # ONE fused r|z sigmoid
        r = rz[:, 0:HID]
        z = rz[:, HID:2 * HID]
        n = jnp.tanh(gi[:, 2 * HID:] + r * gh[:, 2 * HID:])
        h_new = n + z * (h - n)                       # fewer VALU ops on the serial chain
        bufh[pl.ds(row, NPAD), :] = h_new             # GRU output for timestep t
        return h_new

    lax.fori_loop(0, B, gru_step, jnp.zeros((NPAD, HID), f32), unroll=unroll)

    # ---------------- phase 2: block-diagonal multi-head attention ----------------
    # Batched QKV projection for the whole batch at once (bufh holds the GRU outputs).
    buf36[...] = jnp.dot(bufh[...], win_t, preferred_element_type=f32) + b_in   # qkv slab

    # key padding mask built in-kernel (0 for real keys, -1e30 for padded nodes 14..15)
    kmask = jnp.where(lax.broadcasted_iota(jnp.int32, (1, NPAD), 1) < NODES,
                      0.0, -1e30).astype(f32)
    dn = (((1,), (1,)), ((), ()))    # contract q dim 1 with k dim 1 (no explicit transpose)
    q_scale = 1.0 / (HEAD_DIM ** 0.5)

    def attn_step(b, carry):
        row = pl.multiple_of(b * NPAD, NPAD)
        blk = buf36[pl.ds(row, NPAD), :]              # (16, 36) qkv block for sample b
        qm = blk[:, 0:HID] * q_scale
        km = blk[:, HID:2 * HID]
        vm = blk[:, 2 * HID:3 * HID]
        # 3 head score blocks stacked along sublanes -> ONE masked softmax for all heads.
        s = jnp.concatenate(
            [lax.dot_general(qm[:, h * HEAD_DIM:(h + 1) * HEAD_DIM],
                             km[:, h * HEAD_DIM:(h + 1) * HEAD_DIM], dn,
                             preferred_element_type=f32)
             for h in range(HEADS)], axis=0) + kmask                         # (48, 16)
        s = s - jnp.max(s, axis=-1, keepdims=True)
        p = jnp.exp(s)
        p = p * pl.reciprocal(jnp.sum(p, axis=-1, keepdims=True), approx=True)
        ctx = jnp.concatenate(
            [jnp.dot(p[h * NPAD:(h + 1) * NPAD, :],
                     vm[:, h * HEAD_DIM:(h + 1) * HEAD_DIM],
                     preferred_element_type=f32)
             for h in range(HEADS)], axis=-1)                                # (16, 12)
        bufh[pl.ds(row, NPAD), :] = ctx               # GRU outputs dead -> reuse for ctx
        return carry

    lax.fori_loop(0, B, attn_step, 0, unroll=unroll)

    # ---------------- phase 2 tail: fully batched GCN propagation + fused heads ----------------
    wo_t = w12_ref[OFF_WO:OFF_WO + HID, :]            # (12, 12)
    gw_t = w12_ref[OFF_GW:OFF_GW + HID, :]            # (12, 12)
    fcw_t = w12_ref[OFF_FC:OFF_FC + 3 * HID, :]       # (36, 12)
    w2 = w12_ref[OFF_HEAD:OFF_HEAD + HID, :]          # (12, 12), only lanes 0:2 nonzero
    bo = b12_ref[ROW_BO:ROW_BO + 1, :]
    gb = b12_ref[ROW_GB:ROW_GB + 1, :]
    gcs = b12_ref[ROW_GCS:ROW_GCS + 1, :]             # colsum(gcn_w^T) for the sub-graph branch
    fcb = b12_ref[ROW_FCB:ROW_FCB + 1, :]
    b2 = b12_ref[ROW_B2:ROW_B2 + 1, :]
    sel = sel_ref[...]                                # (3B, B*16) node-0 selectors

    att = jnp.dot(bufh[...], wo_t, preferred_element_type=f32) + bo         # (B*16, 12)
    hlin = jnp.dot(att, gw_t, preferred_element_type=f32)                   # (B*16, 12)
    # block-diagonal inner-edge GCN across all samples in one MXU matmul
    ige = jnp.dot(a1k_ref[...], hlin, preferred_element_type=f32) + gb      # (B*16, 12)
    # global_max_pool + global_mean_pool over the feature axis (per node)
    pooled = (jnp.max(ige, axis=-1, keepdims=True) +
              jnp.sum(ige, axis=-1, keepdims=True) * (1.0 / HID))           # (B*16, 1)

    # node-0 gathers as tiny selector matmuls (padded node columns are zero in the selectors,
    # so the non-zero bias in padded `ige` rows never leaks into sub0).
    att0 = jnp.dot(sel[0:B, :], att, preferred_element_type=f32)                       # (B, 12)
    rev0 = jnp.dot(sel[B:2 * B, :], hlin, preferred_element_type=f32) + gb             # (B, 12)
    # sub-graph GCN @ node 0: pooled is feature-constant, so pooled @ W == pooled_col * colsum(W)
    sub0 = jnp.dot(sel[2 * B:3 * B, :], pooled * gcs, preferred_element_type=f32) + gb  # (B, 12)

    fusion = jnp.concatenate([att0, sub0, rev0], axis=-1)                   # (B, 36)
    # TODO(synk): F.dropout / attention dropout omitted (inference-mode forward).
    hfc = jnp.dot(jnp.maximum(fusion, 0.0), fcw_t, preferred_element_type=f32) + fcb   # (B, 12)
    head = jnp.dot(hfc, w2, preferred_element_type=f32) + b2                # (B, 12), lanes 0:2 = (f, q)
    out_ref[...] = head[:, 0:2]                                             # ONE dense output store


# ------------------------------ glue / wrapper -------------------------------
def make_params(key):
    ks = jax.random.split(key, 16)
    rnd = lambda k, shape, s=0.1: s * jax.random.normal(k, shape, dtype=jnp.float32)
    return {
        'gru_wih': rnd(ks[0], (36, 12)), 'gru_whh': rnd(ks[1], (36, 12)),
        'gru_bih': rnd(ks[2], (36,)), 'gru_bhh': rnd(ks[3], (36,)),
        'attn_win': rnd(ks[4], (36, 12)), 'attn_bin': rnd(ks[5], (36,)),
        'attn_wo': rnd(ks[6], (12, 12)), 'attn_bo': rnd(ks[7], (12,)),
        'gcn_w': rnd(ks[8], (12, 12)), 'gcn_b': rnd(ks[9], (12,)),
        'fc_w': rnd(ks[10], (12, 36)), 'fc_b': rnd(ks[11], (12,)),
        'fcf_w': rnd(ks[12], (1, 12)), 'fcf_b': rnd(ks[13], (1,)),
        'fcq_w': rnd(ks[14], (1, 12)), 'fcq_b': rnd(ks[15], (1,)),
    }


def traffic_gnn_pallas(x_flat, p, A1, A2, A3P):
    B = x_flat.shape[0]
    # kron(I_B, A1) / selectors grow O(B^2) (~1 KiB * B^2): fine up to B~64; for larger batches
    # switch to a per-sample adjacency loop or the lane-concatenated (16, B*12) layout.
    assert B <= 64, "block-diagonal adjacency constant grows O(B^2); use the per-sample path"

    x = x_flat.reshape(B, NODES, HID)                      # x.view(B, 14, x.shape[1] // 14)
    x2 = jnp.pad(x, ((0, 0), (0, NPAD - NODES), (0, 0))).reshape(B * NPAD, HID)

    pad2 = lambda a: jnp.pad(a, ((0, NPAD - NODES), (0, NPAD - NODES)))
    A1p, A2p, A3Pp = pad2(A1), pad2(A2), pad2(A3P)

    eyeB = jnp.eye(B, dtype=jnp.float32)
    a1k = jnp.kron(eyeB, A1p)                              # (B*16, B*16) block-diag inner GCN
    e0 = jnp.zeros((1, NPAD), jnp.float32).at[0, 0].set(1.0)
    sel = jnp.concatenate([jnp.kron(eyeB, e0),             # node-0 attention-row gather
                           jnp.kron(eyeB, A3Pp[0:1, :]),   # reverse-edge GCN, row 0 per sample
                           jnp.kron(eyeB, A2p[0:1, :])],   # sub-graph GCN, row 0 per sample
                          axis=0)                          # (3B, B*16)

    pad_rows = lambda a, rows: jnp.pad(a, ((0, rows - a.shape[0]), (0, 0)))
    gw_t = p['gcn_w'].T
    w2 = jnp.pad(jnp.concatenate([p['fcf_w'].T, p['fcq_w'].T], axis=1), ((0, 0), (0, HID - 2)))
    b2 = jnp.pad(jnp.concatenate([p['fcf_b'], p['fcq_b']]), (0, HID - 2))

    # consolidated operands: 2 weight slabs + 2 bias slabs (7 DMAs total instead of ~23)
    w36 = jnp.concatenate([pad_rows(p['gru_wih'].T, 16),
                           pad_rows(p['gru_whh'].T, 16),
                           pad_rows(p['attn_win'].T, 16)], axis=0)           # (48, 36)
    b36 = jnp.stack([p['gru_bih'], p['gru_bhh'], p['attn_bin']], axis=0)     # (3, 36)
    w12 = jnp.concatenate([pad_rows(p['attn_wo'].T, 16),
                           pad_rows(gw_t, 16),
                           pad_rows(p['fc_w'].T, 48),
                           pad_rows(w2, 16)], axis=0)                        # (96, 12)
    b12 = jnp.stack([p['attn_bo'], p['gcn_b'], jnp.sum(gw_t, axis=0),
                     p['fc_b'], b2], axis=0)                                 # (5, 12)

    args = (x2, w36, b36, w12, b12, a1k, sel)
    vmem = pl.BlockSpec(memory_space=pltpu.MemorySpace.VMEM)

    out = pl.pallas_call(
        traffic_gnn_kernel,
        out_shape=jax.ShapeDtypeStruct((B, 2), jnp.float32),
        in_specs=[vmem] * len(args),
        out_specs=vmem,
        scratch_shapes=[pltpu.VMEM((B * NPAD, 3 * HID), jnp.float32),   # gi, then qkv
                        pltpu.VMEM((B * NPAD, HID), jnp.float32)],      # GRU out, then ctx
        compiler_params=pltpu.CompilerParams(vmem_limit_bytes=32 * 1024 * 1024),
    )(*args)
    return out[:, 0:1], out[:, 1:2]


# -------------------------- pure-JAX reference (check) -----------------------
def reference_forward(x_flat, p, A1, A2, A3P):
    B = x_flat.shape[0]
    x = x_flat.reshape(B, NODES, HID)
    h = jnp.zeros((NODES, HID), jnp.float32)
    embs = []
    for t in range(B):
        gi = x[t] @ p['gru_wih'].T + p['gru_bih']
        gh = h @ p['gru_whh'].T + p['gru_bhh']
        r = jax.nn.sigmoid(gi[:, :12] + gh[:, :12])
        z = jax.nn.sigmoid(gi[:, 12:24] + gh[:, 12:24])
        n = jnp.tanh(gi[:, 24:] + r * gh[:, 24:])
        h = (1.0 - z) * n + z * h
        embs.append(h)
    fs, qs = [], []
    for b in range(B):
        xb = embs[b]
        qkv = xb @ p['attn_win'].T + p['attn_bin']
        qm = qkv[:, :12] / (HEAD_DIM ** 0.5)
        km = qkv[:, 12:24]
        vm = qkv[:, 24:]
        heads = []
        for hh in range(HEADS):
            sl = slice(hh * HEAD_DIM, (hh + 1) * HEAD_DIM)
            s = qm[:, sl] @ km[:, sl].T
            heads.append(jax.nn.softmax(s, axis=-1) @ vm[:, sl])
        att = jnp.concatenate(heads, -1) @ p['attn_wo'].T + p['attn_bo']
        hlin = att @ p['gcn_w'].T
        ige = A1 @ hlin + p['gcn_b']
        pooled = jnp.max(ige, -1, keepdims=True) + jnp.mean(ige, -1, keepdims=True)
        pooled = jnp.broadcast_to(pooled, (NODES, HID))
        sub = A2 @ (pooled @ p['gcn_w'].T) + p['gcn_b']
        rev = A3P @ hlin + p['gcn_b']
        fusion = jnp.concatenate([att[0], sub[0], rev[0]], -1)
        xr = jnp.maximum(fusion, 0.0)
        hfc = xr @ p['fc_w'].T + p['fc_b']
        fs.append(hfc @ p['fcf_w'].T + p['fcf_b'])
        qs.append(hfc @ p['fcq_w'].T + p['fcq_b'])
    return jnp.stack(fs), jnp.stack(qs)


if __name__ == "__main__":
    B = 4
    key = jax.random.PRNGKey(0)
    kx, kp = jax.random.split(key)
    x_flat = jax.random.normal(kx, (B, NODES * HID), jnp.float32)  # [B, 168]
    params = make_params(kp)

    A1 = jnp.asarray(gcn_dense_adj(INNER_EDGE, NODES))
    A2 = jnp.asarray(gcn_dense_adj(INNER_SUB_EDGE, NODES))
    P_flip = jnp.asarray(np.eye(NODES, dtype=np.float32)[::-1].copy())
    A3P = jnp.asarray(gcn_dense_adj(REVERSE_EDGE, NODES)) @ P_flip   # fold fliplr into adjacency

    f, q = traffic_gnn_pallas(x_flat, params, A1, A2, A3P)
    jax.block_until_ready((f, q))

    f_ref, q_ref = reference_forward(x_flat, params, A1, A2, A3P)
    np.testing.assert_allclose(np.asarray(f), np.asarray(f_ref), rtol=2e-2, atol=2e-3)
    np.testing.assert_allclose(np.asarray(q), np.asarray(q_ref), rtol=2e-2, atol=2e-3)
    print("KERNEL_OK")
</pallas_src>

<mosaic_0001>
module attributes {stable_mosaic.version = 11 : i64} {
  func.func @traffic_gnn_kernel(%arg0: memref<64x12xf32, #tpu.memory_space<vmem>>, %arg1: memref<48x36xf32, #tpu.memory_space<vmem>>, %arg2: memref<3x36xf32, #tpu.memory_space<vmem>>, %arg3: memref<96x12xf32, #tpu.memory_space<vmem>>, %arg4: memref<5x12xf32, #tpu.memory_space<vmem>>, %arg5: memref<64x64xf32, #tpu.memory_space<vmem>>, %arg6: memref<12x64xf32, #tpu.memory_space<vmem>>, %arg7: memref<4x2xf32, #tpu.memory_space<vmem>>, %arg8: memref<64x36xf32, #tpu.memory_space<vmem>>, %arg9: memref<64x12xf32, #tpu.memory_space<vmem>>) attributes {dimension_semantics = [], scalar_prefetch = 0 : i64, scratch_operands = 2 : i64, tpu.core_type = #tpu.core_type<tc>} {
    %c0 = arith.constant 0 : index
    %c0_0 = arith.constant 0 : index
    %0 = vector.load %arg1[%c0, %c0_0] : memref<48x36xf32, #tpu.memory_space<vmem>>, vector<12x36xf32>
    %c16 = arith.constant 16 : index
    %c0_1 = arith.constant 0 : index
    %1 = vector.load %arg1[%c16, %c0_1] : memref<48x36xf32, #tpu.memory_space<vmem>>, vector<12x36xf32>
    %c32 = arith.constant 32 : index
    %c0_2 = arith.constant 0 : index
    %2 = vector.load %arg1[%c32, %c0_2] : memref<48x36xf32, #tpu.memory_space<vmem>>, vector<12x36xf32>
    %c0_3 = arith.constant 0 : index
    %c0_4 = arith.constant 0 : index
    %3 = vector.load %arg2[%c0_3, %c0_4] : memref<3x36xf32, #tpu.memory_space<vmem>>, vector<1x36xf32>
    %c1 = arith.constant 1 : index
    %c0_5 = arith.constant 0 : index
    %4 = vector.load %arg2[%c1, %c0_5] : memref<3x36xf32, #tpu.memory_space<vmem>>, vector<1x36xf32>
    %c2 = arith.constant 2 : index
    %c0_6 = arith.constant 0 : index
    %5 = vector.load %arg2[%c2, %c0_6] : memref<3x36xf32, #tpu.memory_space<vmem>>, vector<1x36xf32>
    %c0_7 = arith.constant 0 : index
    %c0_8 = arith.constant 0 : index
    %6 = vector.load %arg0[%c0_7, %c0_8] : memref<64x12xf32, #tpu.memory_space<vmem>>, vector<64x12xf32>
    %cst = arith.constant dense<0.000000e+00> : vector<64x36xf32>
    %7 = tpu.matmul %6, %0, %cst {dimension_numbers = #tpu.dot_dimension_numbers<[1], [0], [0], [1], [0, 0, 1, 1], [], []>} : vector<64x12xf32>, vector<12x36xf32>, vector<64x36xf32> -> vector<64x36xf32>
    %8 = vector.broadcast %3 : vector<1x36xf32> to vector<64x36xf32>
    %9 = arith.addf %7, %8 : vector<64x36xf32>
    %c0_9 = arith.constant 0 : index
    %c0_10 = arith.constant 0 : index
    %10 = vector.load %arg8[%c0_9, %c0_10] : memref<64x36xf32, #tpu.memory_space<vmem>>, vector<64x36xf32>
    tpu.vector_store %arg8[%c0_9, %c0_10], %9 {strides = array<i32>} : memref<64x36xf32, #tpu.memory_space<vmem>>, vector<64x36xf32>,
    %cst_11 = arith.constant 0.000000e+00 : f32
    %11 = vector.broadcast %cst_11 : f32 to vector<16x12xf32>
    %c0_i32 = arith.constant 0 : i32
    %c16_i32 = arith.constant 16 : i32
    %12 = arith.muli %c0_i32, %c16_i32 : i32
    %13 = tpu.assume_multiple %12, 16 : i32
    %14 = arith.index_cast %13 : i32 to index
    %c0_12 = arith.constant 0 : index
    %15 = vector.load %arg8[%14, %c0_12] : memref<64x36xf32, #tpu.memory_space<vmem>>, vector<16x36xf32>
    %cst_13 = arith.constant dense<0.000000e+00> : vector<16x36xf32>
    %16 = tpu.matmul %11, %1, %cst_13 {dimension_numbers = #tpu.dot_dimension_numbers<[1], [0], [0], [1], [0, 0, 1, 1], [], []>} : vector<16x12xf32>, vector<12x36xf32>, vector<16x36xf32> -> vector<16x36xf32>
    %17 = vector.broadcast %4 : vector<1x36xf32> to vector<16x36xf32>
    %18 = arith.addf %16, %17 : vector<16x36xf32>
    %19 = vector.extract_strided_slice %15 {offsets = [0, 0], sizes = [16, 24], strides = [1, 1]} : vector<16x36xf32> to vector<16x24xf32>
    %20 = vector.extract_strided_slice %18 {offsets = [0, 0], sizes = [16, 24], strides = [1, 1]} : vector<16x36xf32> to vector<16x24xf32>
    %21 = arith.addf %19, %20 : vector<16x24xf32>
    %22 = arith.negf %21 : vector<16x24xf32>
    %23 = math.exp %22 : vector<16x24xf32>
    %cst_14 = arith.constant 1.000000e+00 : f32
    %24 = vector.broadcast %cst_14 : f32 to vector<16x24xf32>
    %25 = arith.addf %24, %23 : vector<16x24xf32>
    %26 = arith.divf %24, %25 : vector<16x24xf32>
    %27 = vector.extract_strided_slice %26 {offsets = [0, 0], sizes = [16, 12], strides = [1, 1]} : vector<16x24xf32> to vector<16x12xf32>
    %28 = vector.extract_strided_slice %26 {offsets = [0, 12], sizes = [16, 12], strides = [1, 1]} : vector<16x24xf32> to vector<16x12xf32>
    %29 = vector.extract_strided_slice %15 {offsets = [0, 24], sizes = [16, 12], strides = [1, 1]} : vector<16x36xf32> to vector<16x12xf32>
    %30 = vector.extract_strided_slice %18 {offsets = [0, 24], sizes = [16, 12], strides = [1, 1]} : vector<16x36xf32> to vector<16x12xf32>
    %31 = arith.mulf %27, %30 : vector<16x12xf32>
    %32 = arith.addf %29, %31 : vector<16x12xf32>
    %33 = math.tanh %32 : vector<16x12xf32>
    %34 = arith.subf %11, %33 : vector<16x12xf32>
    %35 = arith.mulf %28, %34 : vector<16x12xf32>
    %36 = arith.addf %33, %35 : vector<16x12xf32>
    %37 = arith.index_cast %13 : i32 to index
    %c0_15 = arith.constant 0 : index
    %38 = vector.load %arg9[%37, %c0_15] : memref<64x12xf32, #tpu.memory_space<vmem>>, vector<16x12xf32>
    tpu.vector_store %arg9[%37, %c0_15], %36 {strides = array<i32>} : memref<64x12xf32, #tpu.memory_space<vmem>>, vector<16x12xf32>,
    %c1_i32 = arith.constant 1 : i32
    %c16_i32_16 = arith.constant 16 : i32
    %39 = arith.muli %c1_i32, %c16_i32_16 : i32
    %40 = tpu.assume_multiple %39, 16 : i32
    %41 = arith.index_cast %40 : i32 to index
    %c0_17 = arith.constant 0 : index
    %42 = vector.load %arg8[%41, %c0_17] : memref<64x36xf32, #tpu.memory_space<vmem>>, vector<16x36xf32>
    %cst_18 = arith.constant dense<0.000000e+00> : vector<16x36xf32>
    %43 = tpu.matmul %36, %1, %cst_18 {dimension_numbers = #tpu.dot_dimension_numbers<[1], [0], [0], [1], [0, 0, 1, 1], [], []>} : vector<16x12xf32>, vector<12x36xf32>, vector<16x36xf32> -> vector<16x36xf32>
    %44 = vector.broadcast %4 : vector<1x36xf32> to vector<16x36xf32>
    %45 = arith.addf %43, %44 : vector<16x36xf32>
    %46 = vector.extract_strided_slice %42 {offsets = [0, 0], sizes = [16, 24], strides = [1, 1]} : vector<16x36xf32> to vector<16x24xf32>
    %47 = vector.extract_strided_slice %45 {offsets = [0, 0], sizes = [16, 24], strides = [1, 1]} : vector<16x36xf32> to vector<16x24xf32>
    %48 = arith.addf %46, %47 : vector<16x24xf32>
    %49 = arith.negf %48 : vector<16x24xf32>
    %50 = math.exp %49 : vector<16x24xf32>
    %cst_19 = arith.constant 1.000000e+00 : f32
    %51 = vector.broadcast %cst_19 : f32 to vector<16x24xf32>
    %52 = arith.addf %51, %50 : vector<16x24xf32>
    %53 = arith.divf %51, %52 : vector<16x24xf32>
    %54 = vector.extract_strided_slice %53 {offsets = [0, 0], sizes = [16, 12], strides = [1, 1]} : vector<16x24xf32> to vector<16x12xf32>
    %55 = vector.extract_strided_slice %53 {offsets = [0, 12], sizes = [16, 12], strides = [1, 1]} : vector<16x24xf32> to vector<16x12xf32>
    %56 = vector.extract_strided_slice %42 {offsets = [0, 24], sizes = [16, 12], strides = [1, 1]} : vector<16x36xf32> to vector<16x12xf32>
    %57 = vector.extract_strided_slice %45 {offsets = [0, 24], sizes = [16, 12], strides = [1, 1]} : vector<16x36xf32> to vector<16x12xf32>
    %58 = arith.mulf %54, %57 : vector<16x12xf32>
    %59 = arith.addf %56, %58 : vector<16x12xf32>
    %60 = math.tanh %59 : vector<16x12xf32>
    %61 = arith.subf %36, %60 : vector<16x12xf32>
    %62 = arith.mulf %55, %61 : vector<16x12xf32>
    %63 = arith.addf %60, %62 : vector<16x12xf32>
    %64 = arith.index_cast %40 : i32 to index
    %c0_20 = arith.constant 0 : index
    %65 = vector.load %arg9[%64, %c0_20] : memref<64x12xf32, #tpu.memory_space<vmem>>, vector<16x12xf32>
    tpu.vector_store %arg9[%64, %c0_20], %63 {strides = array<i32>} : memref<64x12xf32, #tpu.memory_space<vmem>>, vector<16x12xf32>,
    %c2_i32 = arith.constant 2 : i32
    %c16_i32_21 = arith.constant 16 : i32
    %66 = arith.muli %c2_i32, %c16_i32_21 : i32
    %67 = tpu.assume_multiple %66, 16 : i32
    %68 = arith.index_cast %67 : i32 to index
    %c0_22 = arith.constant 0 : index
    %69 = vector.load %arg8[%68, %c0_22] : memref<64x36xf32, #tpu.memory_space<vmem>>, vector<16x36xf32>
    %cst_23 = arith.constant dense<0.000000e+00> : vector<16x36xf32>
    %70 = tpu.matmul %63, %1, %cst_23 {dimension_numbers = #tpu.dot_dimension_numbers<[1], [0], [0], [1], [0, 0, 1, 1], [], []>} : vector<16x12xf32>, vector<12x36xf32>, vector<16x36xf32> -> vector<16x36xf32>
    %71 = vector.broadcast %4 : vector<1x36xf32> to vector<16x36xf32>
    %72 = arith.addf %70, %71 : vector<16x36xf32>
    %73 = vector.extract_strided_slice %69 {offsets = [0, 0], sizes = [16, 24], strides = [1, 1]} : vector<16x36xf32> to vector<16x24xf32>
    %74 = vector.extract_strided_slice %72 {offsets = [0, 0], sizes = [16, 24], strides = [1, 1]} : vector<16x36xf32> to vector<16x24xf32>
    %75 = arith.addf %73, %74 : vector<16x24xf32>
    %76 = arith.negf %75 : vector<16x24xf32>
    %77 = math.exp %76 : vector<16x24xf32>
    %cst_24 = arith.constant 1.000000e+00 : f32
    %78 = vector.broadcast %cst_24 : f32 to vector<16x24xf32>
    %79 = arith.addf %78, %77 : vector<16x24xf32>
    %80 = arith.divf %78, %79 : vector<16x24xf32>
    %81 = vector.extract_strided_slice %80 {offsets = [0, 0], sizes = [16, 12], strides = [1, 1]} : vector<16x24xf32> to vector<16x12xf32>
    %82 = vector.extract_strided_slice %80 {offsets = [0, 12], sizes = [16, 12], strides = [1, 1]} : vector<16x24xf32> to vector<16x12xf32>
    %83 = vector.extract_strided_slice %69 {offsets = [0, 24], sizes = [16, 12], strides = [1, 1]} : vector<16x36xf32> to vector<16x12xf32>
    %84 = vector.extract_strided_slice %72 {offsets = [0, 24], sizes = [16, 12], strides = [1, 1]} : vector<16x36xf32> to vector<16x12xf32>
    %85 = arith.mulf %81, %84 : vector<16x12xf32>
    %86 = arith.addf %83, %85 : vector<16x12xf32>
    %87 = math.tanh %86 : vector<16x12xf32>
    %88 = arith.subf %63, %87 : vector<16x12xf32>
    %89 = arith.mulf %82, %88 : vector<16x12xf32>
    %90 = arith.addf %87, %89 : vector<16x12xf32>
    %91 = arith.index_cast %67 : i32 to index
    %c0_25 = arith.constant 0 : index
    %92 = vector.load %arg9[%91, %c0_25] : memref<64x12xf32, #tpu.memory_space<vmem>>, vector<16x12xf32>
    tpu.vector_store %arg9[%91, %c0_25], %90 {strides = array<i32>} : memref<64x12xf32, #tpu.memory_space<vmem>>, vector<16x12xf32>,
    %c3_i32 = arith.constant 3 : i32
    %c16_i32_26 = arith.constant 16 : i32
    %93 = arith.muli %c3_i32, %c16_i32_26 : i32
    %94 = tpu.assume_multiple %93, 16 : i32
    %95 = arith.index_cast %94 : i32 to index
    %c0_27 = arith.constant 0 : index
    %96 = vector.load %arg8[%95, %c0_27] : memref<64x36xf32, #tpu.memory_space<vmem>>, vector<16x36xf32>
    %cst_28 = arith.constant dense<0.000000e+00> : vector<16x36xf32>
    %97 = tpu.matmul %90, %1, %cst_28 {dimension_numbers = #tpu.dot_dimension_numbers<[1], [0], [0], [1], [0, 0, 1, 1], [], []>} : vector<16x12xf32>, vector<12x36xf32>, vector<16x36xf32> -> vector<16x36xf32>
    %98 = vector.broadcast %4 : vector<1x36xf32> to vector<16x36xf32>
    %99 = arith.addf %97, %98 : vector<16x36xf32>
    %100 = vector.extract_strided_slice %96 {offsets = [0, 0], sizes = [16, 24], strides = [1, 1]} : vector<16x36xf32> to vector<16x24xf32>
    %101 = vector.extract_strided_slice %99 {offsets = [0, 0], sizes = [16, 24], strides = [1, 1]} : vector<16x36xf32> to vector<16x24xf32>
    %102 = arith.addf %100, %101 : vector<16x24xf32>
    %103 = arith.negf %102 : vector<16x24xf32>
    %104 = math.exp %103 : vector<16x24xf32>
    %cst_29 = arith.constant 1.000000e+00 : f32
    %105 = vector.broadcast %cst_29 : f32 to vector<16x24xf32>
    %106 = arith.addf %105, %104 : vector<16x24xf32>
    %107 = arith.divf %105, %106 : vector<16x24xf32>
    %108 = vector.extract_strided_slice %107 {offsets = [0, 0], sizes = [16, 12], strides = [1, 1]} : vector<16x24xf32> to vector<16x12xf32>
    %109 = vector.extract_strided_slice %107 {offsets = [0, 12], sizes = [16, 12], strides = [1, 1]} : vector<16x24xf32> to vector<16x12xf32>
    %110 = vector.extract_strided_slice %96 {offsets = [0, 24], sizes = [16, 12], strides = [1, 1]} : vector<16x36xf32> to vector<16x12xf32>
    %111 = vector.extract_strided_slice %99 {offsets = [0, 24], sizes = [16, 12], strides = [1, 1]} : vector<16x36xf32> to vector<16x12xf32>
    %112 = arith.mulf %108, %111 : vector<16x12xf32>
    %113 = arith.addf %110, %112 : vector<16x12xf32>
    %114 = math.tanh %113 : vector<16x12xf32>
    %115 = arith.subf %90, %114 : vector<16x12xf32>
    %116 = arith.mulf %109, %115 : vector<16x12xf32>
    %117 = arith.addf %114, %116 : vector<16x12xf32>
    %118 = arith.index_cast %94 : i32 to index
    %c0_30 = arith.constant 0 : index
    %119 = vector.load %arg9[%118, %c0_30] : memref<64x12xf32, #tpu.memory_space<vmem>>, vector<16x12xf32>
    tpu.vector_store %arg9[%118, %c0_30], %117 {strides = array<i32>} : memref<64x12xf32, #tpu.memory_space<vmem>>, vector<16x12xf32>,
    %c4_i32 = arith.constant 4 : i32
    %c0_31 = arith.constant 0 : index
    %c0_32 = arith.constant 0 : index
    %120 = vector.load %arg9[%c0_31, %c0_32] : memref<64x12xf32, #tpu.memory_space<vmem>>, vector<64x12xf32>
    %cst_33 = arith.constant dense<0.000000e+00> : vector<64x36xf32>
    %121 = tpu.matmul %120, %2, %cst_33 {dimension_numbers = #tpu.dot_dimension_numbers<[1], [0], [0], [1], [0, 0, 1, 1], [], []>} : vector<64x12xf32>, vector<12x36xf32>, vector<64x36xf32> -> vector<64x36xf32>
    %122 = vector.broadcast %5 : vector<1x36xf32> to vector<64x36xf32>
    %123 = arith.addf %121, %122 : vector<64x36xf32>
    %c0_34 = arith.constant 0 : index
    %c0_35 = arith.constant 0 : index
    %124 = vector.load %arg8[%c0_34, %c0_35] : memref<64x36xf32, #tpu.memory_space<vmem>>, vector<64x36xf32>
    tpu.vector_store %arg8[%c0_34, %c0_35], %123 {strides = array<i32>} : memref<64x36xf32, #tpu.memory_space<vmem>>, vector<64x36xf32>,
    %125 = tpu.iota {dimensions = array<i32: 1>} : vector<1x16xi32>
    %c14_i32 = arith.constant 14 : i32
    %126 = vector.broadcast %c14_i32 : i32 to vector<1x16xi32>
    %127 = arith.cmpi slt, %125, %126 : vector<1x16xi32>
    %cst_36 = arith.constant 0.000000e+00 : f32
    %cst_37 = arith.constant -1.000000e+30 : f32
    %128 = vector.broadcast %cst_36 : f32 to vector<1x16xf32>
    %129 = vector.broadcast %cst_37 : f32 to vector<1x16xf32>
    %130 = arith.select %127, %128, %129 : vector<1x16xi1>, vector<1x16xf32>
    %c0_i32_38 = arith.constant 0 : i32
    %c16_i32_39 = arith.constant 16 : i32
    %131 = arith.muli %c0_i32_38, %c16_i32_39 : i32
    %132 = tpu.assume_multiple %131, 16 : i32
    %133 = arith.index_cast %132 : i32 to index
    %c0_40 = arith.constant 0 : index
    %134 = vector.load %arg8[%133, %c0_40] : memref<64x36xf32, #tpu.memory_space<vmem>>, vector<16x36xf32>
    %135 = vector.extract_strided_slice %134 {offsets = [0, 0], sizes = [16, 12], strides = [1, 1]} : vector<16x36xf32> to vector<16x12xf32>
    %cst_41 = arith.constant 5.000000e-01 : f32
    %136 = vector.broadcast %cst_41 : f32 to vector<16x12xf32>
    %137 = arith.mulf %135, %136 : vector<16x12xf32>
    %138 = vector.extract_strided_slice %134 {offsets = [0, 12], sizes = [16, 12], strides = [1, 1]} : vector<16x36xf32> to vector<16x12xf32>
    %139 = vector.extract_strided_slice %134 {offsets = [0, 24], sizes = [16, 12], strides = [1, 1]} : vector<16x36xf32> to vector<16x12xf32>
    %140 = vector.extract_strided_slice %137 {offsets = [0, 0], sizes = [16, 4], strides = [1, 1]} : vector<16x12xf32> to vector<16x4xf32>
    %141 = vector.extract_strided_slice %138 {offsets = [0, 0], sizes = [16, 4], strides = [1, 1]} : vector<16x12xf32> to vector<16x4xf32>
    %cst_42 = arith.constant dense<0.000000e+00> : vector<16x16xf32>
    %142 = tpu.matmul %140, %141, %cst_42 {dimension_numbers = #tpu.dot_dimension_numbers<[1], [1], [0], [0], [0, 0, 1, 0], [], []>} : vector<16x4xf32>, vector<16x4xf32>, vector<16x16xf32> -> vector<16x16xf32>
    %143 = vector.extract_strided_slice %137 {offsets = [0, 4], sizes = [16, 4], strides = [1, 1]} : vector<16x12xf32> to vector<16x4xf32>
    %144 = vector.extract_strided_slice %138 {offsets = [0, 4], sizes = [16, 4], strides = [1, 1]} : vector<16x12xf32> to vector<16x4xf32>
    %cst_43 = arith.constant dense<0.000000e+00> : vector<16x16xf32>
    %145 = tpu.matmul %143, %144, %cst_43 {dimension_numbers = #tpu.dot_dimension_numbers<[1], [1], [0], [0], [0, 0, 1, 0], [], []>} : vector<16x4xf32>, vector<16x4xf32>, vector<16x16xf32> -> vector<16x16xf32>
    %146 = vector.extract_strided_slice %137 {offsets = [0, 8], sizes = [16, 4], strides = [1, 1]} : vector<16x12xf32> to vector<16x4xf32>
    %147 = vector.extract_strided_slice %138 {offsets = [0, 8], sizes = [16, 4], strides = [1, 1]} : vector<16x12xf32> to vector<16x4xf32>
    %cst_44 = arith.constant dense<0.000000e+00> : vector<16x16xf32>
    %148 = tpu.matmul %146, %147, %cst_44 {dimension_numbers = #tpu.dot_dimension_numbers<[1], [1], [0], [0], [0, 0, 1, 0], [], []>} : vector<16x4xf32>, vector<16x4xf32>, vector<16x16xf32> -> vector<16x16xf32>
    %149 = tpu.concatenate %142, %145, %148 in 0 : vector<16x16xf32>, vector<16x16xf32>, vector<16x16xf32> -> vector<48x16xf32>
    %150 = vector.broadcast %130 : vector<1x16xf32> to vector<48x16xf32>
    %151 = arith.addf %149, %150 : vector<48x16xf32>
    %cst_45 = arith.constant dense<0xFF800000> : vector<48xf32>
    %152 = vector.multi_reduction <maximumf>, %151, %cst_45 [1] : vector<48x16xf32> to vector<48xf32>
    %153 = vector.shape_cast %152 : vector<48xf32> to vector<48x1xf32>
    %154 = vector.broadcast %153 : vector<48x1xf32> to vector<48x16xf32>
    %155 = arith.subf %151, %154 : vector<48x16xf32>
    %156 = math.exp %155 : vector<48x16xf32>
    %cst_46 = arith.constant dense<0.000000e+00> : vector<48xf32>
    %157 = vector.multi_reduction <add>, %156, %cst_46 [1] : vector<48x16xf32> to vector<48xf32>
    %158 = vector.shape_cast %157 : vector<48xf32> to vector<48x1xf32>
    %159 = tpu.reciprocal %158 {approx = true} : vector<48x1xf32> -> vector<48x1xf32>
    %160 = vector.broadcast %159 : vector<48x1xf32> to vector<48x16xf32>
    %161 = arith.mulf %156, %160 : vector<48x16xf32>
    %162 = vector.extract_strided_slice %161 {offsets = [0, 0], sizes = [16, 16], strides = [1, 1]} : vector<48x16xf32> to vector<16x16xf32>
    %163 = vector.extract_strided_slice %139 {offsets = [0, 0], sizes = [16, 4], strides = [1, 1]} : vector<16x12xf32> to vector<16x4xf32>
    %cst_47 = arith.constant dense<0.000000e+00> : vector<16x4xf32>
    %164 = tpu.matmul %162, %163, %cst_47 {dimension_numbers = #tpu.dot_dimension_numbers<[1], [0], [0], [1], [0, 0, 1, 1], [], []>} : vector<16x16xf32>, vector<16x4xf32>, vector<16x4xf32> -> vector<16x4xf32>
    %165 = vector.extract_strided_slice %161 {offsets = [16, 0], sizes = [16, 16], strides = [1, 1]} : vector<48x16xf32> to vector<16x16xf32>
    %166 = vector.extract_strided_slice %139 {offsets = [0, 4], sizes = [16, 4], strides = [1, 1]} : vector<16x12xf32> to vector<16x4xf32>
    %cst_48 = arith.constant dense<0.000000e+00> : vector<16x4xf32>
    %167 = tpu.matmul %165, %166, %cst_48 {dimension_numbers = #tpu.dot_dimension_numbers<[1], [0], [0], [1], [0, 0, 1, 1], [], []>} : vector<16x16xf32>, vector<16x4xf32>, vector<16x4xf32> -> vector<16x4xf32>
    %168 = vector.extract_strided_slice %161 {offsets = [32, 0], sizes = [16, 16], strides = [1, 1]} : vector<48x16xf32> to vector<16x16xf32>
    %169 = vector.extract_strided_slice %139 {offsets = [0, 8], sizes = [16, 4], strides = [1, 1]} : vector<16x12xf32> to vector<16x4xf32>
    %cst_49 = arith.constant dense<0.000000e+00> : vector<16x4xf32>
    %170 = tpu.matmul %168, %169, %cst_49 {dimension_numbers = #tpu.dot_dimension_numbers<[1], [0], [0], [1], [0, 0, 1, 1], [], []>} : vector<16x16xf32>, vector<16x4xf32>, vector<16x4xf32> -> vector<16x4xf32>
    %171 = tpu.concatenate %164, %167, %170 in 1 : vector<16x4xf32>, vector<16x4xf32>, vector<16x4xf32> -> vector<16x12xf32>
    %172 = arith.index_cast %132 : i32 to index
    %c0_50 = arith.constant 0 : index
    %173 = vector.load %arg9[%172, %c0_50] : memref<64x12xf32, #tpu.memory_space<vmem>>, vector<16x12xf32>
    tpu.vector_store %arg9[%172, %c0_50], %171 {strides = array<i32>} : memref<64x12xf32, #tpu.memory_space<vmem>>, vector<16x12xf32>,
    %c1_i32_51 = arith.constant 1 : i32
    %c16_i32_52 = arith.constant 16 : i32
    %174 = arith.muli %c1_i32_51, %c16_i32_52 : i32
    %175 = tpu.assume_multiple %174, 16 : i32
    %176 = arith.index_cast %175 : i32 to index
    %c0_53 = arith.constant 0 : index
    %177 = vector.load %arg8[%176, %c0_53] : memref<64x36xf32, #tpu.memory_space<vmem>>, vector<16x36xf32>
    %178 = vector.extract_strided_slice %177 {offsets = [0, 0], sizes = [16, 12], strides = [1, 1]} : vector<16x36xf32> to vector<16x12xf32>
    %cst_54 = arith.constant 5.000000e-01 : f32
    %179 = vector.broadcast %cst_54 : f32 to vector<16x12xf32>
    %180 = arith.mulf %178, %179 : vector<16x12xf32>
    %181 = vector.extract_strided_slice %177 {offsets = [0, 12], sizes = [16, 12], strides = [1, 1]} : vector<16x36xf32> to vector<16x12xf32>
    %182 = vector.extract_strided_slice %177 {offsets = [0, 24], sizes = [16, 12], strides = [1, 1]} : vector<16x36xf32> to vector<16x12xf32>
    %183 = vector.extract_strided_slice %180 {offsets = [0, 0], sizes = [16, 4], strides = [1, 1]} : vector<16x12xf32> to vector<16x4xf32>
    %184 = vector.extract_strided_slice %181 {offsets = [0, 0], sizes = [16, 4], strides = [1, 1]} : vector<16x12xf32> to vector<16x4xf32>
    %cst_55 = arith.constant dense<0.000000e+00> : vector<16x16xf32>
    %185 = tpu.matmul %183, %184, %cst_55 {dimension_numbers = #tpu.dot_dimension_numbers<[1], [1], [0], [0], [0, 0, 1, 0], [], []>} : vector<16x4xf32>, vector<16x4xf32>, vector<16x16xf32> -> vector<16x16xf32>
    %186 = vector.extract_strided_slice %180 {offsets = [0, 4], sizes = [16, 4], strides = [1, 1]} : vector<16x12xf32> to vector<16x4xf32>
    %187 = vector.extract_strided_slice %181 {offsets = [0, 4], sizes = [16, 4], strides = [1, 1]} : vector<16x12xf32> to vector<16x4xf32>
    %cst_56 = arith.constant dense<0.000000e+00> : vector<16x16xf32>
    %188 = tpu.matmul %186, %187, %cst_56 {dimension_numbers = #tpu.dot_dimension_numbers<[1], [1], [0], [0], [0, 0, 1, 0], [], []>} : vector<16x4xf32>, vector<16x4xf32>, vector<16x16xf32> -> vector<16x16xf32>
    %189 = vector.extract_strided_slice %180 {offsets = [0, 8], sizes = [16, 4], strides = [1, 1]} : vector<16x12xf32> to vector<16x4xf32>
    %190 = vector.extract_strided_slice %181 {offsets = [0, 8], sizes = [16, 4], strides = [1, 1]} : vector<16x12xf32> to vector<16x4xf32>
    %cst_57 = arith.constant dense<0.000000e+00> : vector<16x16xf32>
    %191 = tpu.matmul %189, %190, %cst_57 {dimension_numbers = #tpu.dot_dimension_numbers<[1], [1], [0], [0], [0, 0, 1, 0], [], []>} : vector<16x4xf32>, vector<16x4xf32>, vector<16x16xf32> -> vector<16x16xf32>
    %192 = tpu.concatenate %185, %188, %191 in 0 : vector<16x16xf32>, vector<16x16xf32>, vector<16x16xf32> -> vector<48x16xf32>
    %193 = vector.broadcast %130 : vector<1x16xf32> to vector<48x16xf32>
    %194 = arith.addf %192, %193 : vector<48x16xf32>
    %cst_58 = arith.constant dense<0xFF800000> : vector<48xf32>
    %195 = vector.multi_reduction <maximumf>, %194, %cst_58 [1] : vector<48x16xf32> to vector<48xf32>
    %196 = vector.shape_cast %195 : vector<48xf32> to vector<48x1xf32>
    %197 = vector.broadcast %196 : vector<48x1xf32> to vector<48x16xf32>
    %198 = arith.subf %194, %197 : vector<48x16xf32>
    %199 = math.exp %198 : vector<48x16xf32>
    %cst_59 = arith.constant dense<0.000000e+00> : vector<48xf32>
    %200 = vector.multi_reduction <add>, %199, %cst_59 [1] : vector<48x16xf32> to vector<48xf32>
    %201 = vector.shape_cast %200 : vector<48xf32> to vector<48x1xf32>
    %202 = tpu.reciprocal %201 {approx = true} : vector<48x1xf32> -> vector<48x1xf32>
    %203 = vector.broadcast %202 : vector<48x1xf32> to vector<48x16xf32>
    %204 = arith.mulf %199, %203 : vector<48x16xf32>
    %205 = vector.extract_strided_slice %204 {offsets = [0, 0], sizes = [16, 16], strides = [1, 1]} : vector<48x16xf32> to vector<16x16xf32>
    %206 = vector.extract_strided_slice %182 {offsets = [0, 0], sizes = [16, 4], strides = [1, 1]} : vector<16x12xf32> to vector<16x4xf32>
    %cst_60 = arith.constant dense<0.000000e+00> : vector<16x4xf32>
    %207 = tpu.matmul %205, %206, %cst_60 {dimension_numbers = #tpu.dot_dimension_numbers<[1], [0], [0], [1], [0, 0, 1, 1], [], []>} : vector<16x16xf32>, vector<16x4xf32>, vector<16x4xf32> -> vector<16x4xf32>
    %208 = vector.extract_strided_slice %204 {offsets = [16, 0], sizes = [16, 16], strides = [1, 1]} : vector<48x16xf32> to vector<16x16xf32>
    %209 = vector.extract_strided_slice %182 {offsets = [0, 4], sizes = [16, 4], strides = [1, 1]} : vector<16x12xf32> to vector<16x4xf32>
    %cst_61 = arith.constant dense<0.000000e+00> : vector<16x4xf32>
    %210 = tpu.matmul %208, %209, %cst_61 {dimension_numbers = #tpu.dot_dimension_numbers<[1], [0], [0], [1], [0, 0, 1, 1], [], []>} : vector<16x16xf32>, vector<16x4xf32>, vector<16x4xf32> -> vector<16x4xf32>
    %211 = vector.extract_strided_slice %204 {offsets = [32, 0], sizes = [16, 16], strides = [1, 1]} : vector<48x16xf32> to vector<16x16xf32>
    %212 = vector.extract_strided_slice %182 {offsets = [0, 8], sizes = [16, 4], strides = [1, 1]} : vector<16x12xf32> to vector<16x4xf32>
    %cst_62 = arith.constant dense<0.000000e+00> : vector<16x4xf32>
    %213 = tpu.matmul %211, %212, %cst_62 {dimension_numbers = #tpu.dot_dimension_numbers<[1], [0], [0], [1], [0, 0, 1, 1], [], []>} : vector<16x16xf32>, vector<16x4xf32>, vector<16x4xf32> -> vector<16x4xf32>
    %214 = tpu.concatenate %207, %210, %213 in 1 : vector<16x4xf32>, vector<16x4xf32>, vector<16x4xf32> -> vector<16x12xf32>
    %215 = arith.index_cast %175 : i32 to index
    %c0_63 = arith.constant 0 : index
    %216 = vector.load %arg9[%215, %c0_63] : memref<64x12xf32, #tpu.memory_space<vmem>>, vector<16x12xf32>
    tpu.vector_store %arg9[%215, %c0_63], %214 {strides = array<i32>} : memref<64x12xf32, #tpu.memory_space<vmem>>, vector<16x12xf32>,
    %c2_i32_64 = arith.constant 2 : i32
    %c16_i32_65 = arith.constant 16 : i32
    %217 = arith.muli %c2_i32_64, %c16_i32_65 : i32
    %218 = tpu.assume_multiple %217, 16 : i32
    %219 = arith.index_cast %218 : i32 to index
    %c0_66 = arith.constant 0 : index
    %220 = vector.load %arg8[%219, %c0_66] : memref<64x36xf32, #tpu.memory_space<vmem>>, vector<16x36xf32>
    %221 = vector.extract_strided_slice %220 {offsets = [0, 0], sizes = [16, 12], strides = [1, 1]} : vector<16x36xf32> to vector<16x12xf32>
    %cst_67 = arith.constant 5.000000e-01 : f32
    %222 = vector.broadcast %cst_67 : f32 to vector<16x12xf32>
    %223 = arith.mulf %221, %222 : vector<16x12xf32>
    %224 = vector.extract_strided_slice %220 {offsets = [0, 12], sizes = [16, 12], strides = [1, 1]} : vector<16x36xf32> to vector<16x12xf32>
    %225 = vector.extract_strided_slice %220 {offsets = [0, 24], sizes = [16, 12], strides = [1, 1]} : vector<16x36xf32> to vector<16x12xf32>
    %226 = vector.extract_strided_slice %223 {offsets = [0, 0], sizes = [16, 4], strides = [1, 1]} : vector<16x12xf32> to vector<16x4xf32>
    %227 = vector.extract_strided_slice %224 {offsets = [0, 0], sizes = [16, 4], strides = [1, 1]} : vector<16x12xf32> to vector<16x4xf32>
    %cst_68 = arith.constant dense<0.000000e+00> : vector<16x16xf32>
    %228 = tpu.matmul %226, %227, %cst_68 {dimension_numbers = #tpu.dot_dimension_numbers<[1], [1], [0], [0], [0, 0, 1, 0], [], []>} : vector<16x4xf32>, vector<16x4xf32>, vector<16x16xf32> -> vector<16x16xf32>
    %229 = vector.extract_strided_slice %223 {offsets = [0, 4], sizes = [16, 4], strides = [1, 1]} : vector<16x12xf32> to vector<16x4xf32>
    %230 = vector.extract_strided_slice %224 {offsets = [0, 4], sizes = [16, 4], strides = [1, 1]} : vector<16x12xf32> to vector<16x4xf32>
    %cst_69 = arith.constant dense<0.000000e+00> : vector<16x16xf32>
    %231 = tpu.matmul %229, %230, %cst_69 {dimension_numbers = #tpu.dot_dimension_numbers<[1], [1], [0], [0], [0, 0, 1, 0], [], []>} : vector<16x4xf32>, vector<16x4xf32>, vector<16x16xf32> -> vector<16x16xf32>
    %232 = vector.extract_strided_slice %223 {offsets = [0, 8], sizes = [16, 4], strides = [1, 1]} : vector<16x12xf32> to vector<16x4xf32>
    %233 = vector.extract_strided_slice %224 {offsets = [0, 8], sizes = [16, 4], strides = [1, 1]} : vector<16x12xf32> to vector<16x4xf32>
    %cst_70 = arith.constant dense<0.000000e+00> : vector<16x16xf32>
    %234 = tpu.matmul %232, %233, %cst_70 {dimension_numbers = #tpu.dot_dimension_numbers<[1], [1], [0], [0], [0, 0, 1, 0], [], []>} : vector<16x4xf32>, vector<16x4xf32>, vector<16x16xf32> -> vector<16x16xf32>
    %235 = tpu.concatenate %228, %231, %234 in 0 : vector<16x16xf32>, vector<16x16xf32>, vector<16x16xf32> -> vector<48x16xf32>
    %236 = vector.broadcast %130 : vector<1x16xf32> to vector<48x16xf32>
    %237 = arith.addf %235, %236 : vector<48x16xf32>
    %cst_71 = arith.constant dense<0xFF800000> : vector<48xf32>
    %238 = vector.multi_reduction <maximumf>, %237, %cst_71 [1] : vector<48x16xf32> to vector<48xf32>
    %239 = vector.shape_cast %238 : vector<48xf32> to vector<48x1xf32>
    %240 = vector.broadcast %239 : vector<48x1xf32> to vector<48x16xf32>
    %241 = arith.subf %237, %240 : vector<48x16xf32>
    %242 = math.exp %241 : vector<48x16xf32>
    %cst_72 = arith.constant dense<0.000000e+00> : vector<48xf32>
    %243 = vector.multi_reduction <add>, %242, %cst_72 [1] : vector<48x16xf32> to vector<48xf32>
    %244 = vector.shape_cast %243 : vector<48xf32> to vector<48x1xf32>
    %245 = tpu.reciprocal %244 {approx = true} : vector<48x1xf32> -> vector<48x1xf32>
    %246 = vector.broadcast %245 : vector<48x1xf32> to vector<48x16xf32>
    %247 = arith.mulf %242, %246 : vector<48x16xf32>
    %248 = vector.extract_strided_slice %247 {offsets = [0, 0], sizes = [16, 16], strides = [1, 1]} : vector<48x16xf32> to vector<16x16xf32>
    %249 = vector.extract_strided_slice %225 {offsets = [0, 0], sizes = [16, 4], strides = [1, 1]} : vector<16x12xf32> to vector<16x4xf32>
    %cst_73 = arith.constant dense<0.000000e+00> : vector<16x4xf32>
    %250 = tpu.matmul %248, %249, %cst_73 {dimension_numbers = #tpu.dot_dimension_numbers<[1], [0], [0], [1], [0, 0, 1, 1], [], []>} : vector<16x16xf32>, vector<16x4xf32>, vector<16x4xf32> -> vector<16x4xf32>
    %251 = vector.extract_strided_slice %247 {offsets = [16, 0], sizes = [16, 16], strides = [1, 1]} : vector<48x16xf32> to vector<16x16xf32>
    %252 = vector.extract_strided_slice %225 {offsets = [0, 4], sizes = [16, 4], strides = [1, 1]} : vector<16x12xf32> to vector<16x4xf32>
    %cst_74 = arith.constant dense<0.000000e+00> : vector<16x4xf32>
    %253 = tpu.matmul %251, %252, %cst_74 {dimension_numbers = #tpu.dot_dimension_numbers<[1], [0], [0], [1], [0, 0, 1, 1], [], []>} : vector<16x16xf32>, vector<16x4xf32>, vector<16x4xf32> -> vector<16x4xf32>
    %254 = vector.extract_strided_slice %247 {offsets = [32, 0], sizes = [16, 16], strides = [1, 1]} : vector<48x16xf32> to vector<16x16xf32>
    %255 = vector.extract_strided_slice %225 {offsets = [0, 8], sizes = [16, 4], strides = [1, 1]} : vector<16x12xf32> to vector<16x4xf32>
    %cst_75 = arith.constant dense<0.000000e+00> : vector<16x4xf32>
    %256 = tpu.matmul %254, %255, %cst_75 {dimension_numbers = #tpu.dot_dimension_numbers<[1], [0], [0], [1], [0, 0, 1, 1], [], []>} : vector<16x16xf32>, vector<16x4xf32>, vector<16x4xf32> -> vector<16x4xf32>
    %257 = tpu.concatenate %250, %253, %256 in 1 : vector<16x4xf32>, vector<16x4xf32>, vector<16x4xf32> -> vector<16x12xf32>
    %258 = arith.index_cast %218 : i32 to index
    %c0_76 = arith.constant 0 : index
    %259 = vector.load %arg9[%258, %c0_76] : memref<64x12xf32, #tpu.memory_space<vmem>>, vector<16x12xf32>
    tpu.vector_store %arg9[%258, %c0_76], %257 {strides = array<i32>} : memref<64x12xf32, #tpu.memory_space<vmem>>, vector<16x12xf32>,
    %c3_i32_77 = arith.constant 3 : i32
    %c16_i32_78 = arith.constant 16 : i32
    %260 = arith.muli %c3_i32_77, %c16_i32_78 : i32
    %261 = tpu.assume_multiple %260, 16 : i32
    %262 = arith.index_cast %261 : i32 to index
    %c0_79 = arith.constant 0 : index
    %263 = vector.load %arg8[%262, %c0_79] : memref<64x36xf32, #tpu.memory_space<vmem>>, vector<16x36xf32>
    %264 = vector.extract_strided_slice %263 {offsets = [0, 0], sizes = [16, 12], strides = [1, 1]} : vector<16x36xf32> to vector<16x12xf32>
    %cst_80 = arith.constant 5.000000e-01 : f32
    %265 = vector.broadcast %cst_80 : f32 to vector<16x12xf32>
    %266 = arith.mulf %264, %265 : vector<16x12xf32>
    %267 = vector.extract_strided_slice %263 {offsets = [0, 12], sizes = [16, 12], strides = [1, 1]} : vector<16x36xf32> to vector<16x12xf32>
    %268 = vector.extract_strided_slice %263 {offsets = [0, 24], sizes = [16, 12], strides = [1, 1]} : vector<16x36xf32> to vector<16x12xf32>
    %269 = vector.extract_strided_slice %266 {offsets = [0, 0], sizes = [16, 4], strides = [1, 1]} : vector<16x12xf32> to vector<16x4xf32>
    %270 = vector.extract_strided_slice %267 {offsets = [0, 0], sizes = [16, 4], strides = [1, 1]} : vector<16x12xf32> to vector<16x4xf32>
    %cst_81 = arith.constant dense<0.000000e+00> : vector<16x16xf32>
    %271 = tpu.matmul %269, %270, %cst_81 {dimension_numbers = #tpu.dot_dimension_numbers<[1], [1], [0], [0], [0, 0, 1, 0], [], []>} : vector<16x4xf32>, vector<16x4xf32>, vector<16x16xf32> -> vector<16x16xf32>
    %272 = vector.extract_strided_slice %266 {offsets = [0, 4], sizes = [16, 4], strides = [1, 1]} : vector<16x12xf32> to vector<16x4xf32>
    %273 = vector.extract_strided_slice %267 {offsets = [0, 4], sizes = [16, 4], strides = [1, 1]} : vector<16x12xf32> to vector<16x4xf32>
    %cst_82 = arith.constant dense<0.000000e+00> : vector<16x16xf32>
    %274 = tpu.matmul %272, %273, %cst_82 {dimension_numbers = #tpu.dot_dimension_numbers<[1], [1], [0], [0], [0, 0, 1, 0], [], []>} : vector<16x4xf32>, vector<16x4xf32>, vector<16x16xf32> -> vector<16x16xf32>
    %275 = vector.extract_strided_slice %266 {offsets = [0, 8], sizes = [16, 4], strides = [1, 1]} : vector<16x12xf32> to vector<16x4xf32>
    %276 = vector.extract_strided_slice %267 {offsets = [0, 8], sizes = [16, 4], strides = [1, 1]} : vector<16x12xf32> to vector<16x4xf32>
    %cst_83 = arith.constant dense<0.000000e+00> : vector<16x16xf32>
    %277 = tpu.matmul %275, %276, %cst_83 {dimension_numbers = #tpu.dot_dimension_numbers<[1], [1], [0], [0], [0, 0, 1, 0], [], []>} : vector<16x4xf32>, vector<16x4xf32>, vector<16x16xf32> -> vector<16x16xf32>
    %278 = tpu.concatenate %271, %274, %277 in 0 : vector<16x16xf32>, vector<16x16xf32>, vector<16x16xf32> -> vector<48x16xf32>
    %279 = vector.broadcast %130 : vector<1x16xf32> to vector<48x16xf32>
    %280 = arith.addf %278, %279 : vector<48x16xf32>
    %cst_84 = arith.constant dense<0xFF800000> : vector<48xf32>
    %281 = vector.multi_reduction <maximumf>, %280, %cst_84 [1] : vector<48x16xf32> to vector<48xf32>
    %282 = vector.shape_cast %281 : vector<48xf32> to vector<48x1xf32>
    %283 = vector.broadcast %282 : vector<48x1xf32> to vector<48x16xf32>
    %284 = arith.subf %280, %283 : vector<48x16xf32>
    %285 = math.exp %284 : vector<48x16xf32>
    %cst_85 = arith.constant dense<0.000000e+00> : vector<48xf32>
    %286 = vector.multi_reduction <add>, %285, %cst_85 [1] : vector<48x16xf32> to vector<48xf32>
    %287 = vector.shape_cast %286 : vector<48xf32> to vector<48x1xf32>
    %288 = tpu.reciprocal %287 {approx = true} : vector<48x1xf32> -> vector<48x1xf32>
    %289 = vector.broadcast %288 : vector<48x1xf32> to vector<48x16xf32>
    %290 = arith.mulf %285, %289 : vector<48x16xf32>
    %291 = vector.extract_strided_slice %290 {offsets = [0, 0], sizes = [16, 16], strides = [1, 1]} : vector<48x16xf32> to vector<16x16xf32>
    %292 = vector.extract_strided_slice %268 {offsets = [0, 0], sizes = [16, 4], strides = [1, 1]} : vector<16x12xf32> to vector<16x4xf32>
    %cst_86 = arith.constant dense<0.000000e+00> : vector<16x4xf32>
    %293 = tpu.matmul %291, %292, %cst_86 {dimension_numbers = #tpu.dot_dimension_numbers<[1], [0], [0], [1], [0, 0, 1, 1], [], []>} : vector<16x16xf32>, vector<16x4xf32>, vector<16x4xf32> -> vector<16x4xf32>
    %294 = vector.extract_strided_slice %290 {offsets = [16, 0], sizes = [16, 16], strides = [1, 1]} : vector<48x16xf32> to vector<16x16xf32>
    %295 = vector.extract_strided_slice %268 {offsets = [0, 4], sizes = [16, 4], strides = [1, 1]} : vector<16x12xf32> to vector<16x4xf32>
    %cst_87 = arith.constant dense<0.000000e+00> : vector<16x4xf32>
    %296 = tpu.matmul %294, %295, %cst_87 {dimension_numbers = #tpu.dot_dimension_numbers<[1], [0], [0], [1], [0, 0, 1, 1], [], []>} : vector<16x16xf32>, vector<16x4xf32>, vector<16x4xf32> -> vector<16x4xf32>
    %297 = vector.extract_strided_slice %290 {offsets = [32, 0], sizes = [16, 16], strides = [1, 1]} : vector<48x16xf32> to vector<16x16xf32>
    %298 = vector.extract_strided_slice %268 {offsets = [0, 8], sizes = [16, 4], strides = [1, 1]} : vector<16x12xf32> to vector<16x4xf32>
    %cst_88 = arith.constant dense<0.000000e+00> : vector<16x4xf32>
    %299 = tpu.matmul %297, %298, %cst_88 {dimension_numbers = #tpu.dot_dimension_numbers<[1], [0], [0], [1], [0, 0, 1, 1], [], []>} : vector<16x16xf32>, vector<16x4xf32>, vector<16x4xf32> -> vector<16x4xf32>
    %300 = tpu.concatenate %293, %296, %299 in 1 : vector<16x4xf32>, vector<16x4xf32>, vector<16x4xf32> -> vector<16x12xf32>
    %301 = arith.index_cast %261 : i32 to index
    %c0_89 = arith.constant 0 : index
    %302 = vector.load %arg9[%301, %c0_89] : memref<64x12xf32, #tpu.memory_space<vmem>>, vector<16x12xf32>
    tpu.vector_store %arg9[%301, %c0_89], %300 {strides = array<i32>} : memref<64x12xf32, #tpu.memory_space<vmem>>, vector<16x12xf32>,
    %c4_i32_90 = arith.constant 4 : i32
    %c0_91 = arith.constant 0 : index
    %c0_92 = arith.constant 0 : index
    %303 = vector.load %arg3[%c0_91, %c0_92] : memref<96x12xf32, #tpu.memory_space<vmem>>, vector<12x12xf32>
    %c16_93 = arith.constant 16 : index
    %c0_94 = arith.constant 0 : index
    %304 = vector.load %arg3[%c16_93, %c0_94] : memref<96x12xf32, #tpu.memory_space<vmem>>, vector<12x12xf32>
    %c32_95 = arith.constant 32 : index
    %c0_96 = arith.constant 0 : index
    %305 = vector.load %arg3[%c32_95, %c0_96] : memref<96x12xf32, #tpu.memory_space<vmem>>, vector<36x12xf32>
    %c80 = arith.constant 80 : index
    %c0_97 = arith.constant 0 : index
    %306 = vector.load %arg3[%c80, %c0_97] : memref<96x12xf32, #tpu.memory_space<vmem>>, vector<12x12xf32>
    %c0_98 = arith.constant 0 : index
    %c0_99 = arith.constant 0 : index
    %307 = vector.load %arg4[%c0_98, %c0_99] : memref<5x12xf32, #tpu.memory_space<vmem>>, vector<1x12xf32>
    %c1_100 = arith.constant 1 : index
    %c0_101 = arith.constant 0 : index
    %308 = vector.load %arg4[%c1_100, %c0_101] : memref<5x12xf32, #tpu.memory_space<vmem>>, vector<1x12xf32>
    %c2_102 = arith.constant 2 : index
    %c0_103 = arith.constant 0 : index
    %309 = vector.load %arg4[%c2_102, %c0_103] : memref<5x12xf32, #tpu.memory_space<vmem>>, vector<1x12xf32>
    %c3 = arith.constant 3 : index
    %c0_104 = arith.constant 0 : index
    %310 = vector.load %arg4[%c3, %c0_104] : memref<5x12xf32, #tpu.memory_space<vmem>>, vector<1x12xf32>
    %c4 = arith.constant 4 : index
    %c0_105 = arith.constant 0 : index
    %311 = vector.load %arg4[%c4, %c0_105] : memref<5x12xf32, #tpu.memory_space<vmem>>, vector<1x12xf32>
    %c0_106 = arith.constant 0 : index
    %c0_107 = arith.constant 0 : index
    %312 = vector.load %arg6[%c0_106, %c0_107] : memref<12x64xf32, #tpu.memory_space<vmem>>, vector<12x64xf32>
    %c0_108 = arith.constant 0 : index
    %c0_109 = arith.constant 0 : index
    %313 = vector.load %arg9[%c0_108, %c0_109] : memref<64x12xf32, #tpu.memory_space<vmem>>, vector<64x12xf32>
    %cst_110 = arith.constant dense<0.000000e+00> : vector<64x12xf32>
    %314 = tpu.matmul %313, %303, %cst_110 {dimension_numbers = #tpu.dot_dimension_numbers<[1], [0], [0], [1], [0, 0, 1, 1], [], []>} : vector<64x12xf32>, vector<12x12xf32>, vector<64x12xf32> -> vector<64x12xf32>
    %315 = vector.broadcast %307 : vector<1x12xf32> to vector<64x12xf32>
    %316 = arith.addf %314, %315 : vector<64x12xf32>
    %cst_111 = arith.constant dense<0.000000e+00> : vector<64x12xf32>
    %317 = tpu.matmul %316, %304, %cst_111 {dimension_numbers = #tpu.dot_dimension_numbers<[1], [0], [0], [1], [0, 0, 1, 1], [], []>} : vector<64x12xf32>, vector<12x12xf32>, vector<64x12xf32> -> vector<64x12xf32>
    %c0_112 = arith.constant 0 : index
    %c0_113 = arith.constant 0 : index
    %318 = vector.load %arg5[%c0_112, %c0_113] : memref<64x64xf32, #tpu.memory_space<vmem>>, vector<64x64xf32>
    %cst_114 = arith.constant dense<0.000000e+00> : vector<64x12xf32>
    %319 = tpu.matmul %318, %317, %cst_114 {dimension_numbers = #tpu.dot_dimension_numbers<[1], [0], [0], [1], [0, 0, 1, 1], [], []>} : vector<64x64xf32>, vector<64x12xf32>, vector<64x12xf32> -> vector<64x12xf32>
    %320 = vector.broadcast %308 : vector<1x12xf32> to vector<64x12xf32>
    %321 = arith.addf %319, %320 : vector<64x12xf32>
    %cst_115 = arith.constant dense<0xFF800000> : vector<64xf32>
    %322 = vector.multi_reduction <maximumf>, %321, %cst_115 [1] : vector<64x12xf32> to vector<64xf32>
    %323 = vector.shape_cast %322 : vector<64xf32> to vector<64x1xf32>
    %cst_116 = arith.constant dense<0.000000e+00> : vector<64xf32>
    %324 = vector.multi_reduction <add>, %321, %cst_116 [1] : vector<64x12xf32> to vector<64xf32>
    %325 = vector.shape_cast %324 : vector<64xf32> to vector<64x1xf32>
    %cst_117 = arith.constant 0.0833333358 : f32
    %326 = vector.broadcast %cst_117 : f32 to vector<64x1xf32>
    %327 = arith.mulf %325, %326 : vector<64x1xf32>
    %328 = arith.addf %323, %327 : vector<64x1xf32>
    %329 = vector.extract_strided_slice %312 {offsets = [0, 0], sizes = [4, 64], strides = [1, 1]} : vector<12x64xf32> to vector<4x64xf32>
    %cst_118 = arith.constant dense<0.000000e+00> : vector<4x12xf32>
    %330 = tpu.matmul %329, %316, %cst_118 {dimension_numbers = #tpu.dot_dimension_numbers<[1], [0], [0], [1], [0, 0, 1, 1], [], []>} : vector<4x64xf32>, vector<64x12xf32>, vector<4x12xf32> -> vector<4x12xf32>
    %331 = vector.extract_strided_slice %312 {offsets = [4, 0], sizes = [4, 64], strides = [1, 1]} : vector<12x64xf32> to vector<4x64xf32>
    %cst_119 = arith.constant dense<0.000000e+00> : vector<4x12xf32>
    %332 = tpu.matmul %331, %317, %cst_119 {dimension_numbers = #tpu.dot_dimension_numbers<[1], [0], [0], [1], [0, 0, 1, 1], [], []>} : vector<4x64xf32>, vector<64x12xf32>, vector<4x12xf32> -> vector<4x12xf32>
    %333 = vector.broadcast %308 : vector<1x12xf32> to vector<4x12xf32>
    %334 = arith.addf %332, %333 : vector<4x12xf32>
    %335 = vector.extract_strided_slice %312 {offsets = [8, 0], sizes = [4, 64], strides = [1, 1]} : vector<12x64xf32> to vector<4x64xf32>
    %336 = vector.broadcast %328 : vector<64x1xf32> to vector<64x12xf32>
    %337 = vector.broadcast %309 : vector<1x12xf32> to vector<64x12xf32>
    %338 = arith.mulf %336, %337 : vector<64x12xf32>
    %cst_120 = arith.constant dense<0.000000e+00> : vector<4x12xf32>
    %339 = tpu.matmul %335, %338, %cst_120 {dimension_numbers = #tpu.dot_dimension_numbers<[1], [0], [0], [1], [0, 0, 1, 1], [], []>} : vector<4x64xf32>, vector<64x12xf32>, vector<4x12xf32> -> vector<4x12xf32>
    %340 = vector.broadcast %308 : vector<1x12xf32> to vector<4x12xf32>
    %341 = arith.addf %339, %340 : vector<4x12xf32>
    %342 = tpu.concatenate %330, %341, %334 in 1 : vector<4x12xf32>, vector<4x12xf32>, vector<4x12xf32> -> vector<4x36xf32>
    %cst_121 = arith.constant 0.000000e+00 : f32
    %343 = vector.broadcast %cst_121 : f32 to vector<4x36xf32>
    %344 = arith.maximumf %342, %343 : vector<4x36xf32>
    %cst_122 = arith.constant dense<0.000000e+00> : vector<4x12xf32>
    %345 = tpu.matmul %344, %305, %cst_122 {dimension_numbers = #tpu.dot_dimension_numbers<[1], [0], [0], [1], [0, 0, 1, 1], [], []>} : vector<4x36xf32>, vector<36x12xf32>, vector<4x12xf32> -> vector<4x12xf32>
    %346 = vector.broadcast %310 : vector<1x12xf32> to vector<4x12xf32>
    %347 = arith.addf %345, %346 : vector<4x12xf32>
    %cst_123 = arith.constant dense<0.000000e+00> : vector<4x12xf32>
    %348 = tpu.matmul %347, %306, %cst_123 {dimension_numbers = #tpu.dot_dimension_numbers<[1], [0], [0], [1], [0, 0, 1, 1], [], []>} : vector<4x12xf32>, vector<12x12xf32>, vector<4x12xf32> -> vector<4x12xf32>
    %349 = vector.broadcast %311 : vector<1x12xf32> to vector<4x12xf32>
    %350 = arith.addf %348, %349 : vector<4x12xf32>
    %351 = vector.extract_strided_slice %350 {offsets = [0, 0], sizes = [4, 2], strides = [1, 1]} : vector<4x12xf32> to vector<4x2xf32>
    %c0_124 = arith.constant 0 : index
    %c0_125 = arith.constant 0 : index
    %352 = vector.load %arg7[%c0_124, %c0_125] : memref<4x2xf32, #tpu.memory_space<vmem>>, vector<4x2xf32>
    tpu.vector_store %arg7[%c0_124, %c0_125], %351 {strides = array<i32>} : memref<4x2xf32, #tpu.memory_space<vmem>>, vector<4x2xf32>,
    return
  }
}

</mosaic_0001>

<bundles_post_ra>
// kernel: tpu_custom_call.1
= control target key start
LH: loop header
LB: loop body
LE: loop exit
PB: predicated region body
PF: predicated region fallthrough
CT: control target
= control target key end

     0   :  { %vm72_vm0 = vcmask 1043456   ;;  %v5271_v3 = vmov 0.0   ;;  %vm47_vm1 = vcmask 97280   ;;  %vm181_vm2 = vcmask 293888   ;;  %s5272_s17 = smov 104   ;;  %s5273_s18 = smov 24   ;;  %s6219_s1 = inlined_call_operand.vmem [shape: f32[48,36], index: 1, kind: input, shape index: {}]   ;;  %s6220_s0 = inlined_call_operand.vmem [shape: f32[64,12], index: 0, kind: input, shape index: {}]   ;;  %s6221_s2 = inlined_call_operand.vmem [shape: f32[3,36], index: 2, kind: input, shape index: {}]   ;;  %s6222_s3 = inlined_call_operand.vmem [shape: f32[96,12], index: 3, kind: input, shape index: {}]   ;;  %s6223_s4 = inlined_call_operand.vmem [shape: f32[5,12], index: 4, kind: input, shape index: {}]   ;;  %s6224_s5 = inlined_call_operand.vmem [shape: f32[64,64], index: 5, kind: input, shape index: {}]   ;;  %s6225_s6 = inlined_call_operand.vmem [shape: f32[12,64], index: 6, kind: input, shape index: {}]   ;;  %s6226_s7 = inlined_call_operand.vmem [shape: f32[4,2], index: 7, kind: output, shape index: {}]  }
   0x1   :  { %v27_v0 = vld [vmem:[%s6219_s1 + $0x8] sm:$0xf]  ;;  %v5332_v1 = vld [vmem:[%s6219_s1 + $0x18] sm:$0xf]  ;;  %v26_v2 = vld [vmem:[%s6219_s1] sm:$0xff]  ;;  %4767 = vmatprep.mubr.f32.mxu1 %v5271_v3  ;;  %s5274_s19 = smov 116  }
   0x2   :  { %4747 = vmatprep.subr.msk.mxu0 %vm72_vm0, %v27_v0  ;;  %4763 = vmatprep.subr.msk.mxu1 %vm72_vm0, %v5332_v1  ;;  %v5344_v4 = vld [vmem:[%s6219_s1 + $0x10] sm:$0xff]  ;;  %v35_v5 = vld [vmem:[%s6220_s0] sm:$0xff]  ;;  %v36_v6 = vld [vmem:[%s6220_s0 + $0x8] sm:$0xff]  ;;  %s5275_s24 = smov 12   ;;  %vm964_vm3 = vcmask 31744   ;;  %s5277_s14 = smov 124  }
   0x3   :  { %4748 = vmatpush3.msk.msra.mxu0 %vm72_vm0, %v27_v0  ;;  %4764 = vmatpush3.msk.msra.mxu1 %vm72_vm0, %v5332_v1  ;;  %v5371_v7 = vld [vmem:[%s6221_s2] ss:$0 sm:$0xff]  ;;  %v5378_v12 = vld [vmem:[%s6221_s2 + $0x1] ss:$0 sm:$0xff]  ;;  %v37_v41 = vld [vmem:[%s6220_s0 + $0x10] sm:$0xff]  ;;  %s5278_s15 = smov 108  }
   0x4   :  { %4749 = vmatprep.subr.mxu0 %v26_v2  ;;  %4765 = vmatprep.subr.mxu1 %v5344_v4  ;;  %v38_v42 = vld [vmem:[%s6220_s0 + $0x18] sm:$0xff]  ;;  %v39_v47 = vld [vmem:[%s6220_s0 + $0x20] sm:$0xff]  ;;  %v40_v48 = vld [vmem:[%s6220_s0 + $0x28] sm:$0xff]  ;;  %s5279_s16 = smov 120   ;;  %vm1238_vm5 = vcmask 130048   ;;  %s5281_s20 = smov 100  }
   0x5   :  { %4750 = vmatpush3.msra.mxu0 %v26_v2  ;;  %4751 = vmatprep.mubr.msk.f32.mxu0 %vm47_vm1, %v35_v5  ;;  %v41_v49 = vld [vmem:[%s6220_s0 + $0x30] sm:$0xff]  ;;  %v42_v50 = vld [vmem:[%s6220_s0 + $0x38] sm:$0xff]  ;;  %v31_v51 = vld [vmem:[%s6219_s1 + $0x28] sm:$0xf]  ;;  %s5282_s21 = smov 96   ;;  %vm1584_vm6 = vcmask 64512  }
   0x6   :  { %4766 = vmatpush3.msra.mxu1 %v5344_v4  ;;  %4752 = vmatmul.mubr.msk.f32.vlgmr.msra.gmra.mxu0 %vm47_vm1, %v36_v6  ;;  %v30_v52 = vld [vmem:[%s6219_s1 + $0x20] sm:$0xff]  ;;  %vm3791_vm7 = vcmask 523264   ;;  %vm5285_vm8 = vmmov 0   ;;  %vm4225_vm9 = vcmask 195584   ;;  %vm4388_vm10 = vcmask 11264  }
   0x7   :  { %4768 = vmatmul.mubr.f32.vlgmr.msra.gmra.mxu1 %v5271_v3  ;;  %4770 = vmatprep.subr.msk.mxu1 %vm72_vm0, %v5332_v1 }
   0x8   :  { %4771 = vmatpush3.msk.msra.mxu1 %vm72_vm0, %v5332_v1  ;;  %4754 = vmatprep.mubr.msk.f32.mxu0 %vm47_vm1, %v37_v41 }
   0x9   :  { %4772 = vmatprep.subr.mxu1 %v5344_v4  ;;  %4791 = vmatprep.subr.msk.mxu0 %vm72_vm0, %v31_v51 }
   0xa   :  { %4773 = vmatpush3.msra.mxu1 %v5344_v4  ;;  %4755 = vmatmul.mubr.msk.f32.gmra.mxu0 %vm47_vm1, %v38_v42 }
   0xb   :  { %4777 = vmatprep.subr.msk.mxu1 %vm72_vm0, %v5332_v1  ;;  %4757 = vmatprep.mubr.msk.f32.mxu0 %vm47_vm1, %v39_v47 }
   0xc   :  { %4792 = vmatpush3.msk.msra.mxu0 %vm72_vm0, %v31_v51 }
   0xd   :  { %4793 = vmatprep.subr.mxu0 %v30_v52 }
   0xe   :  { %4758 = vmatmul.mubr.msk.f32.gmra.mxu0 %vm47_vm1, %v40_v48 }
   0xf   :  { %4760 = vmatprep.mubr.msk.f32.mxu0 %vm47_vm1, %v41_v49  ;;  %4794 = vmatpush3.msra.mxu0 %v30_v52 }
  0x12   :  { %4761 = vmatmul.mubr.msk.f32.gmra.mxu0 %vm47_vm1, %v42_v50 }
  0xc6   :  { %v4753_v8 = vpop.f32.mrf.mxu0 }
  0xc7   :  { %v148_v9 = vadd.f32 %v4753_v8, %v5371_v7  ;;  %v4769_v10 = vpop.f32.mrf.mxu1 }
  0xc8   :  { %v142_v11 = vpop.f32.mrf.mxu0  ;;  %v274_v16 = vadd.f32 %v4769_v10, %v5378_v12 }
  0xc9   :  { %183 = vst.msk [vmem:[#allocation2 + $0x8] sm:$0xff] %vm181_vm2, %v148_v9  ;;  %v143_v13 = vadd.f32 %v5371_v7, %v142_v11  ;;  %v268_v14 = vpop.f32.mrf.mxu1 }
  0xca   :  { %v269_v15 = vadd.f32 %v5378_v12, %v268_v14  ;;  %v4756_v57 = vpop.f32.mrf.mxu0 }
  0xcb   :  { %182 = vst.msk [vmem:[#allocation2] sm:$0xff] %vm181_vm2, %v143_v13  ;;  %v158_v58 = vadd.f32 %v4756_v57, %v5371_v7 }
  0xcc   :  { %293 = vrot.lane.b32.xlu0 %v269_v15, %s5272_s17  ;;  %v152_v59 = vpop.f32.mrf.mxu0 }
  0xcd   :  { %185 = vst.msk [vmem:[#allocation2 + $0x18] sm:$0xff] %vm181_vm2, %v158_v58  ;;  %v153_v60 = vadd.f32 %v5371_v7, %v152_v59 }
  0xce   :  { %v4759_v2 = vpop.f32.mrf.mxu0 }
  0xcf   :  { %184 = vst.msk [vmem:[#allocation2 + $0x10] sm:$0xff] %vm181_vm2, %v153_v60  ;;  %v168_v5 = vadd.f32 %v4759_v2, %v5371_v7 }
  0xd0   :  { %295 = vrot.lane.b32.xlu0 %v274_v16, %s5272_s17  ;;  %v191_v19 = vld [vmem:[#allocation2 + $0x8] sm:$0xff]  ;;  %v162_v6 = vpop.f32.mrf.mxu0 }
  0xd1   :  { %v278_v20 = vadd.f32 %v274_v16, %v191_v19  ;;  %187 = vst.msk [vmem:[#allocation2 + $0x28] sm:$0xff] %vm181_vm2, %v168_v5  ;;  %v163_v9 = vadd.f32 %v5371_v7, %v162_v6 }
  0xd2   :  { %v190_v17 = vld [vmem:[#allocation2] sm:$0xff]  ;;  %v4762_v8 = vpop.f32.mrf.mxu0 }
  0xd3   :  { %v277_v18 = vadd.f32 %v269_v15, %v190_v17  ;;  %v4407_v22 = vmul.f32 -1.442695, %v278_v20  ;;  %186 = vst.msk [vmem:[#allocation2 + $0x20] sm:$0xff] %vm181_vm2, %v163_v9  ;;  %v178_v11 = vadd.f32 %v4762_v8, %v5371_v7 }
  0xd4   :  { %v172_v10 = vpop.f32.mrf.mxu0 }
  0xd5   :  { %v4406_v21 = vmul.f32 -1.442695, %v277_v18  ;;  %v173_v13 = vadd.f32 %v5371_v7, %v172_v10  ;;  %189 = vst.msk [vmem:[#allocation2 + $0x38] sm:$0xff] %vm181_vm2, %v178_v11  ;;  %v5463_v18 = vld [vmem:[%s6221_s2 + $0x2] ss:$0 sm:$0xff]  ;;  %s5276_s2 = smov 112  }
  0xd7   :  { %5127 = vpow2.f32 %v4406_v21  ;;  %188 = vst.msk [vmem:[#allocation2 + $0x30] sm:$0xff] %vm181_vm2, %v173_v13 }
  0xd8   :  { %5129 = vpow2.f32 %v4407_v22  ;;  %v347_v22 = vld [vmem:[#allocation2 + $0x18] sm:$0xff] }
  0xda   :  { %v497_v2 = vld [vmem:[#allocation2 + $0x20] sm:$0xff] }
  0xe4   :  { %v5128_v23 = vpop.eup %5127 }
  0xe5   :  { %v285_v24 = vadd.f32 1.0, %v5128_v23  ;;  %v5130_v25 = vpop.eup %5129  ;;  %v346_v23 = vld [vmem:[#allocation2 + $0x10] sm:$0xff] }
  0xe6   :  { %v286_v26 = vadd.f32 1.0, %v5130_v25 }
  0xe7   :  { %5131 = vrcp.f32 %v285_v24 }
  0xe8   :  { %5133 = vrcp.f32 %v286_v26 }
  0xf4   :  { %v5132_v27 = vpop.eup %5131 }
  0xf5   :  { %v5134_v30 = vpop.eup %5133 }
 0x13e   :  { %v294_v28 = vpop.permute.xlu0 %293 }
 0x13f   :  { %v299_v29 = vmul.f32 %v5132_v27, %v294_v28 }
 0x141   :  { %303 = vrot.lane.b32.xlu1 %v299_v29, %s5273_s18 }
 0x142   :  { %v296_v31 = vpop.permute.xlu0 %295 }
 0x143   :  { %v300_v32 = vmul.f32 %v5134_v30, %v296_v31 }
 0x145   :  { %305 = vrot.lane.b32.xlu1 %v300_v32, %s5273_s18 }
 0x1b3   :  { %v304_v33 = vpop.permute.xlu1 %303 }
 0x1b4   :  { %v309_v34 = vadd.f32 %v304_v33, %v190_v17 }
 0x1b6   :  { %5135 = vtanh.f32 %v309_v34 }
 0x1b7   :  { %v306_v35 = vpop.permute.xlu1 %305 }
 0x1b8   :  { %v310_v36 = vadd.f32 %v306_v35, %v191_v19 }
 0x1ba   :  { %5137 = vtanh.f32 %v310_v36 }
 0x1c3   :  { %v5136_v37 = vpop.eup %5135 }
 0x1c4   :  { %v313_v38 = vsub.f32 0.0, %v5136_v37 }
 0x1c6   :  { %317 = vrot.lane.b32.xlu0 %v313_v38, %s5274_s19 }
 0x1c7   :  { %v5138_v39 = vpop.eup %5137 }
 0x1c8   :  { %v314_v40 = vsub.f32 0.0, %v5138_v39 }
 0x1ca   :  { %319 = vrot.lane.b32.xlu1 %v314_v40, %s5274_s19 }
 0x238   :  { %v318_v43 = vpop.permute.xlu0 %317 }
 0x239   :  { %v323_v44 = vmul.f32 %v5132_v27, %v318_v43 }
 0x23b   :  { %327 = vrot.lane.b32.xlu0 %v323_v44, %s5275_s24 }
 0x23c   :  { %v320_v45 = vpop.permute.xlu1 %319 }
 0x23d   :  { %v324_v46 = vmul.f32 %v5134_v30, %v320_v45 }
 0x23f   :  { %329 = vrot.lane.b32.xlu1 %v324_v46, %s5275_s24 }
 0x2ad   :  { %v328_v53 = vpop.permute.xlu0 %327 }
 0x2ae   :  { %v5424_v54 = vadd.f32 %v5136_v37, %v328_v53 }
 0x2b0   :  { %337 = vrot.lane.b32.xlu0 %v5424_v54, %s5272_s17 }
 0x2b1   :  { %v330_v55 = vpop.permute.xlu1 %329 }
 0x2b2   :  { %v5428_v56 = vadd.f32 %v5138_v39, %v330_v55 }
 0x2b4   :  { %339 = vrot.lane.b32.xlu1 %v5428_v56, %s5272_s17 }
 0x322   :  { %v338_v61 = vpop.permute.xlu0 %337 }
 0x323   :  { %343 = vst.msk [vmem:[#allocation3] sm:$0xff] %vm47_vm1, %v338_v61  ;;  %4774 = vmatprep.mubr.msk.f32.mxu1 %vm47_vm1, %v338_v61 }
 0x326   :  { %v340_v62 = vpop.permute.xlu1 %339 }
 0x327   :  { %344 = vst.msk [vmem:[#allocation3 + $0x8] sm:$0xff] %vm47_vm1, %v340_v62  ;;  %4775 = vmatmul.mubr.msk.f32.vlgmr.msra.gmra.mxu1 %vm47_vm1, %v340_v62 }
 0x328   :  { %4778 = vmatpush3.msk.msra.mxu1 %vm72_vm0, %v5332_v1 }
 0x329   :  { %4779 = vmatprep.subr.mxu1 %v5344_v4 }
 0x32a   :  { %v798_v63 = vld [vmem:[#allocation3] sm:$0xff]  ;;  %4780 = vmatpush3.msra.mxu1 %v5344_v4 }
 0x32b   :  { %4795 = vmatprep.mubr.msk.f32.mxu0 %vm47_vm1, %v798_v63  ;;  %4784 = vmatprep.subr.msk.mxu1 %vm72_vm0, %v5332_v1 }
 0x32e   :  { %v799_v0 = vld [vmem:[#allocation3 + $0x8] sm:$0xff] }
 0x32f   :  { %4796 = vmatmul.mubr.msk.f32.vlgmr.msra.gmra.mxu0 %vm47_vm1, %v799_v0  ;;  %v498_v0 = vld [vmem:[#allocation2 + $0x28] sm:$0xff] }
 0x3e7   :  { %v4776_v14 = vpop.f32.mrf.mxu1 }
 0x3e8   :  { %v424_v15 = vadd.f32 %v4776_v14, %v5378_v12 }
 0x3e9   :  { %v418_v16 = vpop.f32.mrf.mxu1 }
 0x3ea   :  { %v419_v17 = vadd.f32 %v5378_v12, %v418_v16  ;;  %445 = vrot.lane.b32.xlu1 %v424_v15, %s5272_s17  ;;  %v428_v24 = vadd.f32 %v424_v15, %v347_v22 }
 0x3ec   :  { %443 = vrot.lane.b32.xlu0 %v419_v17, %s5272_s17  ;;  %v427_v25 = vadd.f32 %v419_v17, %v346_v23  ;;  %v4412_v26 = vmul.f32 -1.442695, %v428_v24 }
 0x3ee   :  { %v4411_v27 = vmul.f32 -1.442695, %v427_v25  ;;  %5139 = vpow2.f32 %v4412_v26 }
 0x3ef   :  { %v4797_v7 = vpop.f32.mrf.mxu0 }
 0x3f0   :  { %v909_v19 = vadd.f32 %v4797_v7, %v5463_v18  ;;  %5141 = vpow2.f32 %v4411_v27 }
 0x3f1   :  { %v903_v20 = vpop.f32.mrf.mxu0 }
 0x3f2   :  { %943 = vst.msk [vmem:[#allocation2 + $0x8] sm:$0xff] %vm181_vm2, %v909_v19  ;;  %v904_v21 = vadd.f32 %v5463_v18, %v903_v20 }
 0x3f4   :  { %942 = vst.msk [vmem:[#allocation2] sm:$0xff] %vm181_vm2, %v904_v21 }
 0x3fb   :  { %v5140_v28 = vpop.eup %5139 }
 0x3fc   :  { %v436_v30 = vadd.f32 1.0, %v5140_v28 }
 0x3fd   :  { %v5142_v29 = vpop.eup %5141 }
 0x3fe   :  { %v435_v31 = vadd.f32 1.0, %v5142_v29  ;;  %5143 = vrcp.f32 %v436_v30 }
 0x400   :  { %5145 = vrcp.f32 %v435_v31 }
 0x40b   :  { %v5144_v32 = vpop.eup %5143 }
 0x40d   :  { %v5146_v35 = vpop.eup %5145 }
 0x45c   :  { %v446_v33 = vpop.permute.xlu1 %445 }
 0x45d   :  { %v450_v34 = vmul.f32 %v5144_v32, %v446_v33 }
 0x45e   :  { %v444_v36 = vpop.permute.xlu0 %443 }
 0x45f   :  { %v449_v37 = vmul.f32 %v5146_v35, %v444_v36  ;;  %455 = vrot.lane.b32.xlu1 %v450_v34, %s5273_s18 }
 0x461   :  { %453 = vrot.lane.b32.xlu0 %v449_v37, %s5273_s18 }
 0x4d1   :  { %v456_v38 = vpop.permute.xlu1 %455 }
 0x4d2   :  { %v460_v39 = vadd.f32 %v456_v38, %v347_v22  ;;  %v5505_v38 = vld [vmem:[#allocation2] sm:$0xff] }
 0x4d3   :  { %v454_v40 = vpop.permute.xlu0 %453 }
 0x4d4   :  { %5147 = vtanh.f32 %v460_v39  ;;  %v459_v41 = vadd.f32 %v454_v40, %v346_v23  ;;  %v5511_v40 = vmul.f32 0.5, %v5505_v38 }
 0x4d6   :  { %5149 = vtanh.f32 %v459_v41 }
 0x4e1   :  { %v5148_v42 = vpop.eup %5147 }
 0x4e2   :  { %v464_v43 = vsub.f32 %v5428_v56, %v5148_v42 }
 0x4e3   :  { %v5150_v44 = vpop.eup %5149 }
 0x4e4   :  { %469 = vrot.lane.b32.xlu1 %v464_v43, %s5274_s19  ;;  %v463_v45 = vsub.f32 %v5424_v54, %v5150_v44 }
 0x4e6   :  { %467 = vrot.lane.b32.xlu0 %v463_v45, %s5274_s19 }
 0x556   :  { %v470_v46 = vpop.permute.xlu1 %469 }
 0x557   :  { %v474_v47 = vmul.f32 %v5144_v32, %v470_v46 }
 0x558   :  { %v468_v48 = vpop.permute.xlu0 %467 }
 0x559   :  { %v473_v49 = vmul.f32 %v5146_v35, %v468_v48  ;;  %479 = vrot.lane.b32.xlu1 %v474_v47, %s5275_s24 }
 0x55b   :  { %477 = vrot.lane.b32.xlu0 %v473_v49, %s5275_s24 }
 0x5cb   :  { %v480_v50 = vpop.permute.xlu1 %479 }
 0x5cc   :  { %v484_v51 = vadd.f32 %v5148_v42, %v480_v50 }
 0x5cd   :  { %v478_v52 = vpop.permute.xlu0 %477 }
 0x5ce   :  { %v483_v53 = vadd.f32 %v5150_v44, %v478_v52  ;;  %489 = vrot.lane.b32.xlu1 %v484_v51, %s5272_s17  ;;  %v648_v52 = vld [vmem:[#allocation2 + $0x30] sm:$0xff] }
 0x5d0   :  { %487 = vrot.lane.b32.xlu0 %v483_v53, %s5272_s17 }
 0x640   :  { %v490_v55 = vpop.permute.xlu1 %489 }
 0x641   :  { %495 = vst.msk [vmem:[#allocation3 + $0x18] sm:$0xff] %vm47_vm1, %v490_v55 }
 0x642   :  { %v488_v54 = vpop.permute.xlu0 %487 }
 0x643   :  { %494 = vst.msk [vmem:[#allocation3 + $0x10] sm:$0xff] %vm47_vm1, %v488_v54  ;;  %4781 = vmatprep.mubr.msk.f32.mxu1 %vm47_vm1, %v488_v54 }
 0x644   :  { %4782 = vmatmul.mubr.msk.f32.vlgmr.msra.gmra.mxu1 %vm47_vm1, %v490_v55 }
 0x645   :  { %4785 = vmatpush3.msk.msra.mxu1 %vm72_vm0, %v5332_v1 }
 0x646   :  { %4786 = vmatprep.subr.mxu1 %v5344_v4 }
 0x647   :  { %4787 = vmatpush3.msra.mxu1 %v5344_v4 }
 0x648   :  { %v801_v57 = vld [vmem:[#allocation3 + $0x18] sm:$0xff] }
 0x64a   :  { %v800_v56 = vld [vmem:[#allocation3 + $0x10] sm:$0xff] }
 0x64b   :  { %4798 = vmatprep.mubr.msk.f32.mxu0 %vm47_vm1, %v800_v56 }
 0x64c   :  { %4799 = vmatmul.mubr.msk.f32.gmra.mxu0 %vm47_vm1, %v801_v57 }
 0x704   :  { %v4783_v58 = vpop.f32.mrf.mxu1 }
 0x705   :  { %v575_v59 = vadd.f32 %v4783_v58, %v5378_v12 }
 0x706   :  { %v569_v60 = vpop.f32.mrf.mxu1 }
 0x707   :  { %v570_v61 = vadd.f32 %v5378_v12, %v569_v60  ;;  %596 = vrot.lane.b32.xlu1 %v575_v59, %s5272_s17  ;;  %v579_v5 = vadd.f32 %v575_v59, %v498_v0 }
 0x709   :  { %594 = vrot.lane.b32.xlu0 %v570_v61, %s5272_s17  ;;  %v578_v6 = vadd.f32 %v570_v61, %v497_v2  ;;  %v4417_v8 = vmul.f32 -1.442695, %v579_v5 }
 0x70b   :  { %v4416_v9 = vmul.f32 -1.442695, %v578_v6  ;;  %5151 = vpow2.f32 %v4417_v8 }
 0x70c   :  { %v4800_v1 = vpop.f32.mrf.mxu0 }
 0x70d   :  { %v919_v62 = vadd.f32 %v4800_v1, %v5463_v18  ;;  %5153 = vpow2.f32 %v4416_v9 }
 0x70e   :  { %v913_v4 = vpop.f32.mrf.mxu0 }
 0x70f   :  { %945 = vst.msk [vmem:[#allocation2 + $0x18] sm:$0xff] %vm181_vm2, %v919_v62  ;;  %v914_v63 = vadd.f32 %v5463_v18, %v913_v4 }
 0x711   :  { %944 = vst.msk [vmem:[#allocation2 + $0x10] sm:$0xff] %vm181_vm2, %v914_v63 }
 0x718   :  { %v5152_v10 = vpop.eup %5151 }
 0x719   :  { %v587_v13 = vadd.f32 1.0, %v5152_v10 }
 0x71a   :  { %v5154_v11 = vpop.eup %5153 }
 0x71b   :  { %v586_v14 = vadd.f32 1.0, %v5154_v11  ;;  %5155 = vrcp.f32 %v587_v13 }
 0x71d   :  { %5157 = vrcp.f32 %v586_v14 }
 0x728   :  { %v5156_v15 = vpop.eup %5155 }
 0x72a   :  { %v5158_v7 = vpop.eup %5157 }
 0x779   :  { %v597_v16 = vpop.permute.xlu1 %596 }
 0x77a   :  { %v601_v17 = vmul.f32 %v5156_v15, %v597_v16 }
 0x77b   :  { %v595_v19 = vpop.permute.xlu0 %594 }
 0x77c   :  { %v600_v20 = vmul.f32 %v5158_v7, %v595_v19  ;;  %606 = vrot.lane.b32.xlu1 %v601_v17, %s5273_s18  ;;  %v5534_v17 = vld [vmem:[#allocation2 + $0x8] sm:$0xff] }
 0x77e   :  { %604 = vrot.lane.b32.xlu0 %v600_v20, %s5273_s18 }
 0x7ee   :  { %v607_v21 = vpop.permute.xlu1 %606 }
 0x7ef   :  { %v611_v22 = vadd.f32 %v607_v21, %v498_v0 }
 0x7f0   :  { %v605_v23 = vpop.permute.xlu0 %604 }
 0x7f1   :  { %5159 = vtanh.f32 %v611_v22  ;;  %v610_v24 = vadd.f32 %v605_v23, %v497_v2 }
 0x7f3   :  { %5161 = vtanh.f32 %v610_v24  ;;  %v957_v24 = vmul.f32 0.5, %v5534_v17 }
 0x7fe   :  { %v5160_v25 = vpop.eup %5159 }
 0x7ff   :  { %v615_v26 = vsub.f32 %v484_v51, %v5160_v25  ;;  %v649_v51 = vld [vmem:[#allocation2 + $0x38] sm:$0xff] }
 0x800   :  { %v5162_v27 = vpop.eup %5161 }
 0x801   :  { %620 = vrot.lane.b32.xlu1 %v615_v26, %s5274_s19  ;;  %v614_v28 = vsub.f32 %v483_v53, %v5162_v27 }
 0x803   :  { %618 = vrot.lane.b32.xlu0 %v614_v28, %s5274_s19 }
 0x873   :  { %v621_v29 = vpop.permute.xlu1 %620 }
 0x874   :  { %v625_v30 = vmul.f32 %v5156_v15, %v621_v29 }
 0x875   :  { %v619_v31 = vpop.permute.xlu0 %618 }
 0x876   :  { %v624_v32 = vmul.f32 %v5158_v7, %v619_v31  ;;  %630 = vrot.lane.b32.xlu1 %v625_v30, %s5275_s24 }
 0x878   :  { %628 = vrot.lane.b32.xlu0 %v624_v32, %s5275_s24 }
 0x8e8   :  { %v631_v33 = vpop.permute.xlu1 %630 }
 0x8e9   :  { %v635_v34 = vadd.f32 %v5160_v25, %v631_v33 }
 0x8ea   :  { %v629_v35 = vpop.permute.xlu0 %628 }
 0x8eb   :  { %v634_v36 = vadd.f32 %v5162_v27, %v629_v35  ;;  %640 = vrot.lane.b32.xlu1 %v635_v34, %s5272_s17 }
 0x8ed   :  { %638 = vrot.lane.b32.xlu0 %v634_v36, %s5272_s17 }
 0x95d   :  { %v641_v37 = vpop.permute.xlu1 %640 }
 0x95e   :  { %646 = vst.msk [vmem:[#allocation3 + $0x28] sm:$0xff] %vm47_vm1, %v641_v37 }
 0x95f   :  { %v639_v39 = vpop.permute.xlu0 %638 }
 0x960   :  { %645 = vst.msk [vmem:[#allocation3 + $0x20] sm:$0xff] %vm47_vm1, %v639_v39  ;;  %4788 = vmatprep.mubr.msk.f32.mxu1 %vm47_vm1, %v639_v39 }
 0x961   :  { %4789 = vmatmul.mubr.msk.f32.vlgmr.msra.gmra.mxu1 %vm47_vm1, %v641_v37  ;;  %v950_v37 = vlaneseq }
 0x962   :  { %4811 = vmatprep.mubr.msk.f32.mxu1 %vm964_vm3, %v5511_v40 }
 0x963   :  { %v951_v39 = vand.u32 127, %v950_v37 }
 0x965   :  { %v803_v42 = vld [vmem:[#allocation3 + $0x28] sm:$0xff]  ;;  %vm952_vm4 = vcmp.lt.s32.totalorder %v951_v39, 14 }
 0x967   :  { %v802_v41 = vld [vmem:[#allocation3 + $0x20] sm:$0xff] }
 0x968   :  { %4801 = vmatprep.mubr.msk.f32.mxu0 %vm47_vm1, %v802_v41  ;;  %v5280_v41 = vmov -1e+30  }
 0x969   :  { %4802 = vmatmul.mubr.msk.f32.gmra.mxu0 %vm47_vm1, %v803_v42  ;;  %v5576_v42 = vsel %vm952_vm4, 0.0, %v5280_v41 }
 0xa21   :  { %v4790_v43 = vpop.f32.mrf.mxu1 }
 0xa22   :  { %v726_v44 = vadd.f32 %v4790_v43, %v5378_v12 }
 0xa23   :  { %v720_v45 = vpop.f32.mrf.mxu1 }
 0xa24   :  { %v721_v46 = vadd.f32 %v5378_v12, %v720_v45  ;;  %747 = vrot.lane.b32.xlu1 %v726_v44, %s5272_s17  ;;  %v730_v53 = vadd.f32 %v726_v44, %v649_v51 }
 0xa26   :  { %745 = vrot.lane.b32.xlu0 %v721_v46, %s5272_s17  ;;  %v729_v55 = vadd.f32 %v721_v46, %v648_v52  ;;  %v4422_v54 = vmul.f32 -1.442695, %v730_v53 }
 0xa28   :  { %v4421_v12 = vmul.f32 -1.442695, %v729_v55  ;;  %5163 = vpow2.f32 %v4422_v54 }
 0xa29   :  { %v4803_v47 = vpop.f32.mrf.mxu0 }
 0xa2a   :  { %v929_v48 = vadd.f32 %v4803_v47, %v5463_v18  ;;  %5165 = vpow2.f32 %v4421_v12 }
 0xa2b   :  { %v923_v49 = vpop.f32.mrf.mxu0 }
 0xa2c   :  { %947 = vst.msk [vmem:[#allocation2 + $0x28] sm:$0xff] %vm181_vm2, %v929_v48  ;;  %v924_v50 = vadd.f32 %v5463_v18, %v923_v49 }
 0xa2e   :  { %946 = vst.msk [vmem:[#allocation2 + $0x20] sm:$0xff] %vm181_vm2, %v924_v50 }
 0xa35   :  { %v5164_v56 = vpop.eup %5163 }
 0xa36   :  { %v738_v58 = vadd.f32 1.0, %v5164_v56 }
 0xa37   :  { %v5166_v57 = vpop.eup %5165 }
 0xa38   :  { %v737_v59 = vadd.f32 1.0, %v5166_v57  ;;  %5167 = vrcp.f32 %v738_v58 }
 0xa3a   :  { %5169 = vrcp.f32 %v737_v59 }
 0xa45   :  { %v5168_v60 = vpop.eup %5167 }
 0xa47   :  { %v5170_v62 = vpop.eup %5169 }
 0xa96   :  { %v748_v61 = vpop.permute.xlu1 %747 }
 0xa97   :  { %v752_v1 = vmul.f32 %v5168_v60, %v748_v61 }
 0xa98   :  { %v746_v4 = vpop.permute.xlu0 %745 }
 0xa99   :  { %v751_v63 = vmul.f32 %v5170_v62, %v746_v4  ;;  %757 = vrot.lane.b32.xlu1 %v752_v1, %s5273_s18 }
 0xa9b   :  { %755 = vrot.lane.b32.xlu0 %v751_v63, %s5273_s18 }
 0xb0b   :  { %v758_v0 = vpop.permute.xlu1 %757 }
 0xb0c   :  { %v762_v2 = vadd.f32 %v758_v0, %v649_v51 }
 0xb0d   :  { %v756_v5 = vpop.permute.xlu0 %755 }
 0xb0e   :  { %5171 = vtanh.f32 %v762_v2  ;;  %v761_v6 = vadd.f32 %v756_v5, %v648_v52 }
 0xb10   :  { %5173 = vtanh.f32 %v761_v6 }
 0xb1b   :  { %v5172_v8 = vpop.eup %5171 }
 0xb1c   :  { %v766_v9 = vsub.f32 %v635_v34, %v5172_v8 }
 0xb1d   :  { %v5174_v10 = vpop.eup %5173 }
 0xb1e   :  { %771 = vrot.lane.b32.xlu1 %v766_v9, %s5274_s19  ;;  %v765_v11 = vsub.f32 %v634_v36, %v5174_v10 }
 0xb20   :  { %769 = vrot.lane.b32.xlu0 %v765_v11, %s5274_s19  ;;  %v5609_v11 = vld [vmem:[#allocation2 + $0x10] sm:$0xff] }
 0xb90   :  { %v772_v13 = vpop.permute.xlu1 %771 }
 0xb91   :  { %v776_v14 = vmul.f32 %v5168_v60, %v772_v13  ;;  %v5616_v13 = vmul.f32 0.5, %v5609_v11 }
 0xb92   :  { %v770_v15 = vpop.permute.xlu0 %769 }
 0xb93   :  { %v775_v16 = vmul.f32 %v5170_v62, %v770_v15  ;;  %781 = vrot.lane.b32.xlu1 %v776_v14, %s5275_s24 }
 0xb95   :  { %779 = vrot.lane.b32.xlu0 %v775_v16, %s5275_s24 }
 0xb97   :  { %960 = vrot.lane.b32.xlu1 %v5505_v38, %s5274_s19 }
 0xb99   :  { %962 = vrot.lane.b32.xlu0 %v5534_v17, %s5274_s19 }
 0xb9b   :  { %1054 = vrot.lane.b32.xlu1 %v5505_v38, %s5276_s2 }
 0xb9d   :  { %1056 = vrot.lane.b32.xlu0 %v5534_v17, %s5276_s2 }
 0xc05   :  { %v782_v7 = vpop.permute.xlu1 %781 }
 0xc06   :  { %v786_v19 = vadd.f32 %v5172_v8, %v782_v7 }
 0xc07   :  { %v780_v20 = vpop.permute.xlu0 %779 }
 0xc08   :  { %v785_v21 = vadd.f32 %v5174_v10, %v780_v20  ;;  %791 = vrot.lane.b32.xlu1 %v786_v19, %s5272_s17  ;;  %v5605_v10 = vld [vmem:[#allocation2 + $0x18] sm:$0xff] }
 0xc09   :  { %v961_v23 = vpop.permute.xlu1 %960 }
 0xc0a   :  { %789 = vrot.lane.b32.xlu0 %v785_v21, %s5272_s17 }
 0xc0b   :  { %v963_v22 = vpop.permute.xlu0 %962 }
 0xc0c   :  { %4807 = vmatprep.subr.msk.mxu1 %vm964_vm3, %v963_v22  ;;  %1050 = vrot.lane.b32.xlu1 %v5511_v40, %s5277_s14 }
 0xc0d   :  { %4808 = vmatpush3.xpose.msk.msra.mxu1 %vm964_vm3, %v963_v22  ;;  %v1055_v26 = vpop.permute.xlu1 %1054 }
 0xc0e   :  { %1147 = vrot.lane.b32.xlu0 %v5534_v17, %s5278_s15  ;;  %4809 = vmatprep.subr.msk.mxu1 %vm964_vm3, %v961_v23 }
 0xc0f   :  { %v1057_v25 = vpop.permute.xlu0 %1056 }
 0xc10   :  { %1145 = vrot.lane.b32.xlu1 %v5505_v38, %s5278_s15 }
 0xc11   :  { %4810 = vmatpush3.xpose.msk.msra.mxu1 %vm964_vm3, %v961_v23 }
 0xc12   :  { %1052 = vrot.lane.b32.xlu0 %v957_v24, %s5277_s14  ;;  %4814 = vmatprep.subr.msk.mxu1 %vm964_vm3, %v1057_v25 }
 0xc14   :  { %1143 = vrot.lane.b32.xlu1 %v957_v24, %s5279_s16  ;;  %4812 = vmatmul.mubr.msk.f32.vlgmr.msra.gmra.mxu1 %vm964_vm3, %v957_v24 }
 0xc15   :  { %4815 = vmatpush3.xpose.msk.msra.mxu1 %vm964_vm3, %v1057_v25 }
 0xc16   :  { %1141 = vrot.lane.b32.xlu0 %v5511_v40, %s5279_s16  ;;  %4816 = vmatprep.subr.msk.mxu1 %vm964_vm3, %v1055_v26 }
 0xc19   :  { %4817 = vmatpush3.xpose.msk.msra.mxu1 %vm964_vm3, %v1055_v26 }
 0xc7a   :  { %v792_v27 = vpop.permute.xlu1 %791 }
 0xc7b   :  { %797 = vst.msk [vmem:[#allocation3 + $0x38] sm:$0xff] %vm47_vm1, %v792_v27 }
 0xc7c   :  { %v790_v28 = vpop.permute.xlu0 %789 }
 0xc7d   :  { %796 = vst.msk [vmem:[#allocation3 + $0x30] sm:$0xff] %vm47_vm1, %v790_v28 }
 0xc7e   :  { %v1051_v29 = vpop.permute.xlu1 %1050 }
 0xc7f   :  { %4818 = vmatprep.mubr.msk.f32.mxu1 %vm964_vm3, %v1051_v29 }
 0xc80   :  { %v1148_v30 = vpop.permute.xlu0 %1147 }
 0xc81   :  { %4821 = vmatprep.subr.msk.mxu0 %vm964_vm3, %v1148_v30 }
 0xc82   :  { %4822 = vmatpush3.xpose.msk.msra.mxu0 %vm964_vm3, %v1148_v30  ;;  %v1146_v31 = vpop.permute.xlu1 %1145  ;;  %v805_v34 = vld [vmem:[#allocation3 + $0x38] sm:$0xff] }
 0xc83   :  { %4823 = vmatprep.subr.msk.mxu0 %vm964_vm3, %v1146_v31 }
 0xc84   :  { %v1053_v32 = vpop.permute.xlu0 %1052  ;;  %v804_v33 = vld [vmem:[#allocation3 + $0x30] sm:$0xff] }
 0xc85   :  { %4804 = vmatprep.mubr.msk.f32.mxu0 %vm47_vm1, %v804_v33  ;;  %4819 = vmatmul.mubr.msk.f32.vlgmr.msra.gmra.mxu1 %vm964_vm3, %v1053_v32 }
 0xc86   :  { %4805 = vmatmul.mubr.msk.f32.gmra.mxu0 %vm47_vm1, %v805_v34  ;;  %v1144_v36 = vpop.permute.xlu1 %1143 }
 0xc87   :  { %4824 = vmatpush3.xpose.msk.msra.mxu0 %vm964_vm3, %v1146_v31  ;;  %v5635_v31 = vmul.f32 0.5, %v5605_v10 }
 0xc88   :  { %v1142_v35 = vpop.permute.xlu0 %1141 }
 0xc89   :  { %4825 = vmatprep.mubr.msk.f32.mxu0 %vm964_vm3, %v1142_v35 }
 0xc8a   :  { %4826 = vmatmul.mubr.msk.f32.vlgmr.msra.gmra.mxu0 %vm964_vm3, %v1144_v36 }
 0xcd4   :  { %v4813_v40 = vpop.f32.mrf.mxu1 }
 0xcd5   :  { %v1233_v45 = vadd.f32 %v4813_v40, %v5576_v42 }
 0xcd6   :  { %v1041_v43 = vpop.f32.mrf.mxu1 }
 0xcd7   :  { %v1232_v44 = vadd.f32 %v1041_v43, %v5576_v42  ;;  %v1242_v47 = vsel %vm1238_vm5, %v1233_v45, -inf }
 0xcd9   :  { %v1239_v46 = vsel %vm1238_vm5, %v1232_v44, -inf }
 0xcda   :  { %1240 = vmax.xlane.f32.xlu0 %v1239_v46 }
 0xcde   :  { %1243 = vmax.xlane.f32.xlu0 %v1242_v47 }
 0xd45   :  { %v4820_v48 = vpop.f32.mrf.mxu1 }
 0xd46   :  { %v1235_v49 = vadd.f32 %v4820_v48, %v5576_v42  ;;  %v4806_v50 = vpop.f32.mrf.mxu0 }
 0xd47   :  { %v939_v51 = vadd.f32 %v4806_v50, %v5463_v18  ;;  %v1132_v52 = vpop.f32.mrf.mxu1 }
 0xd48   :  { %v1234_v53 = vadd.f32 %v1132_v52, %v5576_v42  ;;  %v933_v55 = vpop.f32.mrf.mxu0  ;;  %v1248_v54 = vsel %vm1238_vm5, %v1235_v49, -inf }
 0xd49   :  { %949 = vst.msk [vmem:[#allocation2 + $0x38] sm:$0xff] %vm181_vm2, %v939_v51  ;;  %v934_v12 = vadd.f32 %v5463_v18, %v933_v55  ;;  %1249 = vmax.xlane.f32.xlu0 %v1248_v54 }
 0xd4a   :  { %v4827_v56 = vpop.f32.mrf.mxu0  ;;  %v1245_v57 = vsel %vm1238_vm5, %v1234_v53, -inf }
 0xd4b   :  { %948 = vst.msk [vmem:[#allocation2 + $0x30] sm:$0xff] %vm181_vm2, %v934_v12  ;;  %v5591_v58 = vadd.f32 %v4827_v56, %v5576_v42  ;;  %1246 = vmax.xlane.f32.xlu1 %v1245_v57 }
 0xd4c   :  { %v1223_v59 = vpop.f32.mrf.mxu0 }
 0xd4d   :  { %v1236_v60 = vadd.f32 %v1223_v59, %v5576_v42  ;;  %v1254_v61 = vsel %vm1238_vm5, %v5591_v58, -inf }
 0xd4e   :  { %1255 = vmax.xlane.f32.xlu0 %v1254_v61 }
 0xd4f   :  { %v1251_v1 = vsel %vm1238_vm5, %v1236_v60, -inf }
 0xd50   :  { %1252 = vmax.xlane.f32.xlu1 %v1251_v1 }
 0xd63   :  { %v1241_v18 = vpop.xlane.xlu0 %1240 }
 0xd64   :  { %v1257_v62 = vsub.f32 %v1232_v44, %v1241_v18 }
 0xd66   :  { %v1263_v4 = vmul.f32 1.442695, %v1257_v62 }
 0xd67   :  { %v1244_v63 = vpop.xlane.xlu0 %1243 }
 0xd68   :  { %5175 = vpow2.f32 %v1263_v4  ;;  %v1258_v0 = vsub.f32 %v1233_v45, %v1244_v63 }
 0xd6a   :  { %v1265_v2 = vmul.f32 1.442695, %v1258_v0 }
 0xd6c   :  { %5177 = vpow2.f32 %v1265_v2 }
 0xd75   :  { %v5176_v5 = vpop.eup %5175 }
 0xd76   :  { %v1275_v6 = vsel %vm1238_vm5, %v5176_v5, 0.0 }
 0xd77   :  { %1276 = vadd.xlane.f32.xlu1 %v1275_v6 }
 0xd79   :  { %v5178_v8 = vpop.eup %5177 }
 0xd7a   :  { %v1278_v9 = vsel %vm1238_vm5, %v5178_v8, 0.0 }
 0xd7b   :  { %1279 = vadd.xlane.f32.xlu1 %v1278_v9 }
 0xd8c   :  { %1307 = vrot.lane.b32.xlu1 %v5534_v17, %s5272_s17 }
 0xd90   :  { %1305 = vrot.lane.b32.xlu1 %v5505_v38, %s5272_s17 }
 0xd94   :  { %1392 = vrot.lane.b32.xlu1 %v5505_v38, %s5281_s20 }
 0xd98   :  { %1597 = vrot.lane.b32.xlu1 %v5605_v10, %s5274_s19 }
 0xd9c   :  { %1595 = vrot.lane.b32.xlu1 %v5609_v11, %s5274_s19 }
 0xda0   :  { %1688 = vrot.lane.b32.xlu1 %v5609_v11, %s5276_s2 }
 0xda4   :  { %1684 = vrot.lane.b32.xlu1 %v5616_v13, %s5277_s14 }
 0xdd2   :  { %v1250_v14 = vpop.xlane.xlu0 %1249 }
 0xdd3   :  { %v1260_v15 = vsub.f32 %v1235_v49, %v1250_v14 }
 0xdd4   :  { %v1247_v16 = vpop.xlane.xlu1 %1246 }
 0xdd5   :  { %v1259_v7 = vsub.f32 %v1234_v53, %v1247_v16  ;;  %v1269_v19 = vmul.f32 1.442695, %v1260_v15 }
 0xdd7   :  { %v1267_v20 = vmul.f32 1.442695, %v1259_v7  ;;  %v1256_v37 = vpop.xlane.xlu0 %1255 }
 0xdd9   :  { %5179 = vpow2.f32 %v1267_v20  ;;  %v1253_v21 = vpop.xlane.xlu1 %1252 }
 0xdda   :  { %v1261_v22 = vsub.f32 %v1236_v60, %v1253_v21  ;;  %5181 = vpow2.f32 %v1269_v19 }
 0xddc   :  { %v1271_v23 = vmul.f32 1.442695, %v1261_v22 }
 0xdde   :  { %5183 = vpow2.f32 %v1271_v23 }
 0xde6   :  { %v5620_v24 = vpop.eup %5179 }
 0xde7   :  { %v1281_v25 = vsel %vm1238_vm5, %v5620_v24, 0.0  ;;  %v5624_v26 = vpop.eup %5181 }
 0xde8   :  { %1282 = vadd.xlane.f32.xlu0 %v1281_v25  ;;  %v1284_v28 = vsel %vm1238_vm5, %v5624_v26, 0.0 }
 0xdeb   :  { %v5626_v27 = vpop.eup %5183 }
 0xdec   :  { %1285 = vadd.xlane.f32.xlu0 %v1284_v28  ;;  %v1287_v29 = vsel %vm1238_vm5, %v5626_v27, 0.0 }
 0xded   :  { %1288 = vadd.xlane.f32.xlu1 %v1287_v29 }
 0xdfe   :  { %1779 = vrot.lane.b32.xlu1 %v5609_v11, %s5278_s15 }
 0xe00   :  { %v1277_v30 = vpop.xlane.xlu1 %1276 }
 0xe01   :  { %5185 = vrcp.f32 %v1277_v30 }
 0xe02   :  { %1394 = vrot.lane.b32.xlu0 %v5534_v17, %s5281_s20  ;;  %1777 = vrot.lane.b32.xlu1 %v5635_v31, %s5279_s16 }
 0xe04   :  { %v1280_v32 = vpop.xlane.xlu1 %1279 }
 0xe05   :  { %5187 = vrcp.f32 %v1280_v32 }
 0xe06   :  { %1481 = vrot.lane.b32.xlu0 %v5534_v17, %s5282_s21  ;;  %v1262_v17 = vsub.f32 %v5591_v58, %v1256_v37 }
 0xe08   :  { %v1308_v33 = vpop.permute.xlu1 %1307  ;;  %v1273_v41 = vmul.f32 1.442695, %v1262_v17 }
 0xe09   :  { %4828 = vmatprep.subr.mxu1 %v1308_v33 }
 0xe0a   :  { %1479 = vrot.lane.b32.xlu0 %v5505_v38, %s5282_s21  ;;  %4829 = vmatpush3.msra.mxu1 %v1308_v33  ;;  %5189 = vpow2.f32 %v1273_v41 }
 0xe0c   :  { %v1306_v34 = vpop.permute.xlu1 %1305 }
 0xe0d   :  { %4830 = vmatprep.subr.mxu1 %v1306_v34 }
 0xe0e   :  { %v5186_v35 = vpop.eup %5185  ;;  %1690 = vrot.lane.b32.xlu0 %v5605_v10, %s5276_s2  ;;  %4831 = vmatpush3.msra.mxu1 %v1306_v34 }
 0xe0f   :  { %v1299_v36 = vmul.f32 %v5186_v35, %v5176_v5 }
 0xe10   :  { %v1393_v44 = vpop.permute.xlu1 %1392 }
 0xe11   :  { %4832 = vmatprep.mubr.msk.f32.mxu1 %vm1238_vm5, %v1299_v36 }
 0xe12   :  { %v5188_v39 = vpop.eup %5187 }
 0xe13   :  { %v1300_v40 = vmul.f32 %v5188_v39, %v5178_v8 }
 0xe14   :  { %v1598_v45 = vpop.permute.xlu1 %1597 }
 0xe15   :  { %4833 = vmatmul.mubr.msk.f32.vlgmr.msra.gmra.mxu1 %vm1238_vm5, %v1300_v40 }
 0xe17   :  { %v5190_v38 = vpop.eup %5189 }
 0xe18   :  { %v1290_v43 = vsel %vm1238_vm5, %v5190_v38, 0.0  ;;  %v1596_v46 = vpop.permute.xlu1 %1595 }
 0xe1c   :  { %v1689_v47 = vpop.permute.xlu1 %1688 }
 0xe20   :  { %v1685_v49 = vpop.permute.xlu1 %1684 }
 0xe2d   :  { %1291 = vadd.xlane.f32.xlu0 %v1290_v43 }
 0xe43   :  { %1781 = vrot.lane.b32.xlu0 %v5605_v10, %s5278_s15 }
 0xe47   :  { %1686 = vrot.lane.b32.xlu0 %v5635_v31, %s5277_s14 }
 0xe4b   :  { %1775 = vrot.lane.b32.xlu0 %v5616_v13, %s5279_s16 }
 0xe71   :  { %v1283_v48 = vpop.xlane.xlu0 %1282 }
 0xe72   :  { %5191 = vrcp.f32 %v1283_v48 }
 0xe75   :  { %v1286_v50 = vpop.xlane.xlu0 %1285 }
 0xe76   :  { %5193 = vrcp.f32 %v1286_v50  ;;  %v1289_v51 = vpop.xlane.xlu1 %1288 }
 0xe77   :  { %5195 = vrcp.f32 %v1289_v51 }
 0xe79   :  { %v1395_v52 = vpop.permute.xlu0 %1394 }
 0xe7a   :  { %4835 = vmatprep.subr.mxu0 %v1395_v52  ;;  %v1780_v18 = vpop.permute.xlu1 %1779 }
 0xe7b   :  { %4836 = vmatpush3.msra.mxu0 %v1395_v52 }
 0xe7c   :  { %4837 = vmatprep.subr.mxu0 %v1393_v44 }
 0xe7d   :  { %v1482_v53 = vpop.permute.xlu0 %1481  ;;  %4838 = vmatpush3.msra.mxu0 %v1393_v44 }
 0xe7e   :  { %4842 = vmatprep.subr.mxu1 %v1482_v53  ;;  %4849 = vmatprep.subr.msk.mxu0 %vm964_vm3, %v1598_v45  ;;  %v1778_v63 = vpop.permute.xlu1 %1777 }
 0xe7f   :  { %v5192_v55 = vpop.eup %5191  ;;  %4843 = vmatpush3.msra.mxu1 %v1482_v53 }
 0xe80   :  { %v1301_v54 = vmul.f32 %v5192_v55, %v5620_v24 }
 0xe81   :  { %v1480_v12 = vpop.permute.xlu0 %1479 }
 0xe82   :  { %4839 = vmatprep.mubr.msk.f32.mxu0 %vm1238_vm5, %v1301_v54  ;;  %4844 = vmatprep.subr.mxu1 %v1480_v12 }
 0xe83   :  { %v5194_v56 = vpop.eup %5193  ;;  %4845 = vmatpush3.msra.mxu1 %v1480_v12  ;;  %v2222_v12 = vld [vmem:[#allocation2 + $0x28] sm:$0xff] }
 0xe84   :  { %v5196_v57 = vpop.eup %5195  ;;  %v1302_v58 = vmul.f32 %v5194_v56, %v5624_v26  ;;  %v5725_v56 = vld [vmem:[#allocation2 + $0x20] sm:$0xff] }
 0xe85   :  { %v1691_v59 = vpop.permute.xlu0 %1690  ;;  %v1303_v60 = vmul.f32 %v5196_v57, %v5626_v27 }
 0xe86   :  { %4840 = vmatmul.mubr.msk.f32.vlgmr.msra.gmra.mxu0 %vm1238_vm5, %v1302_v58  ;;  %4856 = vmatprep.subr.msk.mxu1 %vm964_vm3, %v1691_v59 }
 0xe87   :  { %4850 = vmatpush3.xpose.msk.msra.mxu0 %vm964_vm3, %v1598_v45  ;;  %4846 = vmatprep.mubr.msk.f32.mxu1 %vm1238_vm5, %v1303_v60 }
 0xe88   :  { %4851 = vmatprep.subr.msk.mxu0 %vm964_vm3, %v1596_v46  ;;  %4853 = vmatprep.mubr.msk.f32.mxu0 %vm964_vm3, %v5616_v13 }
 0xe8b   :  { %4852 = vmatpush3.xpose.msk.msra.mxu0 %vm964_vm3, %v1596_v46 }
 0xe8e   :  { %4854 = vmatmul.mubr.msk.f32.vlgmr.msra.gmra.mxu0 %vm964_vm3, %v5635_v31 }
 0xeb6   :  { %v1292_v61 = vpop.xlane.xlu0 %1291 }
 0xeb7   :  { %5197 = vrcp.f32 %v1292_v61 }
 0xeba   :  { %v1782_v1 = vpop.permute.xlu0 %1781 }
 0xebb   :  { %4863 = vmatprep.subr.msk.mxu0 %vm964_vm3, %v1782_v1 }
 0xebc   :  { %4864 = vmatpush3.xpose.msk.msra.mxu0 %vm964_vm3, %v1782_v1 }
 0xebd   :  { %4865 = vmatprep.subr.msk.mxu0 %vm964_vm3, %v1780_v18 }
 0xebe   :  { %v1687_v62 = vpop.permute.xlu0 %1686 }
 0xec0   :  { %4866 = vmatpush3.xpose.msk.msra.mxu0 %vm964_vm3, %v1780_v18 }
 0xec2   :  { %v1776_v4 = vpop.permute.xlu0 %1775 }
 0xec3   :  { %4867 = vmatprep.mubr.msk.f32.mxu0 %vm964_vm3, %v1776_v4 }
 0xec4   :  { %v5198_v0 = vpop.eup %5197  ;;  %4868 = vmatmul.mubr.msk.f32.vlgmr.msra.gmra.mxu0 %vm964_vm3, %v1778_v63 }
 0xec5   :  { %v1304_v2 = vmul.f32 %v5198_v0, %v5190_v38  ;;  %v5756_v0 = vmul.f32 0.5, %v5725_v56 }
 0xec7   :  { %4847 = vmatmul.mubr.msk.f32.vlgmr.msra.gmra.mxu1 %vm1238_vm5, %v1304_v2 }
 0xec8   :  { %4857 = vmatpush3.xpose.msk.msra.mxu1 %vm964_vm3, %v1691_v59  ;;  %4860 = vmatprep.mubr.msk.f32.mxu1 %vm964_vm3, %v1685_v49 }
 0xec9   :  { %4858 = vmatprep.subr.msk.mxu1 %vm964_vm3, %v1689_v47 }
 0xecc   :  { %4859 = vmatpush3.xpose.msk.msra.mxu1 %vm964_vm3, %v1689_v47 }
 0xecf   :  { %4861 = vmatmul.mubr.msk.f32.vlgmr.msra.gmra.mxu1 %vm964_vm3, %v1687_v62 }
 0xed5   :  { %v5692_v7 = vpop.f32.mrf.mxu1 }
 0xed7   :  { %v5694_v21 = vpop.f32.mrf.mxu1 }
 0xf46   :  { %v5684_v5 = vpop.f32.mrf.mxu0 }
 0xf48   :  { %v5686_v6 = vpop.f32.mrf.mxu0 }
 0xf4e   :  { %v4855_v8 = vpop.f32.mrf.mxu0 }
 0xf4f   :  { %v1867_v9 = vadd.f32 %v4855_v8, %v5576_v42 }
 0xf50   :  { %v1675_v13 = vpop.f32.mrf.mxu0 }
 0xf51   :  { %v1866_v14 = vadd.f32 %v1675_v13, %v5576_v42  ;;  %v1875_v15 = vsel %vm1238_vm5, %v1867_v9, -inf }
 0xf52   :  { %1876 = vmax.xlane.f32.xlu1 %v1875_v15 }
 0xf53   :  { %v1872_v16 = vsel %vm1238_vm5, %v1866_v14, -inf }
 0xf54   :  { %1873 = vmax.xlane.f32.xlu0 %v1872_v16 }
 0xf84   :  { %v4869_v19 = vpop.f32.mrf.mxu0 }
 0xf85   :  { %v1871_v31 = vadd.f32 %v4869_v19, %v5576_v42 }
 0xf86   :  { %v1857_v20 = vpop.f32.mrf.mxu0 }
 0xf87   :  { %v1870_v22 = vadd.f32 %v1857_v20, %v5576_v42  ;;  %v5697_v23 = vpop.f32.mrf.mxu1  ;;  %v1887_v33 = vsel %vm1238_vm5, %v1871_v31, -inf }
 0xf89   :  { %v1884_v24 = vsel %vm1238_vm5, %v1870_v22, -inf  ;;  %v5700_v25 = vpop.f32.mrf.mxu1 }
 0xf8a   :  { %1885 = vmax.xlane.f32.xlu1 %v1884_v24 }
 0xf8f   :  { %v4862_v26 = vpop.f32.mrf.mxu1 }
 0xf90   :  { %v1869_v29 = vadd.f32 %v4862_v26, %v5576_v42 }
 0xf91   :  { %v1766_v27 = vpop.f32.mrf.mxu1 }
 0xf92   :  { %v1868_v28 = vadd.f32 %v1766_v27, %v5576_v42  ;;  %v1881_v32 = vsel %vm1238_vm5, %v1869_v29, -inf }
 0xf94   :  { %v1878_v30 = vsel %vm1238_vm5, %v1868_v28, -inf }
 0xf95   :  { %1879 = vmax.xlane.f32.xlu0 %v1878_v30 }
 0xf99   :  { %1882 = vmax.xlane.f32.xlu0 %v1881_v32 }
 0xf9d   :  { %1888 = vmax.xlane.f32.xlu0 %v1887_v33 }
 0xfdb   :  { %v1877_v34 = vpop.xlane.xlu1 %1876 }
 0xfdc   :  { %v1891_v35 = vsub.f32 %v1867_v9, %v1877_v34 }
 0xfdd   :  { %v1874_v36 = vpop.xlane.xlu0 %1873 }
 0xfde   :  { %v1898_v37 = vmul.f32 1.442695, %v1891_v35  ;;  %v1890_v39 = vsub.f32 %v1866_v14, %v1874_v36 }
 0xfe0   :  { %5199 = vpow2.f32 %v1898_v37  ;;  %v1896_v40 = vmul.f32 1.442695, %v1890_v39 }
 0xfe2   :  { %5201 = vpow2.f32 %v1896_v40 }
 0xfed   :  { %v5708_v17 = vpop.eup %5199 }
 0xfee   :  { %v1911_v41 = vsel %vm1238_vm5, %v5708_v17, 0.0 }
 0xfef   :  { %v5202_v38 = vpop.eup %5201  ;;  %1912 = vadd.xlane.f32.xlu0 %v1911_v41 }
 0xff0   :  { %v1908_v43 = vsel %vm1238_vm5, %v5202_v38, 0.0 }
 0xff1   :  { %1909 = vadd.xlane.f32.xlu1 %v1908_v43 }
0x1013   :  { %v1886_v44 = vpop.xlane.xlu1 %1885 }
0x1014   :  { %v1894_v45 = vsub.f32 %v1870_v22, %v1886_v44 }
0x1016   :  { %v1904_v46 = vmul.f32 1.442695, %v1894_v45 }
0x1018   :  { %5203 = vpow2.f32 %v1904_v46 }
0x101e   :  { %v1880_v47 = vpop.xlane.xlu0 %1879 }
0x101f   :  { %v1892_v57 = vsub.f32 %v1868_v28, %v1880_v47 }
0x1021   :  { %v1900_v58 = vmul.f32 1.442695, %v1892_v57 }
0x1022   :  { %v1883_v48 = vpop.xlane.xlu0 %1882 }
0x1023   :  { %v1893_v59 = vsub.f32 %v1869_v29, %v1883_v48 }
0x1025   :  { %v5204_v49 = vpop.eup %5203  ;;  %v1902_v60 = vmul.f32 1.442695, %v1893_v59  ;;  %v5813_v59 = vld [vmem:[#allocation2 + $0x38] sm:$0xff] }
0x1026   :  { %v1889_v50 = vpop.xlane.xlu0 %1888  ;;  %v1920_v51 = vsel %vm1238_vm5, %v5204_v49, 0.0 }
0x1027   :  { %v1895_v52 = vsub.f32 %v1871_v31, %v1889_v50  ;;  %1921 = vadd.xlane.f32.xlu1 %v1920_v51 }
0x1029   :  { %v1906_v53 = vmul.f32 1.442695, %v1895_v52 }
0x102b   :  { %5205 = vpow2.f32 %v1906_v53 }
0x102c   :  { %5207 = vpow2.f32 %v1900_v58 }
0x102d   :  { %5209 = vpow2.f32 %v1902_v60  ;;  %v5817_v60 = vld [vmem:[#allocation2 + $0x30] sm:$0xff] }
0x1038   :  { %v5714_v55 = vpop.eup %5205  ;;  %1940 = vrot.lane.b32.xlu1 %v5605_v10, %s5272_s17 }
0x1039   :  { %v1923_v54 = vsel %vm1238_vm5, %v5714_v55, 0.0  ;;  %v5735_v61 = vpop.eup %5207 }
0x103a   :  { %1924 = vadd.xlane.f32.xlu0 %v1923_v54  ;;  %v1914_v1 = vsel %vm1238_vm5, %v5735_v61, 0.0  ;;  %v5739_v18 = vpop.eup %5209 }
0x103b   :  { %v1917_v62 = vsel %vm1238_vm5, %v5739_v18, 0.0 }
0x103c   :  { %2027 = vrot.lane.b32.xlu1 %v5605_v10, %s5281_s20 }
0x1040   :  { %2025 = vrot.lane.b32.xlu1 %v5609_v11, %s5281_s20 }
0x1044   :  { %2229 = vrot.lane.b32.xlu1 %v2222_v12, %s5274_s19 }
0x1048   :  { %2227 = vrot.lane.b32.xlu1 %v5725_v56, %s5274_s19 }
0x1050   :  { %1938 = vrot.lane.b32.xlu0 %v5609_v11, %s5272_s17 }
0x1054   :  { %2114 = vrot.lane.b32.xlu0 %v5605_v10, %s5282_s21 }
0x1058   :  { %2112 = vrot.lane.b32.xlu0 %v5609_v11, %s5282_s21  ;;  %v5748_v11 = vmul.f32 0.5, %v2222_v12 }
0x106c   :  { %1915 = vadd.xlane.f32.xlu1 %v1914_v1 }
0x1077   :  { %1918 = vadd.xlane.f32.xlu0 %v1917_v62 }
0x1078   :  { %v1913_v9 = vpop.xlane.xlu0 %1912 }
0x107a   :  { %v1910_v10 = vpop.xlane.xlu1 %1909 }
0x107b   :  { %5211 = vrcp.f32 %v1910_v10 }
0x107d   :  { %2320 = vrot.lane.b32.xlu1 %v5725_v56, %s5276_s2 }
0x1081   :  { %2413 = vrot.lane.b32.xlu1 %v2222_v12, %s5278_s15 }
0x1085   :  { %2411 = vrot.lane.b32.xlu1 %v5725_v56, %s5278_s15 }
0x1088   :  { %v5212_v4 = vpop.eup %5211 }
0x1089   :  { %2409 = vrot.lane.b32.xlu1 %v5748_v11, %s5279_s16  ;;  %v1932_v63 = vmul.f32 %v5212_v4, %v5202_v38 }
0x108b   :  { %4874 = vmatprep.mubr.msk.f32.mxu1 %vm1238_vm5, %v1932_v63 }
0x108d   :  { %2322 = vrot.lane.b32.xlu0 %v2222_v12, %s5276_s2  ;;  %2572 = vrot.lane.b32.xlu1 %v2222_v12, %s5272_s17 }
0x1091   :  { %2316 = vrot.lane.b32.xlu0 %v5756_v0, %s5277_s14  ;;  %2659 = vrot.lane.b32.xlu1 %v2222_v12, %s5281_s20 }
0x1095   :  { %2318 = vrot.lane.b32.xlu0 %v5748_v11, %s5277_s14  ;;  %2657 = vrot.lane.b32.xlu1 %v5725_v56, %s5281_s20 }
0x1099   :  { %2407 = vrot.lane.b32.xlu0 %v5756_v0, %s5279_s16  ;;  %2746 = vrot.lane.b32.xlu1 %v2222_v12, %s5282_s21 }
0x109d   :  { %2744 = vrot.lane.b32.xlu1 %v5725_v56, %s5282_s21 }
0x10b0   :  { %v1922_v2 = vpop.xlane.xlu1 %1921 }
0x10b1   :  { %5213 = vrcp.f32 %v1922_v2 }
0x10b2   :  { %5215 = vrcp.f32 %v1913_v9 }
0x10b4   :  { %v1941_v8 = vpop.permute.xlu1 %1940 }
0x10b5   :  { %4870 = vmatprep.subr.mxu1 %v1941_v8 }
0x10b6   :  { %4871 = vmatpush3.msra.mxu1 %v1941_v8 }
0x10b8   :  { %v2028_v15 = vpop.permute.xlu1 %2027 }
0x10bc   :  { %v2026_v20 = vpop.permute.xlu1 %2025 }
0x10be   :  { %v5214_v13 = vpop.eup %5213 }
0x10bf   :  { %v1936_v14 = vmul.f32 %v5214_v13, %v5204_v49  ;;  %v5216_v19 = vpop.eup %5215 }
0x10c0   :  { %v1933_v24 = vmul.f32 %v5216_v19, %v5708_v17  ;;  %v2230_v27 = vpop.permute.xlu1 %2229 }
0x10c1   :  { %4888 = vmatprep.mubr.msk.f32.mxu0 %vm1238_vm5, %v1936_v14 }
0x10c3   :  { %v1925_v16 = vpop.xlane.xlu0 %1924 }
0x10c4   :  { %5217 = vrcp.f32 %v1925_v16  ;;  %v2228_v31 = vpop.permute.xlu1 %2227 }
0x10c7   :  { %v1939_v22 = vpop.permute.xlu0 %1938 }
0x10c8   :  { %4872 = vmatprep.subr.mxu1 %v1939_v22 }
0x10c9   :  { %4873 = vmatpush3.msra.mxu1 %v1939_v22 }
0x10ca   :  { %4875 = vmatmul.mubr.msk.f32.vlgmr.msra.gmra.mxu1 %vm1238_vm5, %v1933_v24  ;;  %4877 = vmatprep.subr.mxu1 %v2028_v15 }
0x10cb   :  { %v2115_v26 = vpop.permute.xlu0 %2114  ;;  %4878 = vmatpush3.msra.mxu1 %v2028_v15 }
0x10cc   :  { %4879 = vmatprep.subr.mxu1 %v2026_v20  ;;  %4884 = vmatprep.subr.mxu0 %v2115_v26 }
0x10cd   :  { %4880 = vmatpush3.msra.mxu1 %v2026_v20  ;;  %4885 = vmatpush3.msra.mxu0 %v2115_v26 }
0x10ce   :  { %4891 = vmatprep.subr.msk.mxu1 %vm964_vm3, %v2230_v27 }
0x10cf   :  { %v2113_v28 = vpop.permute.xlu0 %2112 }
0x10d0   :  { %4886 = vmatprep.subr.mxu0 %v2113_v28 }
0x10d1   :  { %v5218_v29 = vpop.eup %5217  ;;  %4887 = vmatpush3.msra.mxu0 %v2113_v28 }
0x10d2   :  { %v1937_v30 = vmul.f32 %v5218_v29, %v5714_v55 }
0x10d4   :  { %4889 = vmatmul.mubr.msk.f32.vlgmr.msra.gmra.mxu0 %vm1238_vm5, %v1937_v30 }
0x10f5   :  { %v1916_v32 = vpop.xlane.xlu1 %1915 }
0x10f6   :  { %5219 = vrcp.f32 %v1916_v32 }
0x10f9   :  { %v2321_v33 = vpop.permute.xlu1 %2320 }
0x10fd   :  { %v2414_v34 = vpop.permute.xlu1 %2413 }
0x1100   :  { %v1919_v35 = vpop.xlane.xlu0 %1918 }
0x1101   :  { %5221 = vrcp.f32 %v1919_v35  ;;  %v2412_v36 = vpop.permute.xlu1 %2411 }
0x1103   :  { %v5220_v37 = vpop.eup %5219 }
0x1104   :  { %v2323_v39 = vpop.permute.xlu0 %2322  ;;  %v1934_v40 = vmul.f32 %v5220_v37, %v5735_v61 }
0x1105   :  { %4898 = vmatprep.subr.msk.mxu0 %vm964_vm3, %v2323_v39  ;;  %v2410_v17 = vpop.permute.xlu1 %2409 }
0x1106   :  { %4899 = vmatpush3.xpose.msk.msra.mxu0 %vm964_vm3, %v2323_v39  ;;  %4881 = vmatprep.mubr.msk.f32.mxu1 %vm1238_vm5, %v1934_v40 }
0x1107   :  { %4900 = vmatprep.subr.msk.mxu0 %vm964_vm3, %v2321_v33 }
0x1108   :  { %v2317_v41 = vpop.permute.xlu0 %2316 }
0x1109   :  { %4902 = vmatprep.mubr.msk.f32.mxu0 %vm964_vm3, %v2317_v41  ;;  %v2573_v38 = vpop.permute.xlu1 %2572 }
0x110a   :  { %4901 = vmatpush3.xpose.msk.msra.mxu0 %vm964_vm3, %v2321_v33 }
0x110b   :  { %4912 = vmatprep.subr.mxu0 %v2573_v38 }
0x110c   :  { %v2319_v43 = vpop.permute.xlu0 %2318 }
0x110d   :  { %4903 = vmatmul.mubr.msk.f32.vlgmr.msra.gmra.mxu0 %vm964_vm3, %v2319_v43  ;;  %v5785_v46 = vpop.permute.xlu1 %2659 }
0x110e   :  { %v5222_v44 = vpop.eup %5221  ;;  %4913 = vmatpush3.msra.mxu0 %v2573_v38 }
0x110f   :  { %v1935_v45 = vmul.f32 %v5222_v44, %v5739_v18 }
0x1110   :  { %v2408_v48 = vpop.permute.xlu0 %2407 }
0x1111   :  { %4882 = vmatmul.mubr.msk.f32.vlgmr.msra.gmra.mxu1 %vm1238_vm5, %v1935_v45  ;;  %v5792_v47 = vpop.permute.xlu1 %2657 }
0x1112   :  { %4892 = vmatpush3.xpose.msk.msra.mxu1 %vm964_vm3, %v2230_v27  ;;  %4895 = vmatprep.mubr.msk.f32.mxu1 %vm964_vm3, %v5756_v0 }
0x1113   :  { %4893 = vmatprep.subr.msk.mxu1 %vm964_vm3, %v2228_v31 }
0x1115   :  { %v2747_v49 = vpop.permute.xlu1 %2746 }
0x1116   :  { %4894 = vmatpush3.xpose.msk.msra.mxu1 %vm964_vm3, %v2228_v31 }
0x1117   :  { %4905 = vmatprep.subr.msk.mxu1 %vm964_vm3, %v2414_v34 }
0x1119   :  { %4896 = vmatmul.mubr.msk.f32.vlgmr.msra.gmra.mxu1 %vm964_vm3, %v5748_v11  ;;  %v2745_v50 = vpop.permute.xlu1 %2744 }
0x111a   :  { %4906 = vmatpush3.xpose.msk.msra.mxu1 %vm964_vm3, %v2414_v34  ;;  %4909 = vmatprep.mubr.msk.f32.mxu1 %vm964_vm3, %v2408_v48 }
0x111b   :  { %4907 = vmatprep.subr.msk.mxu1 %vm964_vm3, %v2412_v36 }
0x111e   :  { %4908 = vmatpush3.xpose.msk.msra.mxu1 %vm964_vm3, %v2412_v36 }
0x111f   :  { %4926 = vmatprep.subr.mxu1 %v2747_v49 }
0x1121   :  { %4910 = vmatmul.mubr.msk.f32.vlgmr.msra.gmra.mxu1 %vm964_vm3, %v2410_v17 }
0x1122   :  { %4927 = vmatpush3.msra.mxu1 %v2747_v49 }
0x1123   :  { %4928 = vmatprep.subr.mxu1 %v2745_v50 }
0x1124   :  { %4929 = vmatpush3.msra.mxu1 %v2745_v50 }
0x118a   :  { %v5821_v61 = vpop.f32.mrf.mxu1 }
0x118c   :  { %v5823_v62 = vpop.f32.mrf.mxu1 }
0x1194   :  { %v5803_v51 = vpop.f32.mrf.mxu0 }
0x1196   :  { %v5805_v52 = vpop.f32.mrf.mxu0 }
0x11cd   :  { %v4904_v53 = vpop.f32.mrf.mxu0 }
0x11ce   :  { %v2501_v12 = vadd.f32 %v4904_v53, %v5576_v42 }
0x11cf   :  { %v2398_v55 = vpop.f32.mrf.mxu0 }
0x11d0   :  { %v2500_v54 = vadd.f32 %v2398_v55, %v5576_v42  ;;  %v2513_v58 = vsel %vm1238_vm5, %v2501_v12, -inf }
0x11d1   :  { %v5825_v11 = vpop.f32.mrf.mxu1 }
0x11d2   :  { %v2510_v57 = vsel %vm1238_vm5, %v2500_v54, -inf }
0x11d3   :  { %2511 = vmax.xlane.f32.xlu0 %v2510_v57  ;;  %v5827_v0 = vpop.f32.mrf.mxu1 }
0x11d7   :  { %2514 = vmax.xlane.f32.xlu0 %v2513_v58 }
0x11d9   :  { %v4897_v8 = vpop.f32.mrf.mxu1 }
0x11da   :  { %v2499_v15 = vadd.f32 %v4897_v8, %v5576_v42 }
0x11db   :  { %v2307_v9 = vpop.f32.mrf.mxu1 }
0x11dc   :  { %v2498_v22 = vadd.f32 %v2307_v9, %v5576_v42  ;;  %v2507_v26 = vsel %vm1238_vm5, %v2499_v15, -inf }
0x11de   :  { %v2504_v29 = vsel %vm1238_vm5, %v2498_v22, -inf }
0x11e1   :  { %v4911_v13 = vpop.f32.mrf.mxu1 }
0x11e2   :  { %v2503_v28 = vadd.f32 %v4911_v13, %v5576_v42 }
0x11e3   :  { %v2489_v19 = vpop.f32.mrf.mxu1 }
0x11e4   :  { %v2502_v24 = vadd.f32 %v2489_v19, %v5576_v42  ;;  %v2519_v31 = vsel %vm1238_vm5, %v2503_v28, -inf }
0x11e6   :  { %v2516_v30 = vsel %vm1238_vm5, %v2502_v24, -inf }
0x11ed   :  { %2570 = vrot.lane.b32.xlu0 %v5725_v56, %s5272_s17 }
0x11f1   :  { %2861 = vrot.lane.b32.xlu0 %v5813_v59, %s5274_s19 }
0x11f5   :  { %2859 = vrot.lane.b32.xlu0 %v5817_v60, %s5274_s19  ;;  %s5284_s19 = smov 8  }
0x125c   :  { %v2512_v1 = vpop.xlane.xlu0 %2511 }
0x125d   :  { %v2524_v18 = vsub.f32 %v2500_v54, %v2512_v1 }
0x125f   :  { %v2532_v10 = vmul.f32 1.442695, %v2524_v18 }
0x1260   :  { %v2515_v56 = vpop.xlane.xlu0 %2514 }
0x1261   :  { %5223 = vpow2.f32 %v2532_v10  ;;  %v2525_v4 = vsub.f32 %v2501_v12, %v2515_v56  ;;  %v2856_v10 = vmul.f32 0.5, %v5813_v59  ;;  %v2855_v56 = vmul.f32 0.5, %v5817_v60 }
0x1263   :  { %v2534_v63 = vmul.f32 1.442695, %v2525_v4 }
0x1264   :  { %v2571_v2 = vpop.permute.xlu0 %2570 }
0x1265   :  { %5225 = vpow2.f32 %v2534_v63  ;;  %4914 = vmatprep.subr.mxu0 %v2571_v2 }
0x1266   :  { %4915 = vmatpush3.msra.mxu0 %v2571_v2 }
0x1267   :  { %4919 = vmatprep.subr.mxu0 %v5785_v46 }
0x1268   :  { %v5850_v32 = vpop.permute.xlu0 %2861 }
0x126c   :  { %v5852_v33 = vpop.permute.xlu0 %2859 }
0x126e   :  { %v5830_v14 = vpop.eup %5223 }
0x126f   :  { %v2546_v16 = vsel %vm1238_vm5, %v5830_v14, 0.0 }
0x1270   :  { %2547 = vadd.xlane.f32.xlu1 %v2546_v16 }
0x1272   :  { %v5835_v20 = vpop.eup %5225 }
0x1273   :  { %v2549_v27 = vsel %vm1238_vm5, %v5835_v20, 0.0 }
0x1274   :  { %2508 = vmax.xlane.f32.xlu1 %v2507_v26  ;;  %2550 = vadd.xlane.f32.xlu0 %v2549_v27 }
0x1278   :  { %2505 = vmax.xlane.f32.xlu0 %v2504_v29  ;;  %2517 = vmax.xlane.f32.xlu1 %v2516_v30 }
0x127c   :  { %2520 = vmax.xlane.f32.xlu0 %v2519_v31 }
0x1289   :  { %3045 = vrot.lane.b32.xlu1 %v5813_v59, %s5278_s15 }
0x1292   :  { %2954 = vrot.lane.b32.xlu0 %v5813_v59, %s5276_s2 }
0x12f9   :  { %v2548_v34 = vpop.xlane.xlu1 %2547 }
0x12fd   :  { %v2551_v35 = vpop.xlane.xlu0 %2550  ;;  %v2509_v36 = vpop.xlane.xlu1 %2508 }
0x12fe   :  { %v2523_v37 = vsub.f32 %v2499_v15, %v2509_v36 }
0x1300   :  { %v2530_v39 = vmul.f32 1.442695, %v2523_v37 }
0x1301   :  { %v2506_v40 = vpop.xlane.xlu0 %2505  ;;  %v2518_v53 = vpop.xlane.xlu1 %2517 }
0x1302   :  { %5227 = vpow2.f32 %v2530_v39  ;;  %v2522_v17 = vsub.f32 %v2498_v22, %v2506_v40  ;;  %v2526_v55 = vsub.f32 %v2502_v24, %v2518_v53 }
0x1304   :  { %v2528_v41 = vmul.f32 1.442695, %v2522_v17  ;;  %v2536_v12 = vmul.f32 1.442695, %v2526_v55 }
0x1305   :  { %v2521_v38 = vpop.xlane.xlu0 %2520  ;;  %v3046_v4 = vpop.permute.xlu1 %3045 }
0x1306   :  { %5229 = vpow2.f32 %v2528_v41  ;;  %v2527_v50 = vsub.f32 %v2503_v28, %v2521_v38 }
0x1308   :  { %v2538_v54 = vmul.f32 1.442695, %v2527_v50 }
0x1309   :  { %v5854_v43 = vpop.permute.xlu0 %2954 }
0x130a   :  { %4940 = vmatprep.subr.msk.mxu1 %vm964_vm3, %v5854_v43  ;;  %5231 = vpow2.f32 %v2538_v54 }
0x130b   :  { %5233 = vpow2.f32 %v2536_v12 }
0x130c   :  { %5235 = vrcp.f32 %v2548_v34 }
0x130f   :  { %v5228_v44 = vpop.eup %5227 }
0x1310   :  { %v2543_v45 = vsel %vm1238_vm5, %v5228_v44, 0.0 }
0x1311   :  { %2544 = vadd.xlane.f32.xlu0 %v2543_v45 }
0x1313   :  { %v5230_v48 = vpop.eup %5229 }
0x1314   :  { %v2540_v49 = vsel %vm1238_vm5, %v5230_v48, 0.0 }
0x1315   :  { %2541 = vadd.xlane.f32.xlu1 %v2540_v49 }
0x1317   :  { %v5232_v57 = vpop.eup %5231 }
0x1318   :  { %v2555_v58 = vsel %vm1238_vm5, %v5232_v57, 0.0  ;;  %v5234_v1 = vpop.eup %5233 }
0x1319   :  { %v2552_v18 = vsel %vm1238_vm5, %v5234_v1, 0.0  ;;  %v5236_v8 = vpop.eup %5235 }
0x131a   :  { %v2566_v22 = vmul.f32 %v5236_v8, %v5830_v14 }
0x1326   :  { %3043 = vrot.lane.b32.xlu1 %v5817_v60, %s5278_s15 }
0x1327   :  { %2952 = vrot.lane.b32.xlu0 %v5817_v60, %s5276_s2 }
0x1346   :  { %2556 = vadd.xlane.f32.xlu0 %v2555_v58 }
0x134a   :  { %2553 = vadd.xlane.f32.xlu1 %v2552_v18 }
0x135b   :  { %2950 = vrot.lane.b32.xlu1 %v2856_v10, %s5277_s14 }
0x135c   :  { %2948 = vrot.lane.b32.xlu0 %v2855_v56, %s5277_s14 }
0x135f   :  { %3041 = vrot.lane.b32.xlu1 %v2856_v10, %s5279_s16 }
0x1360   :  { %3039 = vrot.lane.b32.xlu0 %v2855_v56, %s5279_s16 }
0x139a   :  { %v2545_v63 = vpop.xlane.xlu0 %2544 }
0x139b   :  { %5237 = vrcp.f32 %v2545_v63 }
0x139e   :  { %v2542_v2 = vpop.xlane.xlu1 %2541 }
0x139f   :  { %5239 = vrcp.f32 %v2542_v2 }
0x13a0   :  { %5241 = vrcp.f32 %v2551_v35 }
0x13a8   :  { %v5238_v9 = vpop.eup %5237 }
0x13a9   :  { %v2565_v16 = vmul.f32 %v5238_v9, %v5228_v44 }
0x13ac   :  { %v5240_v13 = vpop.eup %5239 }
0x13ad   :  { %v2564_v15 = vmul.f32 %v5240_v13, %v5230_v48  ;;  %v5242_v19 = vpop.eup %5241 }
0x13ae   :  { %v2567_v24 = vmul.f32 %v5242_v19, %v5835_v20 }
0x13af   :  { %4916 = vmatprep.mubr.msk.f32.mxu0 %vm1238_vm5, %v2564_v15 }
0x13b0   :  { %4917 = vmatmul.mubr.msk.f32.vlgmr.msra.gmra.mxu0 %vm1238_vm5, %v2565_v16 }
0x13b1   :  { %4920 = vmatpush3.msra.mxu0 %v5785_v46  ;;  %4923 = vmatprep.mubr.msk.f32.mxu0 %vm1238_vm5, %v2566_v22  ;;  %v3044_v46 = vpop.permute.xlu1 %3043 }
0x13b2   :  { %4921 = vmatprep.subr.mxu0 %v5792_v47 }
0x13b3   :  { %4922 = vmatpush3.msra.mxu0 %v5792_v47  ;;  %v2953_v47 = vpop.permute.xlu0 %2952 }
0x13b4   :  { %4933 = vmatprep.subr.msk.mxu0 %vm964_vm3, %v5850_v32  ;;  %4924 = vmatmul.mubr.msk.f32.vlgmr.msra.gmra.mxu0 %vm1238_vm5, %v2567_v24 }
0x13b5   :  { %4934 = vmatpush3.xpose.msk.msra.mxu0 %vm964_vm3, %v5850_v32  ;;  %4937 = vmatprep.mubr.msk.f32.mxu0 %vm964_vm3, %v2855_v56 }
0x13b6   :  { %4935 = vmatprep.subr.msk.mxu0 %vm964_vm3, %v5852_v33 }
0x13b9   :  { %4936 = vmatpush3.xpose.msk.msra.mxu0 %vm964_vm3, %v5852_v33 }
0x13ba   :  { %4947 = vmatprep.subr.msk.mxu0 %vm964_vm3, %v3046_v4 }
0x13bc   :  { %4938 = vmatmul.mubr.msk.f32.vlgmr.msra.gmra.mxu0 %vm964_vm3, %v2856_v10 }
0x13bd   :  { %4948 = vmatpush3.xpose.msk.msra.mxu0 %vm964_vm3, %v3046_v4 }
0x13be   :  { %4949 = vmatprep.subr.msk.mxu0 %vm964_vm3, %v3044_v46 }
0x13c1   :  { %4950 = vmatpush3.xpose.msk.msra.mxu0 %vm964_vm3, %v3044_v46 }
0x13cf   :  { %v2557_v14 = vpop.xlane.xlu0 %2556 }
0x13d0   :  { %5243 = vrcp.f32 %v2557_v14 }
0x13d3   :  { %v2949_v20 = vpop.permute.xlu0 %2948  ;;  %v2554_v26 = vpop.xlane.xlu1 %2553 }
0x13d4   :  { %5245 = vrcp.f32 %v2554_v26 }
0x13d7   :  { %v3040_v27 = vpop.permute.xlu0 %3039  ;;  %v2951_v28 = vpop.permute.xlu1 %2950 }
0x13d8   :  { %4951 = vmatprep.mubr.msk.f32.mxu0 %vm964_vm3, %v3040_v27 }
0x13db   :  { %v3042_v29 = vpop.permute.xlu1 %3041 }
0x13dc   :  { %4952 = vmatmul.mubr.msk.f32.vlgmr.msra.gmra.mxu0 %vm964_vm3, %v3042_v29 }
0x13dd   :  { %v5244_v30 = vpop.eup %5243 }
0x13de   :  { %v2569_v33 = vmul.f32 %v5244_v30, %v5232_v57 }
0x13e1   :  { %v5246_v31 = vpop.eup %5245 }
0x13e2   :  { %v2568_v32 = vmul.f32 %v5246_v31, %v5234_v1 }
0x13e4   :  { %4930 = vmatprep.mubr.msk.f32.mxu1 %vm1238_vm5, %v2568_v32 }
0x13e5   :  { %4931 = vmatmul.mubr.msk.f32.vlgmr.msra.gmra.mxu1 %vm1238_vm5, %v2569_v33 }
0x13e6   :  { %4941 = vmatpush3.xpose.msk.msra.mxu1 %vm964_vm3, %v5854_v43  ;;  %4944 = vmatprep.mubr.msk.f32.mxu1 %vm964_vm3, %v2949_v20 }
0x13e7   :  { %4942 = vmatprep.subr.msk.mxu1 %vm964_vm3, %v2953_v47 }
0x13ea   :  { %4943 = vmatpush3.xpose.msk.msra.mxu1 %vm964_vm3, %v2953_v47 }
0x13ed   :  { %4945 = vmatmul.mubr.msk.f32.vlgmr.msra.gmra.mxu1 %vm964_vm3, %v2951_v28 }
0x1470   :  { %v5905_v34 = vpop.f32.mrf.mxu0 }
0x1472   :  { %v5907_v35 = vpop.f32.mrf.mxu0 }
0x1474   :  { %v5909_v36 = vpop.f32.mrf.mxu0 }
0x1476   :  { %v5911_v37 = vpop.f32.mrf.mxu0 }
0x147c   :  { %v4939_v39 = vpop.f32.mrf.mxu0 }
0x147d   :  { %v3131_v40 = vadd.f32 %v4939_v39, %v5576_v42 }
0x147e   :  { %v2939_v17 = vpop.f32.mrf.mxu0 }
0x147f   :  { %v3130_v41 = vadd.f32 %v2939_v17, %v5576_v42  ;;  %v3139_v38 = vsel %vm1238_vm5, %v3131_v40, -inf }
0x1480   :  { %3140 = vmax.xlane.f32.xlu1 %v3139_v38 }
0x1481   :  { %v3136_v43 = vsel %vm1238_vm5, %v3130_v41, -inf }
0x1482   :  { %3137 = vmax.xlane.f32.xlu0 %v3136_v43 }
0x149c   :  { %v4953_v44 = vpop.f32.mrf.mxu0 }
0x149d   :  { %v3135_v1 = vadd.f32 %v4953_v44, %v5576_v42 }
0x149e   :  { %v3121_v45 = vpop.f32.mrf.mxu0 }
0x149f   :  { %v3134_v48 = vadd.f32 %v3121_v45, %v5576_v42  ;;  %v3151_v10 = vsel %vm1238_vm5, %v3135_v1, -inf }
0x14a1   :  { %v3148_v49 = vsel %vm1238_vm5, %v3134_v48, -inf }
0x14a2   :  { %3149 = vmax.xlane.f32.xlu1 %v3148_v49  ;;  %v3486_v49 = vld [vmem:[%s6222_s3 + $0x8] sm:$0xf] }
0x14a5   :  { %v5919_v50 = vpop.f32.mrf.mxu1 }
0x14a7   :  { %v5921_v53 = vpop.f32.mrf.mxu1 }
0x14ad   :  { %v4946_v55 = vpop.f32.mrf.mxu1 }
0x14ae   :  { %v3133_v54 = vadd.f32 %v4946_v55, %v5576_v42 }
0x14af   :  { %v3030_v12 = vpop.f32.mrf.mxu1 }
0x14b0   :  { %v3132_v57 = vadd.f32 %v3030_v12, %v5576_v42  ;;  %v3145_v58 = vsel %vm1238_vm5, %v3133_v54, -inf }
0x14b1   :  { %3146 = vmax.xlane.f32.xlu0 %v3145_v58 }
0x14b2   :  { %v3142_v18 = vsel %vm1238_vm5, %v3132_v57, -inf }
0x14b3   :  { %3204 = vrot.lane.b32.xlu1 %v5813_v59, %s5272_s17 }
0x14b5   :  { %3143 = vmax.xlane.f32.xlu0 %v3142_v18 }
0x14b7   :  { %3291 = vrot.lane.b32.xlu1 %v5813_v59, %s5281_s20 }
0x14b9   :  { %3152 = vmax.xlane.f32.xlu0 %v3151_v10 }
0x14bb   :  { %3378 = vrot.lane.b32.xlu1 %v5813_v59, %s5282_s21 }
0x14cf   :  { %3202 = vrot.lane.b32.xlu0 %v5817_v60, %s5272_s17  ;;  %s5283_s17 = smov 4  }
0x1509   :  { %v3141_v56 = vpop.xlane.xlu1 %3140 }
0x150a   :  { %v3155_v4 = vsub.f32 %v3131_v40, %v3141_v56 }
0x150b   :  { %v3138_v63 = vpop.xlane.xlu0 %3137 }
0x150c   :  { %v3162_v2 = vmul.f32 1.442695, %v3155_v4  ;;  %v3154_v42 = vsub.f32 %v3130_v41, %v3138_v63  ;;  %v3485_v63 = vld [vmem:[%s6222_s3] sm:$0xff] }
0x150e   :  { %5247 = vpow2.f32 %v3162_v2  ;;  %v3160_v8 = vmul.f32 1.442695, %v3154_v42 }
0x1510   :  { %5249 = vpow2.f32 %v3160_v8 }
0x151b   :  { %v5937_v9 = vpop.eup %5247 }
0x151c   :  { %v3175_v13 = vsel %vm1238_vm5, %v5937_v9, 0.0 }
0x151d   :  { %v5941_v15 = vpop.eup %5249  ;;  %3176 = vadd.xlane.f32.xlu0 %v3175_v13 }
0x151e   :  { %v3172_v59 = vsel %vm1238_vm5, %v5941_v15, 0.0 }
0x151f   :  { %3173 = vadd.xlane.f32.xlu1 %v3172_v59 }
0x152b   :  { %v3150_v16 = vpop.xlane.xlu1 %3149 }
0x152c   :  { %v3158_v14 = vsub.f32 %v3134_v48, %v3150_v16 }
0x152e   :  { %v3168_v28 = vmul.f32 1.442695, %v3158_v14 }
0x152f   :  { %v3205_v19 = vpop.permute.xlu1 %3204 }
0x1530   :  { %4954 = vmatprep.subr.mxu1 %v3205_v19 }
0x1531   :  { %4955 = vmatpush3.msra.mxu1 %v3205_v19 }
0x1533   :  { %v3292_v22 = vpop.permute.xlu1 %3291 }
0x1537   :  { %v3379_v24 = vpop.permute.xlu1 %3378 }
0x1538   :  { %4968 = vmatprep.subr.mxu0 %v3379_v24 }
0x1539   :  { %4969 = vmatpush3.msra.mxu0 %v3379_v24 }
0x153a   :  { %v3147_v46 = vpop.xlane.xlu0 %3146 }
0x153b   :  { %v3157_v47 = vsub.f32 %v3133_v54, %v3147_v46 }
0x153d   :  { %v3166_v20 = vmul.f32 1.442695, %v3157_v47 }
0x153e   :  { %v3144_v26 = vpop.xlane.xlu0 %3143 }
0x153f   :  { %5251 = vpow2.f32 %v3166_v20  ;;  %v3156_v27 = vsub.f32 %v3132_v57, %v3144_v26 }
0x1541   :  { %v3164_v29 = vmul.f32 1.442695, %v3156_v27 }
0x1542   :  { %v3153_v30 = vpop.xlane.xlu0 %3152 }
0x1543   :  { %5253 = vpow2.f32 %v3164_v29  ;;  %v3159_v31 = vsub.f32 %v3135_v1, %v3153_v30 }
0x1544   :  { %5255 = vpow2.f32 %v3168_v28 }
0x1545   :  { %v3170_v32 = vmul.f32 1.442695, %v3159_v31 }
0x1546   :  { %v3203_v33 = vpop.permute.xlu0 %3202 }
0x1547   :  { %5257 = vpow2.f32 %v3170_v32  ;;  %4956 = vmatprep.subr.mxu1 %v3203_v33  ;;  %v3487_v32 = vld [vmem:[%s6222_s3 + $0x10] sm:$0xff] }
0x1548   :  { %4957 = vmatpush3.msra.mxu1 %v3203_v33 }
0x1549   :  { %4961 = vmatprep.subr.mxu1 %v3292_v22 }
0x154c   :  { %v5945_v39 = vpop.eup %5251 }
0x154d   :  { %v3181_v40 = vsel %vm1238_vm5, %v5945_v39, 0.0 }
0x154e   :  { %3182 = vadd.xlane.f32.xlu0 %v3181_v40 }
0x1550   :  { %v5254_v17 = vpop.eup %5253 }
0x1551   :  { %v3178_v41 = vsel %vm1238_vm5, %v5254_v17, 0.0  ;;  %v5950_v38 = vpop.eup %5255 }
0x1552   :  { %3179 = vadd.xlane.f32.xlu1 %v3178_v41  ;;  %v3184_v45 = vsel %vm1238_vm5, %v5950_v38, 0.0 }
0x1554   :  { %v5952_v43 = vpop.eup %5257 }
0x1555   :  { %v3187_v44 = vsel %vm1238_vm5, %v5952_v43, 0.0 }
0x1556   :  { %3188 = vadd.xlane.f32.xlu0 %v3187_v44  ;;  %3185 = vadd.xlane.f32.xlu1 %v3184_v45  ;;  %v4505_v44 = vld [vmem:[%s6223_s4] ss:$0 sm:$0xff] }
0x1567   :  { %3376 = vrot.lane.b32.xlu1 %v5817_v60, %s5282_s21 }
0x156b   :  { %1570 = vrot.lane.b32.xlu1 %v5684_v5, %s5283_s17 }
0x156c   :  { %3289 = vrot.lane.b32.xlu0 %v5817_v60, %s5281_s20 }
0x156f   :  { %1578 = vrot.lane.b32.xlu1 %v5697_v23, %s5284_s19 }
0x1570   :  { %1568 = vrot.lane.b32.xlu0 %v5686_v6, %s5283_s17 }
0x1573   :  { %2203 = vrot.lane.b32.xlu1 %v5825_v11, %s5283_s17 }
0x1574   :  { %1576 = vrot.lane.b32.xlu0 %v5700_v25, %s5284_s19 }
0x1577   :  { %2211 = vrot.lane.b32.xlu1 %v5803_v51, %s5284_s19 }
0x1578   :  { %2201 = vrot.lane.b32.xlu0 %v5827_v0, %s5283_s17 }
0x157b   :  { %2835 = vrot.lane.b32.xlu1 %v5909_v36, %s5283_s17 }
0x157c   :  { %2209 = vrot.lane.b32.xlu0 %v5805_v52, %s5284_s19 }
0x157f   :  { %2843 = vrot.lane.b32.xlu1 %v5919_v50, %s5284_s19 }
0x1580   :  { %2833 = vrot.lane.b32.xlu0 %v5911_v37, %s5283_s17 }
0x1584   :  { %2841 = vrot.lane.b32.xlu0 %v5921_v53, %s5284_s19 }
0x15a6   :  { %v3177_v5 = vpop.xlane.xlu0 %3176 }
0x15a7   :  { %5259 = vrcp.f32 %v3177_v5 }
0x15a8   :  { %v3174_v6 = vpop.xlane.xlu1 %3173 }
0x15a9   :  { %5261 = vrcp.f32 %v3174_v6 }
0x15b4   :  { %v5260_v23 = vpop.eup %5259 }
0x15b5   :  { %v3197_v60 = vmul.f32 %v5260_v23, %v5937_v9 }
0x15b6   :  { %v5262_v25 = vpop.eup %5261 }
0x15b7   :  { %v3196_v51 = vmul.f32 %v5262_v25, %v5941_v15 }
0x15b9   :  { %4958 = vmatprep.mubr.msk.f32.mxu1 %vm1238_vm5, %v3196_v51 }
0x15ba   :  { %4959 = vmatmul.mubr.msk.f32.vlgmr.msra.gmra.mxu1 %vm1238_vm5, %v3197_v60 }
0x15bb   :  { %4962 = vmatpush3.msra.mxu1 %v3292_v22 }
0x15d7   :  { %v3183_v52 = vpop.xlane.xlu0 %3182 }
0x15d8   :  { %5263 = vrcp.f32 %v3183_v52 }
0x15db   :  { %v3180_v11 = vpop.xlane.xlu1 %3179 }
0x15dc   :  { %5265 = vrcp.f32 %v3180_v11 }
0x15df   :  { %v3189_v0 = vpop.xlane.xlu0 %3188  ;;  %v3186_v36 = vpop.xlane.xlu1 %3185 }
0x15e0   :  { %5267 = vrcp.f32 %v3189_v0 }
0x15e1   :  { %5269 = vrcp.f32 %v3186_v36 }
0x15e3   :  { %v3290_v37 = vpop.permute.xlu0 %3289  ;;  %v3377_v48 = vpop.permute.xlu1 %3376 }
0x15e4   :  { %4963 = vmatprep.subr.mxu1 %v3290_v37  ;;  %4970 = vmatprep.subr.mxu0 %v3377_v48 }
0x15e5   :  { %4964 = vmatpush3.msra.mxu1 %v3290_v37  ;;  %4971 = vmatpush3.msra.mxu0 %v3377_v48  ;;  %v5264_v55 = vpop.eup %5263 }
0x15e6   :  { %4975 = vmatprep.subr.msk.mxu1 %vm72_vm0, %v3486_v49  ;;  %v3199_v10 = vmul.f32 %v5264_v55, %v5945_v39 }
0x15e7   :  { %v1569_v50 = vpop.permute.xlu0 %1568  ;;  %v1571_v53 = vpop.permute.xlu1 %1570 }
0x15e8   :  { %v1582_v57 = vsel %vm964_vm3, %v5694_v21, %v1569_v50  ;;  %v1583_v58 = vsel %vm964_vm3, %v5692_v7, %v1571_v53 }
0x15e9   :  { %v5266_v54 = vpop.eup %5265 }
0x15ea   :  { %v3198_v12 = vmul.f32 %v5266_v54, %v5254_v17 }
0x15eb   :  { %v1577_v1 = vpop.permute.xlu0 %1576  ;;  %v1579_v18 = vpop.permute.xlu1 %1578 }
0x15ec   :  { %v1585_v56 = vsel %vm1584_vm6, %v1582_v57, %v1577_v1  ;;  %v1586_v4 = vsel %vm1584_vm6, %v1583_v58, %v1579_v18  ;;  %4965 = vmatprep.mubr.msk.f32.mxu1 %vm1238_vm5, %v3198_v12 }
0x15ed   :  { %v5268_v2 = vpop.eup %5267  ;;  %1587 = vst.msk [vmem:[#allocation3] sm:$0xff] %vm47_vm1, %v1585_v56  ;;  %1588 = vst.msk [vmem:[#allocation3 + $0x8] sm:$0xff] %vm47_vm1, %v1586_v4  ;;  %4966 = vmatmul.mubr.msk.f32.vlgmr.msra.gmra.mxu1 %vm1238_vm5, %v3199_v10  ;;  %v3779_v4 = vld [vmem:[%s6224_s5] sm:$0xff] }
0x15ee   :  { %v5270_v7 = vpop.eup %5269  ;;  %v3201_v21 = vmul.f32 %v5268_v2, %v5952_v43  ;;  %4976 = vmatpush3.msk.msra.mxu1 %vm72_vm0, %v3486_v49 }
0x15ef   :  { %v2202_v42 = vpop.permute.xlu0 %2201  ;;  %v2204_v8 = vpop.permute.xlu1 %2203  ;;  %v3200_v9 = vmul.f32 %v5270_v7, %v5950_v38  ;;  %4977 = vmatprep.subr.mxu1 %v3485_v63 }
0x15f0   :  { %4978 = vmatpush3.msra.mxu1 %v3485_v63  ;;  %v2215_v13 = vsel %vm964_vm3, %v5823_v62, %v2202_v42  ;;  %v2216_v15 = vsel %vm964_vm3, %v5821_v61, %v2204_v8 }
0x15f1   :  { %4972 = vmatprep.mubr.msk.f32.mxu0 %vm1238_vm5, %v3200_v9 }
0x15f2   :  { %4973 = vmatmul.mubr.msk.f32.vlgmr.msra.gmra.mxu0 %vm1238_vm5, %v3201_v21 }
0x15f3   :  { %v2210_v59 = vpop.permute.xlu0 %2209  ;;  %v2212_v16 = vpop.permute.xlu1 %2211 }
0x15f4   :  { %v2217_v19 = vsel %vm1584_vm6, %v2215_v13, %v2210_v59  ;;  %v2218_v22 = vsel %vm1584_vm6, %v2216_v15, %v2212_v16  ;;  %v3503_v24 = vld [vmem:[#allocation3] sm:$0xff]  ;;  %v3504_v46 = vld [vmem:[#allocation3 + $0x8] sm:$0xff]  ;;  %v3781_v59 = vld [vmem:[%s6224_s5 + $0x10] sm:$0xff] }
0x15f5   :  { %2219 = vst.msk [vmem:[#allocation3 + $0x10] sm:$0xff] %vm47_vm1, %v2217_v19  ;;  %2220 = vst.msk [vmem:[#allocation3 + $0x18] sm:$0xff] %vm47_vm1, %v2218_v22  ;;  %4979 = vmatprep.mubr.msk.f32.mxu1 %vm47_vm1, %v3503_v24  ;;  %v3780_v15 = vld [vmem:[%s6224_s5 + $0x8] sm:$0xff]  ;;  %v3782_v16 = vld [vmem:[%s6224_s5 + $0x18] sm:$0xff] }
0x15f6   :  { %4980 = vmatmul.mubr.msk.f32.vlgmr.msra.gmra.mxu1 %vm47_vm1, %v3504_v46  ;;  %v3783_v19 = vld [vmem:[%s6224_s5 + $0x20] sm:$0xff]  ;;  %v3784_v22 = vld [vmem:[%s6224_s5 + $0x28] sm:$0xff]  ;;  %v3785_v24 = vld [vmem:[%s6224_s5 + $0x30] sm:$0xff] }
0x15f7   :  { %v2834_v62 = vpop.permute.xlu0 %2833  ;;  %v2836_v47 = vpop.permute.xlu1 %2835  ;;  %v3786_v46 = vld [vmem:[%s6224_s5 + $0x38] sm:$0xff] }
0x15f8   :  { %v2847_v61 = vsel %vm964_vm3, %v5907_v35, %v2834_v62  ;;  %v2848_v14 = vsel %vm964_vm3, %v5905_v34, %v2836_v47  ;;  %v3488_v34 = vld [vmem:[%s6222_s3 + $0x18] sm:$0xf] }
0x15f9   :  { %4991 = vmatprep.subr.msk.mxu0 %vm72_vm0, %v3488_v34 }
0x15fa   :  { %4992 = vmatpush3.msk.msra.mxu0 %vm72_vm0, %v3488_v34 }
0x15fb   :  { %v2842_v20 = vpop.permute.xlu0 %2841  ;;  %v2844_v26 = vpop.permute.xlu1 %2843  ;;  %4993 = vmatprep.subr.mxu0 %v3487_v32 }
0x15fc   :  { %v2849_v27 = vsel %vm1584_vm6, %v2847_v61, %v2842_v20  ;;  %v2850_v28 = vsel %vm1584_vm6, %v2848_v14, %v2844_v26  ;;  %v3505_v29 = vld [vmem:[#allocation3 + $0x10] sm:$0xff]  ;;  %v3506_v30 = vld [vmem:[#allocation3 + $0x18] sm:$0xff]  ;;  %4994 = vmatpush3.msra.mxu0 %v3487_v32  ;;  %v6119_v61 = vld [vmem:[%s6223_s4 + $0x1] ss:$0 sm:$0xff] }
0x15fd   :  { %2851 = vst.msk [vmem:[#allocation3 + $0x20] sm:$0xff] %vm47_vm1, %v2849_v27  ;;  %2852 = vst.msk [vmem:[#allocation3 + $0x28] sm:$0xff] %vm47_vm1, %v2850_v28  ;;  %4982 = vmatprep.mubr.msk.f32.mxu1 %vm47_vm1, %v3505_v29  ;;  %5035 = vmatprep.subr.mxu0 %v5271_v3 }
0x15fe   :  { %4983 = vmatmul.mubr.msk.f32.gmra.mxu1 %vm47_vm1, %v3506_v30 }
0x1604   :  { %v3507_v35 = vld [vmem:[#allocation3 + $0x20] sm:$0xff]  ;;  %v3508_v31 = vld [vmem:[#allocation3 + $0x28] sm:$0xff] }
0x1605   :  { %4985 = vmatprep.mubr.msk.f32.mxu1 %vm47_vm1, %v3507_v35 }
0x1606   :  { %4986 = vmatmul.mubr.msk.f32.gmra.mxu1 %vm47_vm1, %v3508_v31 }
0x167a   :  { %v4960_v33 = vpop.f32.mrf.mxu1 }
0x167c   :  { %v3280_v39 = vpop.f32.mrf.mxu1 }
0x16ad   :  { %v4967_v40 = vpop.f32.mrf.mxu1 }
0x16ae   :  { %3467 = vrot.lane.b32.xlu1 %v4967_v40, %s5283_s17 }
0x16af   :  { %v3367_v17 = vpop.f32.mrf.mxu1 }
0x16b0   :  { %3465 = vrot.lane.b32.xlu0 %v3367_v17, %s5283_s17 }
0x16b2   :  { %v4974_v41 = vpop.f32.mrf.mxu0 }
0x16b3   :  { %3475 = vrot.lane.b32.xlu1 %v4974_v41, %s5284_s19 }
0x16b4   :  { %v3454_v38 = vpop.f32.mrf.mxu0 }
0x16b5   :  { %3473 = vrot.lane.b32.xlu0 %v3454_v38, %s5284_s19 }
0x16b6   :  { %v4981_v43 = vpop.f32.mrf.mxu1 }
0x16b7   :  { %v3614_v6 = vadd.f32 %v4981_v43, %v4505_v44 }
0x16b8   :  { %v3608_v45 = vpop.f32.mrf.mxu1 }
0x16b9   :  { %v3609_v5 = vadd.f32 %v4505_v44, %v3608_v45 }
0x16bb   :  { %4995 = vmatprep.mubr.msk.f32.mxu0 %vm47_vm1, %v3609_v5 }
0x16bc   :  { %4996 = vmatmul.mubr.msk.f32.vlgmr.msra.gmra.mxu0 %vm47_vm1, %v3614_v6 }
0x16be   :  { %v4984_v23 = vpop.f32.mrf.mxu1 }
0x16bf   :  { %v3624_v60 = vadd.f32 %v4984_v23, %v4505_v44 }
0x16c0   :  { %v3618_v25 = vpop.f32.mrf.mxu1 }
0x16c1   :  { %v3619_v51 = vadd.f32 %v4505_v44, %v3618_v25 }
0x16c3   :  { %4998 = vmatprep.mubr.msk.f32.mxu0 %vm47_vm1, %v3619_v51 }
0x16c4   :  { %4999 = vmatmul.mubr.msk.f32.gmra.mxu0 %vm47_vm1, %v3624_v60 }
0x16c6   :  { %v4987_v52 = vpop.f32.mrf.mxu1 }
0x16c7   :  { %v3634_v36 = vadd.f32 %v4987_v52, %v4505_v44 }
0x16c8   :  { %v3628_v11 = vpop.f32.mrf.mxu1 }
0x16c9   :  { %v3629_v0 = vadd.f32 %v4505_v44, %v3628_v11 }
0x16cb   :  { %5001 = vmatprep.mubr.msk.f32.mxu0 %vm47_vm1, %v3629_v0 }
0x16cc   :  { %5002 = vmatmul.mubr.msk.f32.gmra.mxu0 %vm47_vm1, %v3634_v36 }
0x1720   :  { %v3468_v37 = vpop.permute.xlu1 %3467 }
0x1721   :  { %v3480_v49 = vsel %vm964_vm3, %v4960_v33, %v3468_v37 }
0x1722   :  { %v3466_v48 = vpop.permute.xlu0 %3465 }
0x1723   :  { %v3479_v55 = vsel %vm964_vm3, %v3280_v39, %v3466_v48 }
0x1725   :  { %v3476_v50 = vpop.permute.xlu1 %3475 }
0x1726   :  { %v3482_v53 = vsel %vm1584_vm6, %v3480_v49, %v3476_v50 }
0x1727   :  { %3484 = vst.msk [vmem:[#allocation3 + $0x38] sm:$0xff] %vm47_vm1, %v3482_v53  ;;  %v3474_v54 = vpop.permute.xlu0 %3473 }
0x1728   :  { %v3481_v12 = vsel %vm1584_vm6, %v3479_v55, %v3474_v54 }
0x1729   :  { %3483 = vst.msk [vmem:[#allocation3 + $0x30] sm:$0xff] %vm47_vm1, %v3481_v12 }
0x172e   :  { %v3510_v58 = vld [vmem:[#allocation3 + $0x38] sm:$0xff] }
0x1730   :  { %v3509_v57 = vld [vmem:[#allocation3 + $0x30] sm:$0xff] }
0x1731   :  { %4988 = vmatprep.mubr.msk.f32.mxu1 %vm47_vm1, %v3509_v57 }
0x1732   :  { %4989 = vmatmul.mubr.msk.f32.gmra.mxu1 %vm47_vm1, %v3510_v58 }
0x1733   :  { %5023 = vmatprep.mubr.msk.f32.mxu1 %vm3791_vm7, %v3779_v4 }
0x177c   :  { %v4997_v63 = vpop.f32.mrf.mxu0 }
0x177e   :  { %v3740_v2 = vpop.f32.mrf.mxu0 }
0x1784   :  { %v5000_v7 = vpop.f32.mrf.mxu0 }
0x1786   :  { %v3750_v21 = vpop.f32.mrf.mxu0 }
0x178c   :  { %v5003_v42 = vpop.f32.mrf.mxu0 }
0x178e   :  { %v3760_v8 = vpop.f32.mrf.mxu0 }
0x17f2   :  { %v4990_v1 = vpop.f32.mrf.mxu1 }
0x17f3   :  { %v3644_v18 = vadd.f32 %v4990_v1, %v4505_v44 }
0x17f4   :  { %v3638_v10 = vpop.f32.mrf.mxu1 }
0x17f5   :  { %v3639_v56 = vadd.f32 %v4505_v44, %v3638_v10  ;;  %5036 = vmatpush3.msra.mxu0 %v3644_v18  ;;  %v4535_v10 = vld [vmem:[%s6223_s4 + $0x2] ss:$0 sm:$0xff] }
0x17f6   :  { %5037 = vmatprep.subr.mxu0 %v5271_v3 }
0x17f7   :  { %5004 = vmatprep.mubr.msk.f32.mxu0 %vm47_vm1, %v3639_v56  ;;  %5038 = vmatpush3.msra.mxu0 %v3639_v56 }
0x17f8   :  { %5005 = vmatmul.mubr.msk.f32.gmra.mxu0 %vm47_vm1, %v3644_v18  ;;  %5039 = vmatprep.subr.mxu0 %v5271_v3 }
0x17f9   :  { %5040 = vmatpush3.msra.mxu0 %v3634_v36  ;;  %5051 = vmatprep.mubr.msk.f32.mxu0 %vm5285_vm8, %v5271_v3  ;;  %v3501_v36 = vld [vmem:[%s6225_s6] sm:$0xff] }
0x17fa   :  { %5041 = vmatprep.subr.mxu0 %v5271_v3  ;;  %v4058_v37 = vrot.slane %v3501_v36, 4 }
0x17fb   :  { %5042 = vmatpush3.msra.mxu0 %v3629_v0 }
0x17fc   :  { %5043 = vmatprep.subr.mxu0 %v5271_v3 }
0x17fd   :  { %5044 = vmatpush3.msra.mxu0 %v3624_v60 }
0x17fe   :  { %5045 = vmatprep.subr.mxu0 %v5271_v3 }
0x17ff   :  { %5046 = vmatpush3.msra.mxu0 %v3619_v51 }
0x1800   :  { %5047 = vmatprep.subr.mxu0 %v5271_v3 }
0x1801   :  { %5048 = vmatpush3.msra.mxu0 %v3614_v6 }
0x1802   :  { %5049 = vmatprep.subr.mxu0 %v5271_v3 }
0x1803   :  { %5050 = vmatpush3.msra.mxu0 %v3609_v5 }
0x1804   :  { %5073 = vmatprep.subr.mxu0 %v5271_v3  ;;  %5052 = vmatmul.mubr.msk.f32.vlgmr.msra.gmra.mxu0 %vm3791_vm7, %v3501_v36 }
0x1805   :  { %5089 = vmatprep.mubr.msk.f32.mxu0 %vm5285_vm8, %v5271_v3 }
0x18b8   :  { %v5006_v9 = vpop.f32.mrf.mxu0 }
0x18b9   :  { %5007 = vmatprep.subr.mxu1 %v5006_v9 }
0x18ba   :  { %v3770_v13 = vpop.f32.mrf.mxu0  ;;  %5008 = vmatpush3.msra.mxu1 %v5006_v9 }
0x18bb   :  { %5009 = vmatprep.subr.mxu1 %v3770_v13 }
0x18bc   :  { %5010 = vmatpush3.msra.mxu1 %v3770_v13 }
0x18bd   :  { %5011 = vmatprep.subr.mxu1 %v5003_v42 }
0x18be   :  { %5012 = vmatpush3.msra.mxu1 %v5003_v42 }
0x18bf   :  { %5013 = vmatprep.subr.mxu1 %v3760_v8 }
0x18c0   :  { %5014 = vmatpush3.msra.mxu1 %v3760_v8 }
0x18c1   :  { %5015 = vmatprep.subr.mxu1 %v5000_v7 }
0x18c2   :  { %5016 = vmatpush3.msra.mxu1 %v5000_v7 }
0x18c3   :  { %5017 = vmatprep.subr.mxu1 %v3750_v21 }
0x18c4   :  { %5018 = vmatpush3.msra.mxu1 %v3750_v21 }
0x18c5   :  { %5019 = vmatprep.subr.mxu1 %v4997_v63 }
0x18c6   :  { %5020 = vmatpush3.msra.mxu1 %v4997_v63 }
0x18c7   :  { %5021 = vmatprep.subr.mxu1 %v3740_v2 }
0x18c8   :  { %5022 = vmatpush3.msra.mxu1 %v3740_v2 }
0x18c9   :  { %5024 = vmatmul.mubr.msk.f32.vlgmr.msra.gmra.mxu1 %vm3791_vm7, %v3780_v15  ;;  %5054 = vmatprep.subr.mxu1 %v5271_v3 }
0x18ca   :  { %5055 = vmatpush3.msra.mxu1 %v5006_v9  ;;  %5026 = vmatprep.mubr.msk.f32.mxu1 %vm3791_vm7, %v3781_v59 }
0x18cb   :  { %5056 = vmatprep.subr.mxu1 %v5271_v3 }
0x18cc   :  { %5057 = vmatpush3.msra.mxu1 %v3770_v13 }
0x18cd   :  { %5027 = vmatmul.mubr.msk.f32.gmra.mxu1 %vm3791_vm7, %v3782_v16  ;;  %5058 = vmatprep.subr.mxu1 %v5271_v3 }
0x18ce   :  { %5059 = vmatpush3.msra.mxu1 %v5003_v42  ;;  %5029 = vmatprep.mubr.msk.f32.mxu1 %vm3791_vm7, %v3783_v19 }
0x18cf   :  { %5060 = vmatprep.subr.mxu1 %v5271_v3 }
0x18d0   :  { %5061 = vmatpush3.msra.mxu1 %v3760_v8 }
0x18d1   :  { %5030 = vmatmul.mubr.msk.f32.gmra.mxu1 %vm3791_vm7, %v3784_v22  ;;  %5062 = vmatprep.subr.mxu1 %v5271_v3 }
0x18d2   :  { %5063 = vmatpush3.msra.mxu1 %v5000_v7  ;;  %5032 = vmatprep.mubr.msk.f32.mxu1 %vm3791_vm7, %v3785_v24 }
0x18d3   :  { %5064 = vmatprep.subr.mxu1 %v5271_v3 }
0x18d4   :  { %5065 = vmatpush3.msra.mxu1 %v3750_v21 }
0x18d5   :  { %5066 = vmatprep.subr.mxu1 %v5271_v3  ;;  %5033 = vmatmul.mubr.msk.f32.gmra.mxu1 %vm3791_vm7, %v3786_v46 }
0x18d6   :  { %5067 = vmatpush3.msra.mxu1 %v4997_v63  ;;  %5070 = vmatprep.mubr.msk.f32.mxu1 %vm5285_vm8, %v5271_v3 }
0x18d7   :  { %5068 = vmatprep.subr.mxu1 %v5271_v3 }
0x18d8   :  { %5069 = vmatpush3.msra.mxu1 %v3740_v2 }
0x18d9   :  { %5092 = vmatprep.subr.mxu1 %v5271_v3  ;;  %5071 = vmatmul.mubr.msk.f32.vlgmr.msra.gmra.mxu1 %vm3791_vm7, %v4058_v37  ;;  %v3495_v37 = vld [vmem:[%s6222_s3 + $0x58] sm:$0xf] }
0x18da   :  { %5102 = vmatprep.mubr.msk.f32.mxu1 %vm5285_vm8, %v5271_v3 }
0x1989   :  { %v5025_v62 = vpop.f32.mrf.mxu1 }
0x198a   :  { %v3888_v5 = vadd.f32 %v5025_v62, %v6119_v61 }
0x198b   :  { %v3882_v47 = vpop.f32.mrf.mxu1 }
0x198c   :  { %v3883_v25 = vadd.f32 %v6119_v61, %v3882_v47  ;;  %v3948_v60 = vsel %vm47_vm1, %v3888_v5, 0.0  ;;  %v3924_v0 = vsel %vm47_vm1, %v3888_v5, -inf  ;;  %v3490_v5 = vld [vmem:[%s6222_s3 + $0x28] sm:$0xff] }
0x198d   :  { %v5028_v14 = vpop.f32.mrf.mxu1 }
0x198e   :  { %v3898_v20 = vadd.f32 %v5028_v14, %v6119_v61  ;;  %v3945_v11 = vsel %vm47_vm1, %v3883_v25, 0.0  ;;  %v3921_v48 = vsel %vm47_vm1, %v3883_v25, -inf }
0x198f   :  { %v3892_v26 = vpop.f32.mrf.mxu1 }
0x1990   :  { %v3954_v27 = vsel %vm47_vm1, %v3898_v20, 0.0  ;;  %v3930_v28 = vsel %vm47_vm1, %v3898_v20, -inf  ;;  %v3893_v44 = vadd.f32 %v6119_v61, %v3892_v26 }
0x1991   :  { %3955 = vadd.xlane.f32.xlu1 %v3954_v27  ;;  %3931 = vmax.xlane.f32.xlu0 %v3930_v28  ;;  %v5031_v29 = vpop.f32.mrf.mxu1 }
0x1992   :  { %v3908_v30 = vadd.f32 %v5031_v29, %v6119_v61  ;;  %v3951_v23 = vsel %vm47_vm1, %v3893_v44, 0.0  ;;  %v3927_v52 = vsel %vm47_vm1, %v3893_v44, -inf  ;;  %v3492_v44 = vld [vmem:[%s6222_s3 + $0x38] sm:$0xff] }
0x1993   :  { %v3902_v35 = vpop.f32.mrf.mxu1 }
0x1994   :  { %v3903_v31 = vadd.f32 %v6119_v61, %v3902_v35  ;;  %v3960_v34 = vsel %vm47_vm1, %v3908_v30, 0.0  ;;  %v3936_v32 = vsel %vm47_vm1, %v3908_v30, -inf }
0x1995   :  { %3961 = vadd.xlane.f32.xlu1 %v3960_v34  ;;  %3937 = vmax.xlane.f32.xlu0 %v3936_v32  ;;  %v5034_v33 = vpop.f32.mrf.mxu1 }
0x1996   :  { %v3918_v39 = vadd.f32 %v5034_v33, %v6119_v61  ;;  %v3957_v40 = vsel %vm47_vm1, %v3903_v31, 0.0  ;;  %v3933_v17 = vsel %vm47_vm1, %v3903_v31, -inf  ;;  %v3502_v33 = vld [vmem:[%s6225_s6 + $0x8] sm:$0xf] }
0x1997   :  { %v3912_v41 = vpop.f32.mrf.mxu1 }
0x1998   :  { %v3942_v38 = vsel %vm47_vm1, %v3918_v39, -inf  ;;  %v3966_v43 = vsel %vm47_vm1, %v3918_v39, 0.0  ;;  %v3913_v45 = vadd.f32 %v6119_v61, %v3912_v41  ;;  %v4054_v39 = vpop.f32.mrf.mxu0 }
0x1999   :  { %3958 = vadd.xlane.f32.xlu1 %v3957_v40  ;;  %3934 = vmax.xlane.f32.xlu0 %v3933_v17  ;;  %v4127_v17 = vpop.f32.mrf.mxu1 }
0x199a   :  { %v3963_v6 = vsel %vm47_vm1, %v3913_v45, 0.0  ;;  %v3939_v51 = vsel %vm47_vm1, %v3913_v45, -inf  ;;  %v5053_v40 = vpop.f32.mrf.mxu0  ;;  %v4128_v41 = vadd.f32 %v6119_v61, %v4127_v17  ;;  %v3491_v45 = vld [vmem:[%s6222_s3 + $0x30] sm:$0xff] }
0x199d   :  { %3943 = vmax.xlane.f32.xlu1 %v3942_v38  ;;  %3967 = vadd.xlane.f32.xlu0 %v3966_v43  ;;  %v5072_v38 = vpop.f32.mrf.mxu1  ;;  %v3493_v43 = vld [vmem:[%s6222_s3 + $0x40] sm:$0xf] }
0x199e   :  { %5093 = vmatpush3.msk.msra.mxu1 %vm72_vm0, %v3493_v43 }
0x199f   :  { %5094 = vmatprep.subr.mxu1 %v5271_v3 }
0x19a0   :  { %5095 = vmatpush3.msra.mxu1 %v3492_v44 }
0x19a1   :  { %3964 = vadd.xlane.f32.xlu0 %v3963_v6  ;;  %3952 = vadd.xlane.f32.xlu1 %v3951_v23  ;;  %v3489_v6 = vld [vmem:[%s6222_s3 + $0x20] sm:$0xff] }
0x19a2   :  { %5096 = vmatprep.subr.mxu1 %v5271_v3 }
0x19a3   :  { %5097 = vmatpush3.msra.mxu1 %v3491_v45 }
0x19a4   :  { %5098 = vmatprep.subr.mxu1 %v5271_v3 }
0x19a5   :  { %3940 = vmax.xlane.f32.xlu0 %v3939_v51  ;;  %3949 = vadd.xlane.f32.xlu1 %v3948_v60 }
0x19a6   :  { %5099 = vmatpush3.msra.mxu1 %v3490_v5 }
0x19a7   :  { %5100 = vmatprep.subr.mxu1 %v5271_v3 }
0x19a8   :  { %5101 = vmatpush3.msra.mxu1 %v3489_v6 }
0x19a9   :  { %3928 = vmax.xlane.f32.xlu0 %v3927_v52  ;;  %3946 = vadd.xlane.f32.xlu1 %v3945_v11 }
0x19ad   :  { %3925 = vmax.xlane.f32.xlu0 %v3924_v0 }
0x19b1   :  { %3922 = vmax.xlane.f32.xlu0 %v3921_v48  ;;  %v4537_v48 = vld [vmem:[%s6223_s4 + $0x3] ss:$0 sm:$0xff] }
0x19c7   :  { %4221 = vrot.lane.b32.xlu0 %v4128_v41, %s5273_s18 }
0x1a1a   :  { %v3956_v49 = vpop.xlane.xlu1 %3955  ;;  %v3932_v50 = vpop.xlane.xlu0 %3931 }
0x1a1b   :  { %v3972_v8 = vmul.f32 0.083333336, %v3956_v49 }
0x1a1d   :  { %v3980_v22 = vadd.f32 %v3972_v8, %v3932_v50 }
0x1a1e   :  { %v3962_v53 = vpop.xlane.xlu1 %3961  ;;  %v3938_v55 = vpop.xlane.xlu0 %3937 }
0x1a1f   :  { %v3974_v63 = vmul.f32 0.083333336, %v3962_v53  ;;  %v4138_v27 = vmul.f32 %v4535_v10, %v3980_v22 }
0x1a21   :  { %v3982_v9 = vadd.f32 %v3974_v63, %v3938_v55  ;;  %v4540_v55 = vld [vmem:[%s6223_s4 + $0x4] ss:$0 sm:$0xff] }
0x1a22   :  { %v3959_v54 = vpop.xlane.xlu1 %3958  ;;  %v3935_v12 = vpop.xlane.xlu0 %3934 }
0x1a23   :  { %v3973_v7 = vmul.f32 0.083333336, %v3959_v54  ;;  %v4140_v24 = vmul.f32 %v4535_v10, %v3982_v9 }
0x1a25   :  { %v3981_v59 = vadd.f32 %v3973_v7, %v3935_v12 }
0x1a26   :  { %v3944_v57 = vpop.xlane.xlu1 %3943  ;;  %v3968_v58 = vpop.xlane.xlu0 %3967 }
0x1a27   :  { %v3976_v1 = vmul.f32 0.083333336, %v3968_v58  ;;  %v4139_v62 = vmul.f32 %v4535_v10, %v3981_v59 }
0x1a29   :  { %v3984_v18 = vadd.f32 %v3976_v1, %v3944_v57 }
0x1a2a   :  { %v3965_v56 = vpop.xlane.xlu0 %3964  ;;  %v3953_v4 = vpop.xlane.xlu1 %3952 }
0x1a2b   :  { %v4142_v2 = vmul.f32 %v4535_v10, %v3984_v18  ;;  %v3975_v21 = vmul.f32 0.083333336, %v3965_v56  ;;  %v3971_v46 = vmul.f32 0.083333336, %v3953_v4 }
0x1a2d   :  { %5074 = vmatpush3.msra.mxu0 %v4142_v2 }
0x1a2e   :  { %v3941_v42 = vpop.xlane.xlu0 %3940  ;;  %5075 = vmatprep.subr.mxu0 %v5271_v3  ;;  %v3950_v15 = vpop.xlane.xlu1 %3949 }
0x1a2f   :  { %v3983_v13 = vadd.f32 %v3975_v21, %v3941_v42  ;;  %v3970_v47 = vmul.f32 0.083333336, %v3950_v15 }
0x1a31   :  { %v4141_v16 = vmul.f32 %v4535_v10, %v3983_v13 }
0x1a32   :  { %v3929_v19 = vpop.xlane.xlu0 %3928  ;;  %v3947_v20 = vpop.xlane.xlu1 %3946 }
0x1a33   :  { %5076 = vmatpush3.msra.mxu0 %v4141_v16  ;;  %v3979_v14 = vadd.f32 %v3971_v46, %v3929_v19  ;;  %v3969_v30 = vmul.f32 0.083333336, %v3947_v20 }
0x1a34   :  { %5077 = vmatprep.subr.mxu0 %v5271_v3 }
0x1a35   :  { %5078 = vmatpush3.msra.mxu0 %v4140_v24  ;;  %v4137_v29 = vmul.f32 %v4535_v10, %v3979_v14 }
0x1a36   :  { %5079 = vmatprep.subr.mxu0 %v5271_v3  ;;  %v3926_v26 = vpop.xlane.xlu0 %3925 }
0x1a37   :  { %v3978_v28 = vadd.f32 %v3970_v47, %v3926_v26  ;;  %5080 = vmatpush3.msra.mxu0 %v4139_v62 }
0x1a38   :  { %5081 = vmatprep.subr.mxu0 %v5271_v3 }
0x1a39   :  { %5082 = vmatpush3.msra.mxu0 %v4138_v27  ;;  %v4136_v31 = vmul.f32 %v4535_v10, %v3978_v28 }
0x1a3a   :  { %5083 = vmatprep.subr.mxu0 %v5271_v3  ;;  %v3923_v35 = vpop.xlane.xlu0 %3922 }
0x1a3b   :  { %v3977_v34 = vadd.f32 %v3969_v30, %v3923_v35  ;;  %5084 = vmatpush3.msra.mxu0 %v4137_v29 }
0x1a3c   :  { %5085 = vmatprep.subr.mxu0 %v5271_v3 }
0x1a3d   :  { %v4135_v32 = vmul.f32 %v4535_v10, %v3977_v34  ;;  %5086 = vmatpush3.msra.mxu0 %v4136_v31 }
0x1a3e   :  { %5087 = vmatprep.subr.mxu0 %v5271_v3  ;;  %v4222_v60 = vpop.permute.xlu0 %4221 }
0x1a3f   :  { %5088 = vmatpush3.msra.mxu0 %v4135_v32 }
0x1a40   :  { %5090 = vmatmul.mubr.msk.f32.vlgmr.msra.gmra.mxu0 %vm3791_vm7, %v3502_v33  ;;  %5105 = vmatprep.subr.mxu0 %v5271_v3 }
0x1a41   :  { %5109 = vmatprep.mubr.msk.f32.mxu0 %vm5285_vm8, %v5271_v3  ;;  %5106 = vmatpush3.msk.msra.mxu0 %vm72_vm0, %v3495_v37 }
0x1a42   :  { %5107 = vmatprep.subr.mxu0 %v5271_v3 }
0x1b00   :  { %v4212_v23 = vpop.f32.mrf.mxu0 }
0x1b01   :  { %v4213_v25 = vadd.f32 %v6119_v61, %v4212_v23  ;;  %v3494_v61 = vld [vmem:[%s6222_s3 + $0x50] sm:$0xff] }
0x1b02   :  { %v5091_v51 = vpop.f32.mrf.mxu0  ;;  %5108 = vmatpush3.msra.mxu0 %v3494_v61 }
0x1b03   :  { %4217 = vrot.lane.b32.xlu1 %v4213_v25, %s5275_s24 }
0x1b75   :  { %v4218_v52 = vpop.permute.xlu1 %4217 }
0x1b76   :  { %v4224_v11 = vsel %vm47_vm1, %v4054_v39, %v4218_v52 }
0x1b77   :  { %v4226_v0 = vsel %vm4225_vm9, %v4224_v11, %v4222_v60 }
0x1b78   :  { %v4227_v36 = vmax.f32 %v4226_v0, 0.0 }
0x1b7a   :  { %5103 = vmatmul.mubr.msk.f32.vlgmr.msra.gmra.mxu1 %vm181_vm2, %v4227_v36 }
0x1c3a   :  { %v4304_v49 = vpop.f32.mrf.mxu1 }
0x1c3b   :  { %v4305_v50 = vadd.f32 %v4537_v48, %v4304_v49 }
0x1c3c   :  { %v5104_v53 = vpop.f32.mrf.mxu1 }
0x1c3d   :  { %5110 = vmatmul.mubr.msk.f32.vlgmr.msra.gmra.mxu0 %vm47_vm1, %v4305_v50 }
0x1cfd   :  { %v4384_v54 = vpop.f32.mrf.mxu0 }
0x1cfe   :  { %v4385_v3 = vadd.f32 %v4540_v55, %v4384_v54 }
0x1cff   :  { %v5111_v12 = vpop.f32.mrf.mxu0 }
0x1d00   :  { %4389 = vst.msk [vmem:[%s6226_s7] sm:$0xf] %vm4388_vm10, %v4385_v3 }

</bundles_post_ra>
